<compile_context>
chip_gen: v7x
topology: tpu7x:2x2x1
jax: 0.10.0
libtpu: 0.0.40
codegen_flags: <defaults>
</compile_context>

<pallas_src>
import functools

import jax
import jax.numpy as jnp
from jax.experimental import pallas as pl
from jax.experimental.pallas import tpu as pltpu


# ---------------------------------------------------------------------------
# Kernel 1: fused matmul (+ folded BN bias) + ReLU
# ---------------------------------------------------------------------------
def _mm_bias_relu_kernel(a_ref, w_ref, b_ref, o_ref):
    acc = jnp.dot(a_ref[...], w_ref[...], preferred_element_type=jnp.float32)
    acc = acc + b_ref[...]
    o_ref[...] = jnp.maximum(acc, 0.0).astype(o_ref.dtype)


def matmul_bias_relu(a, w, bias, out_dtype=jnp.bfloat16, max_tm=1024):
    """o = relu(a @ w + bias); a:(M,K) bf16, w:(K,N) bf16, bias:(1,N) f32."""
    M, K = a.shape
    _, N = w.shape
    # Pick an M tile that divides M exactly (no host-side pad / output slice).
    if M <= max_tm:
        tm = M                      # one full block: always a legal block shape
    else:
        tm = max_tm
        while tm >= 8 and M % tm:
            tm //= 2
        if tm < 8 or M % tm:
            tm = M                  # fallback: single full block
    grid = (M // tm,)

    cost = pl.CostEstimate(
        flops=2 * M * K * N,
        transcendentals=0,
        bytes_accessed=(M * K * a.dtype.itemsize
                        + K * N * w.dtype.itemsize
                        + N * bias.dtype.itemsize
                        + M * N * jnp.dtype(out_dtype).itemsize),
    )
    return pl.pallas_call(
        _mm_bias_relu_kernel,
        out_shape=jax.ShapeDtypeStruct((M, N), out_dtype),
        grid=grid,
        in_specs=[
            pl.BlockSpec((tm, K), lambda i: (i, 0)),
            pl.BlockSpec((K, N), lambda i: (0, 0)),
            pl.BlockSpec((1, N), lambda i: (0, 0)),
        ],
        out_specs=pl.BlockSpec((tm, N), lambda i: (i, 0)),
        compiler_params=pltpu.CompilerParams(
            dimension_semantics=("parallel",),
            vmem_limit_bytes=32 * 1024 * 1024),
        cost_estimate=cost,
    )(a, w, bias)


# ---------------------------------------------------------------------------
# im2col helpers (XLA-side layout prep, bf16, low amplification)
# ---------------------------------------------------------------------------
def im2col_s2d(x):
    """im2col for a 4x4 / stride-2 / pad-1 conv via space-to-depth.

    x: (N, H, W, C) with H, W even.
    Returns cols (N*OH*OW, 16*C) with K ordered (di, dj, ri, rj, c), OH, OW.
    Only 4x data expansion (vs 16x for direct im2col).
    """
    n, h, w, c = x.shape
    oh, ow = h // 2, w // 2
    xp = jnp.pad(x, ((0, 0), (1, 1), (1, 1), (0, 0)))
    s2d = xp.reshape(n, oh + 1, 2, ow + 1, 2, c)
    s2d = jnp.transpose(s2d, (0, 1, 3, 2, 4, 5)).reshape(n, oh + 1, ow + 1, 4 * c)
    cols = jnp.concatenate(
        [s2d[:, di:di + oh, dj:dj + ow, :] for di in (0, 1) for dj in (0, 1)],
        axis=-1)                                     # (N, OH, OW, 16*C)
    return cols.reshape(n * oh * ow, 16 * c), oh, ow


def conv_weight_s2d(w_oihw):
    """(Cout, Cin, 4, 4) -> (16*Cin, Cout) matching im2col_s2d's K ordering."""
    cout, cin, kh, kw = w_oihw.shape
    w = jnp.transpose(w_oihw, (2, 3, 1, 0))          # (i, j, c, co)
    w = w.reshape(2, 2, 2, 2, cin, cout)             # (di, ri, dj, rj, c, co)
    w = jnp.transpose(w, (0, 2, 1, 3, 4, 5))         # (di, dj, ri, rj, c, co)
    return w.reshape(16 * cin, cout)


def im2col_generic(x, kh, kw, stride, pad):
    """Generic im2col (rows ordered (kh, kw, c)). Used for the 4x4/s1/p0 conv
    (no expansion there: output is 1x1 so it is just a patch flatten)."""
    x = jnp.pad(x, ((0, 0), (pad, pad), (pad, pad), (0, 0)))
    n, h, w, c = x.shape
    oh = (h - kh) // stride + 1
    ow = (w - kw) // stride + 1
    cols = []
    for i in range(kh):
        for j in range(kw):
            cols.append(x[:, i:i + stride * oh:stride, j:j + stride * ow:stride, :])
    cols = jnp.concatenate(cols, axis=-1)            # (N, OH, OW, kh*kw*C)
    return cols.reshape(n * oh * ow, kh * kw * c), oh, ow


def conv_bn_relu(x, w_oihw, bn_scale, bn_bias, stride, pad):
    """PyTorch Conv2d (OIHW weight, no conv bias) + eval BN + ReLU, NHWC x."""
    n = x.shape[0]
    cout, cin, kh, kw = w_oihw.shape
    if (stride == 2 and pad == 1 and kh == 4 and kw == 4
            and x.shape[1] % 2 == 0 and x.shape[2] % 2 == 0):
        cols, oh, ow = im2col_s2d(x)
        w_mat = conv_weight_s2d(w_oihw)
    else:
        cols, oh, ow = im2col_generic(x, kh, kw, stride, pad)
        w_mat = jnp.transpose(w_oihw, (2, 3, 1, 0)).reshape(kh * kw * cin, cout)
    # Fold eval-mode BN scale into the weights (f32), then cast to bf16 for MXU.
    w_mat = (w_mat.astype(jnp.float32) * bn_scale.reshape(1, -1)).astype(jnp.bfloat16)
    bias = bn_bias.reshape(1, -1).astype(jnp.float32)
    y = matmul_bias_relu(cols.astype(jnp.bfloat16), w_mat, bias)
    return y.reshape(n, oh, ow, cout)


# ---------------------------------------------------------------------------
# Kernel 2: l2_norm + Linear + Sigmoid head (all f32 elementwise)
# ---------------------------------------------------------------------------
def _head_kernel(h_ref, w_ref, b_ref, feat_ref, out_ref, *, alpha):
    h = h_ref[...].astype(jnp.float32)
    normp = jnp.sum(h * h, axis=1, keepdims=True) + 1e-10
    feat = h * jax.lax.rsqrt(normp)                  # l2_norm via EUP rsqrt
    feat_ref[...] = (feat * alpha).astype(feat_ref.dtype)
    # As in the reference: fc is applied to the *un-scaled* normalized feat.
    logits = jnp.dot(feat, w_ref[...], preferred_element_type=jnp.float32)
    logits = logits + b_ref[...]
    out_ref[...] = pl.reciprocal(1.0 + jnp.exp(-logits),
                                 approx=True).astype(out_ref.dtype)


def l2norm_fc_sigmoid(h, w_fc_t, b_fc, alpha):
    bs, dim = h.shape
    n_class = w_fc_t.shape[1]
    cost = pl.CostEstimate(
        flops=2 * bs * dim * n_class + 6 * bs * dim,
        transcendentals=bs * n_class + bs,
        bytes_accessed=(h.size * h.dtype.itemsize
                        + w_fc_t.size * w_fc_t.dtype.itemsize
                        + n_class * 4 + bs * dim * 4 + bs * n_class * 4),
    )
    feat, out = pl.pallas_call(
        functools.partial(_head_kernel, alpha=alpha),
        out_shape=(jax.ShapeDtypeStruct((bs, dim), jnp.float32),
                   jax.ShapeDtypeStruct((bs, n_class), jnp.float32)),
        cost_estimate=cost,
    )(h, w_fc_t, b_fc.reshape(1, -1))
    return feat, out


# ---------------------------------------------------------------------------
# Parameter init (deterministic, synthetic) + full forward
# ---------------------------------------------------------------------------
def init_params(key, n_class, nc=3, dim=100):
    nf = 32
    shapes = [(nc, nf), (nf, nf * 2), (nf * 2, nf * 4), (nf * 4, nf * 4), (nf * 4, dim)]
    strides_pads = [(2, 1)] * 4 + [(1, 0)]
    conv_params = []
    for (cin, cout), (stride, pad) in zip(shapes, strides_pads):
        key, k1, k2, k3, k4, k5 = jax.random.split(key, 6)
        w = jax.random.normal(k1, (cout, cin, 4, 4), jnp.float32) * 0.05
        gamma = 1.0 + 0.1 * jax.random.normal(k2, (cout,), jnp.float32)
        beta = 0.1 * jax.random.normal(k3, (cout,), jnp.float32)
        rmean = 0.1 * jax.random.normal(k4, (cout,), jnp.float32)
        rvar = 1.0 + 0.1 * jnp.abs(jax.random.normal(k5, (cout,), jnp.float32))
        # eval-mode BatchNorm folded to scale/bias
        scale = gamma / jnp.sqrt(rvar + 1e-5)
        bias = beta - rmean * scale
        conv_params.append(dict(w=w, scale=scale, bias=bias, stride=stride, pad=pad))
    key, k1, k2 = jax.random.split(key, 3)
    w_fc = jax.random.normal(k1, (n_class, dim), jnp.float32) * 0.05  # (out, in) like nn.Linear
    b_fc = 0.05 * jax.random.normal(k2, (n_class,), jnp.float32)
    return conv_params, w_fc, b_fc


def facenet_forward(x_nchw, conv_params, w_fc, b_fc, alpha=1.0):
    x = jnp.transpose(x_nchw, (0, 2, 3, 1)).astype(jnp.bfloat16)  # NCHW -> NHWC, bf16
    for p in conv_params:
        x = conv_bn_relu(x, p["w"], p["scale"], p["bias"], p["stride"], p["pad"])
    bs = x.shape[0]
    h = x.reshape(bs, -1)  # last conv gives 1x1 spatial -> (bs, dim)
    feat_alpha, out = l2norm_fc_sigmoid(h, w_fc.T, b_fc, alpha)
    return feat_alpha, out


if __name__ == "__main__":
    n_class, nc, dim = 10, 3, 64
    key = jax.random.PRNGKey(0)
    kp, kx = jax.random.split(key)
    conv_params, w_fc, b_fc = init_params(kp, n_class, nc=nc, dim=dim)
    # input must be 64x64 so the final 4x4/s1/p0 conv yields 1x1 spatial
    x = jax.random.normal(kx, (2, nc, 64, 64), jnp.float32)

    fwd = jax.jit(lambda xx: facenet_forward(xx, conv_params, w_fc, b_fc, alpha=1.0))
    feat, out = fwd(x)
    jax.block_until_ready((feat, out))
    assert feat.shape == (2, dim) and out.shape == (2, n_class)
    assert bool(jnp.all(jnp.isfinite(feat))) and bool(jnp.all(jnp.isfinite(out)))
    print("KERNEL_OK")
</pallas_src>

<mosaic_0001>
module attributes {stable_mosaic.version = 11 : i64} {
  func.func @_mm_bias_relu_kernel(%arg0: i32, %arg1: memref<1024x48xbf16, #tpu.memory_space<vmem>>, %arg2: memref<48x32xbf16, #tpu.memory_space<vmem>>, %arg3: memref<1x32xf32, #tpu.memory_space<vmem>>, %arg4: memref<1024x32xbf16, #tpu.memory_space<vmem>>) attributes {dimension_semantics = [#tpu.dimension_semantics<parallel>], iteration_bounds = array<i64: 2>, scalar_prefetch = 0 : i64, scratch_operands = 0 : i64, tpu.core_type = #tpu.core_type<tc>, window_params = [{transform_indices = @transform_0, window_bounds = array<i64: 1024, 48>}, {pipeline_mode = #tpu.pipeline_mode<synchronous>, transform_indices = @transform_1, window_bounds = array<i64: 48, 32>}, {pipeline_mode = #tpu.pipeline_mode<synchronous>, transform_indices = @transform_2, window_bounds = array<i64: 1, 32>}, {transform_indices = @transform_3, window_bounds = array<i64: 1024, 32>}]} {
    %c0 = arith.constant 0 : index
    %c0_0 = arith.constant 0 : index
    %0 = vector.load %arg1[%c0, %c0_0] : memref<1024x48xbf16, #tpu.memory_space<vmem>>, vector<1024x48xbf16>
    %c0_1 = arith.constant 0 : index
    %c0_2 = arith.constant 0 : index
    %1 = vector.load %arg2[%c0_1, %c0_2] : memref<48x32xbf16, #tpu.memory_space<vmem>>, vector<48x32xbf16>
    %cst = arith.constant dense<0.000000e+00> : vector<1024x32xf32>
    %2 = tpu.matmul %0, %1, %cst {dimension_numbers = #tpu.dot_dimension_numbers<[1], [0], [0], [1], [0, 0, 1, 1], [], []>} : vector<1024x48xbf16>, vector<48x32xbf16>, vector<1024x32xf32> -> vector<1024x32xf32>
    %c0_3 = arith.constant 0 : index
    %c0_4 = arith.constant 0 : index
    %3 = vector.load %arg3[%c0_3, %c0_4] : memref<1x32xf32, #tpu.memory_space<vmem>>, vector<1x32xf32>
    %4 = vector.broadcast %3 : vector<1x32xf32> to vector<1024x32xf32>
    %5 = arith.addf %2, %4 : vector<1024x32xf32>
    %cst_5 = arith.constant 0.000000e+00 : f32
    %6 = vector.broadcast %cst_5 : f32 to vector<1024x32xf32>
    %7 = arith.maximumf %5, %6 : vector<1024x32xf32>
    %8 = arith.truncf %7 : vector<1024x32xf32> to vector<1024x32xbf16>
    %c0_6 = arith.constant 0 : index
    %c0_7 = arith.constant 0 : index
    %9 = vector.load %arg4[%c0_6, %c0_7] : memref<1024x32xbf16, #tpu.memory_space<vmem>>, vector<1024x32xbf16>
    tpu.vector_store %arg4[%c0_6, %c0_7], %8 {strides = array<i32>} : memref<1024x32xbf16, #tpu.memory_space<vmem>>, vector<1024x32xbf16>,
    return
  }
  func.func @transform_0(%arg0: i32) -> (i32, i32) {
    %c0_i32 = arith.constant 0 : i32
    %c0_i32_0 = arith.constant 0 : i32
    return %arg0, %c0_i32 : i32, i32
  }
  func.func @transform_1(%arg0: i32) -> (i32, i32) {
    %c0_i32 = arith.constant 0 : i32
    %c0_i32_0 = arith.constant 0 : i32
    %c0_i32_1 = arith.constant 0 : i32
    return %c0_i32, %c0_i32_0 : i32, i32
  }
  func.func @transform_2(%arg0: i32) -> (i32, i32) {
    %c0_i32 = arith.constant 0 : i32
    %c0_i32_0 = arith.constant 0 : i32
    %c0_i32_1 = arith.constant 0 : i32
    return %c0_i32, %c0_i32_0 : i32, i32
  }
  func.func @transform_3(%arg0: i32) -> (i32, i32) {
    %c0_i32 = arith.constant 0 : i32
    %c0_i32_0 = arith.constant 0 : i32
    return %arg0, %c0_i32 : i32, i32
  }
}

module attributes {stable_mosaic.version = 11 : i64} {
  func.func @_mm_bias_relu_kernel(%arg0: i32, %arg1: memref<512x512xbf16, #tpu.memory_space<vmem>>, %arg2: memref<512x64xbf16, #tpu.memory_space<vmem>>, %arg3: memref<1x64xf32, #tpu.memory_space<vmem>>, %arg4: memref<512x64xbf16, #tpu.memory_space<vmem>>) attributes {dimension_semantics = [#tpu.dimension_semantics<parallel>], iteration_bounds = array<i64: 1>, scalar_prefetch = 0 : i64, scratch_operands = 0 : i64, tpu.core_type = #tpu.core_type<tc>, window_params = [{transform_indices = @transform_0, window_bounds = array<i64: 512, 512>}, {pipeline_mode = #tpu.pipeline_mode<synchronous>, transform_indices = @transform_1, window_bounds = array<i64: 512, 64>}, {pipeline_mode = #tpu.pipeline_mode<synchronous>, transform_indices = @transform_2, window_bounds = array<i64: 1, 64>}, {transform_indices = @transform_3, window_bounds = array<i64: 512, 64>}]} {
    %c0 = arith.constant 0 : index
    %c0_0 = arith.constant 0 : index
    %0 = vector.load %arg1[%c0, %c0_0] : memref<512x512xbf16, #tpu.memory_space<vmem>>, vector<512x512xbf16>
    %c0_1 = arith.constant 0 : index
    %c0_2 = arith.constant 0 : index
    %1 = vector.load %arg2[%c0_1, %c0_2] : memref<512x64xbf16, #tpu.memory_space<vmem>>, vector<512x64xbf16>
    %cst = arith.constant dense<0.000000e+00> : vector<512x64xf32>
    %2 = tpu.matmul %0, %1, %cst {dimension_numbers = #tpu.dot_dimension_numbers<[1], [0], [0], [1], [0, 0, 1, 1], [], []>} : vector<512x512xbf16>, vector<512x64xbf16>, vector<512x64xf32> -> vector<512x64xf32>
    %c0_3 = arith.constant 0 : index
    %c0_4 = arith.constant 0 : index
    %3 = vector.load %arg3[%c0_3, %c0_4] : memref<1x64xf32, #tpu.memory_space<vmem>>, vector<1x64xf32>
    %4 = vector.broadcast %3 : vector<1x64xf32> to vector<512x64xf32>
    %5 = arith.addf %2, %4 : vector<512x64xf32>
    %cst_5 = arith.constant 0.000000e+00 : f32
    %6 = vector.broadcast %cst_5 : f32 to vector<512x64xf32>
    %7 = arith.maximumf %5, %6 : vector<512x64xf32>
    %8 = arith.truncf %7 : vector<512x64xf32> to vector<512x64xbf16>
    %c0_6 = arith.constant 0 : index
    %c0_7 = arith.constant 0 : index
    %9 = vector.load %arg4[%c0_6, %c0_7] : memref<512x64xbf16, #tpu.memory_space<vmem>>, vector<512x64xbf16>
    tpu.vector_store %arg4[%c0_6, %c0_7], %8 {strides = array<i32>} : memref<512x64xbf16, #tpu.memory_space<vmem>>, vector<512x64xbf16>,
    return
  }
  func.func @transform_0(%arg0: i32) -> (i32, i32) {
    %c0_i32 = arith.constant 0 : i32
    %c0_i32_0 = arith.constant 0 : i32
    return %arg0, %c0_i32 : i32, i32
  }
  func.func @transform_1(%arg0: i32) -> (i32, i32) {
    %c0_i32 = arith.constant 0 : i32
    %c0_i32_0 = arith.constant 0 : i32
    %c0_i32_1 = arith.constant 0 : i32
    return %c0_i32, %c0_i32_0 : i32, i32
  }
  func.func @transform_2(%arg0: i32) -> (i32, i32) {
    %c0_i32 = arith.constant 0 : i32
    %c0_i32_0 = arith.constant 0 : i32
    %c0_i32_1 = arith.constant 0 : i32
    return %c0_i32, %c0_i32_0 : i32, i32
  }
  func.func @transform_3(%arg0: i32) -> (i32, i32) {
    %c0_i32 = arith.constant 0 : i32
    %c0_i32_0 = arith.constant 0 : i32
    return %arg0, %c0_i32 : i32, i32
  }
}

module attributes {stable_mosaic.version = 11 : i64} {
  func.func @_mm_bias_relu_kernel(%arg0: i32, %arg1: memref<128x1024xbf16, #tpu.memory_space<vmem>>, %arg2: memref<1024x128xbf16, #tpu.memory_space<vmem>>, %arg3: memref<1x128xf32, #tpu.memory_space<vmem>>, %arg4: memref<128x128xbf16, #tpu.memory_space<vmem>>) attributes {dimension_semantics = [#tpu.dimension_semantics<parallel>], iteration_bounds = array<i64: 1>, scalar_prefetch = 0 : i64, scratch_operands = 0 : i64, tpu.core_type = #tpu.core_type<tc>, window_params = [{transform_indices = @transform_0, window_bounds = array<i64: 128, 1024>}, {pipeline_mode = #tpu.pipeline_mode<synchronous>, transform_indices = @transform_1, window_bounds = array<i64: 1024, 128>}, {pipeline_mode = #tpu.pipeline_mode<synchronous>, transform_indices = @transform_2, window_bounds = array<i64: 1, 128>}, {transform_indices = @transform_3, window_bounds = array<i64: 128, 128>}]} {
    %c0 = arith.constant 0 : index
    %c0_0 = arith.constant 0 : index
    %0 = vector.load %arg1[%c0, %c0_0] : memref<128x1024xbf16, #tpu.memory_space<vmem>>, vector<128x1024xbf16>
    %c0_1 = arith.constant 0 : index
    %c0_2 = arith.constant 0 : index
    %1 = vector.load %arg2[%c0_1, %c0_2] : memref<1024x128xbf16, #tpu.memory_space<vmem>>, vector<1024x128xbf16>
    %cst = arith.constant dense<0.000000e+00> : vector<128x128xf32>
    %2 = tpu.matmul %0, %1, %cst {dimension_numbers = #tpu.dot_dimension_numbers<[1], [0], [0], [1], [0, 0, 1, 1], [], []>} : vector<128x1024xbf16>, vector<1024x128xbf16>, vector<128x128xf32> -> vector<128x128xf32>
    %c0_3 = arith.constant 0 : index
    %c0_4 = arith.constant 0 : index
    %3 = vector.load %arg3[%c0_3, %c0_4] : memref<1x128xf32, #tpu.memory_space<vmem>>, vector<1x128xf32>
    %4 = vector.broadcast %3 : vector<1x128xf32> to vector<128x128xf32>
    %5 = arith.addf %2, %4 : vector<128x128xf32>
    %cst_5 = arith.constant 0.000000e+00 : f32
    %6 = vector.broadcast %cst_5 : f32 to vector<128x128xf32>
    %7 = arith.maximumf %5, %6 : vector<128x128xf32>
    %8 = arith.truncf %7 : vector<128x128xf32> to vector<128x128xbf16>
    %c0_6 = arith.constant 0 : index
    %c0_7 = arith.constant 0 : index
    %9 = vector.load %arg4[%c0_6, %c0_7] : memref<128x128xbf16, #tpu.memory_space<vmem>>, vector<128x128xbf16>
    tpu.vector_store %arg4[%c0_6, %c0_7], %8 {strides = array<i32>} : memref<128x128xbf16, #tpu.memory_space<vmem>>, vector<128x128xbf16>,
    return
  }
  func.func @transform_0(%arg0: i32) -> (i32, i32) {
    %c0_i32 = arith.constant 0 : i32
    %c0_i32_0 = arith.constant 0 : i32
    return %arg0, %c0_i32 : i32, i32
  }
  func.func @transform_1(%arg0: i32) -> (i32, i32) {
    %c0_i32 = arith.constant 0 : i32
    %c0_i32_0 = arith.constant 0 : i32
    %c0_i32_1 = arith.constant 0 : i32
    return %c0_i32, %c0_i32_0 : i32, i32
  }
  func.func @transform_2(%arg0: i32) -> (i32, i32) {
    %c0_i32 = arith.constant 0 : i32
    %c0_i32_0 = arith.constant 0 : i32
    %c0_i32_1 = arith.constant 0 : i32
    return %c0_i32, %c0_i32_0 : i32, i32
  }
  func.func @transform_3(%arg0: i32) -> (i32, i32) {
    %c0_i32 = arith.constant 0 : i32
    %c0_i32_0 = arith.constant 0 : i32
    return %arg0, %c0_i32 : i32, i32
  }
}

module attributes {stable_mosaic.version = 11 : i64} {
  func.func @_mm_bias_relu_kernel(%arg0: i32, %arg1: memref<32x2048xbf16, #tpu.memory_space<vmem>>, %arg2: memref<2048x128xbf16, #tpu.memory_space<vmem>>, %arg3: memref<1x128xf32, #tpu.memory_space<vmem>>, %arg4: memref<32x128xbf16, #tpu.memory_space<vmem>>) attributes {dimension_semantics = [#tpu.dimension_semantics<parallel>], iteration_bounds = array<i64: 1>, scalar_prefetch = 0 : i64, scratch_operands = 0 : i64, tpu.core_type = #tpu.core_type<tc>, window_params = [{transform_indices = @transform_0, window_bounds = array<i64: 32, 2048>}, {pipeline_mode = #tpu.pipeline_mode<synchronous>, transform_indices = @transform_1, window_bounds = array<i64: 2048, 128>}, {pipeline_mode = #tpu.pipeline_mode<synchronous>, transform_indices = @transform_2, window_bounds = array<i64: 1, 128>}, {transform_indices = @transform_3, window_bounds = array<i64: 32, 128>}]} {
    %c0 = arith.constant 0 : index
    %c0_0 = arith.constant 0 : index
    %0 = vector.load %arg1[%c0, %c0_0] : memref<32x2048xbf16, #tpu.memory_space<vmem>>, vector<32x2048xbf16>
    %c0_1 = arith.constant 0 : index
    %c0_2 = arith.constant 0 : index
    %1 = vector.load %arg2[%c0_1, %c0_2] : memref<2048x128xbf16, #tpu.memory_space<vmem>>, vector<2048x128xbf16>
    %cst = arith.constant dense<0.000000e+00> : vector<32x128xf32>
    %2 = tpu.matmul %0, %1, %cst {dimension_numbers = #tpu.dot_dimension_numbers<[1], [0], [0], [1], [0, 0, 1, 1], [], []>} : vector<32x2048xbf16>, vector<2048x128xbf16>, vector<32x128xf32> -> vector<32x128xf32>
    %c0_3 = arith.constant 0 : index
    %c0_4 = arith.constant 0 : index
    %3 = vector.load %arg3[%c0_3, %c0_4] : memref<1x128xf32, #tpu.memory_space<vmem>>, vector<1x128xf32>
    %4 = vector.broadcast %3 : vector<1x128xf32> to vector<32x128xf32>
    %5 = arith.addf %2, %4 : vector<32x128xf32>
    %cst_5 = arith.constant 0.000000e+00 : f32
    %6 = vector.broadcast %cst_5 : f32 to vector<32x128xf32>
    %7 = arith.maximumf %5, %6 : vector<32x128xf32>
    %8 = arith.truncf %7 : vector<32x128xf32> to vector<32x128xbf16>
    %c0_6 = arith.constant 0 : index
    %c0_7 = arith.constant 0 : index
    %9 = vector.load %arg4[%c0_6, %c0_7] : memref<32x128xbf16, #tpu.memory_space<vmem>>, vector<32x128xbf16>
    tpu.vector_store %arg4[%c0_6, %c0_7], %8 {strides = array<i32>} : memref<32x128xbf16, #tpu.memory_space<vmem>>, vector<32x128xbf16>,
    return
  }
  func.func @transform_0(%arg0: i32) -> (i32, i32) {
    %c0_i32 = arith.constant 0 : i32
    %c0_i32_0 = arith.constant 0 : i32
    return %arg0, %c0_i32 : i32, i32
  }
  func.func @transform_1(%arg0: i32) -> (i32, i32) {
    %c0_i32 = arith.constant 0 : i32
    %c0_i32_0 = arith.constant 0 : i32
    %c0_i32_1 = arith.constant 0 : i32
    return %c0_i32, %c0_i32_0 : i32, i32
  }
  func.func @transform_2(%arg0: i32) -> (i32, i32) {
    %c0_i32 = arith.constant 0 : i32
    %c0_i32_0 = arith.constant 0 : i32
    %c0_i32_1 = arith.constant 0 : i32
    return %c0_i32, %c0_i32_0 : i32, i32
  }
  func.func @transform_3(%arg0: i32) -> (i32, i32) {
    %c0_i32 = arith.constant 0 : i32
    %c0_i32_0 = arith.constant 0 : i32
    return %arg0, %c0_i32 : i32, i32
  }
}

module attributes {stable_mosaic.version = 11 : i64} {
  func.func @_mm_bias_relu_kernel(%arg0: i32, %arg1: memref<2x2048xbf16, #tpu.memory_space<vmem>>, %arg2: memref<2048x64xbf16, #tpu.memory_space<vmem>>, %arg3: memref<1x64xf32, #tpu.memory_space<vmem>>, %arg4: memref<2x64xbf16, #tpu.memory_space<vmem>>) attributes {dimension_semantics = [#tpu.dimension_semantics<parallel>], iteration_bounds = array<i64: 1>, scalar_prefetch = 0 : i64, scratch_operands = 0 : i64, tpu.core_type = #tpu.core_type<tc>, window_params = [{transform_indices = @transform_0, window_bounds = array<i64: 2, 2048>}, {pipeline_mode = #tpu.pipeline_mode<synchronous>, transform_indices = @transform_1, window_bounds = array<i64: 2048, 64>}, {pipeline_mode = #tpu.pipeline_mode<synchronous>, transform_indices = @transform_2, window_bounds = array<i64: 1, 64>}, {transform_indices = @transform_3, window_bounds = array<i64: 2, 64>}]} {
    %c0 = arith.constant 0 : index
    %c0_0 = arith.constant 0 : index
    %0 = vector.load %arg1[%c0, %c0_0] : memref<2x2048xbf16, #tpu.memory_space<vmem>>, vector<2x2048xbf16>
    %c0_1 = arith.constant 0 : index
    %c0_2 = arith.constant 0 : index
    %1 = vector.load %arg2[%c0_1, %c0_2] : memref<2048x64xbf16, #tpu.memory_space<vmem>>, vector<2048x64xbf16>
    %cst = arith.constant dense<0.000000e+00> : vector<2x64xf32>
    %2 = tpu.matmul %0, %1, %cst {dimension_numbers = #tpu.dot_dimension_numbers<[1], [0], [0], [1], [0, 0, 1, 1], [], []>} : vector<2x2048xbf16>, vector<2048x64xbf16>, vector<2x64xf32> -> vector<2x64xf32>
    %c0_3 = arith.constant 0 : index
    %c0_4 = arith.constant 0 : index
    %3 = vector.load %arg3[%c0_3, %c0_4] : memref<1x64xf32, #tpu.memory_space<vmem>>, vector<1x64xf32>
    %4 = vector.broadcast %3 : vector<1x64xf32> to vector<2x64xf32>
    %5 = arith.addf %2, %4 : vector<2x64xf32>
    %cst_5 = arith.constant 0.000000e+00 : f32
    %6 = vector.broadcast %cst_5 : f32 to vector<2x64xf32>
    %7 = arith.maximumf %5, %6 : vector<2x64xf32>
    %8 = arith.truncf %7 : vector<2x64xf32> to vector<2x64xbf16>
    %c0_6 = arith.constant 0 : index
    %c0_7 = arith.constant 0 : index
    %9 = vector.load %arg4[%c0_6, %c0_7] : memref<2x64xbf16, #tpu.memory_space<vmem>>, vector<2x64xbf16>
    tpu.vector_store %arg4[%c0_6, %c0_7], %8 {strides = array<i32>} : memref<2x64xbf16, #tpu.memory_space<vmem>>, vector<2x64xbf16>,
    return
  }
  func.func @transform_0(%arg0: i32) -> (i32, i32) {
    %c0_i32 = arith.constant 0 : i32
    %c0_i32_0 = arith.constant 0 : i32
    return %arg0, %c0_i32 : i32, i32
  }
  func.func @transform_1(%arg0: i32) -> (i32, i32) {
    %c0_i32 = arith.constant 0 : i32
    %c0_i32_0 = arith.constant 0 : i32
    %c0_i32_1 = arith.constant 0 : i32
    return %c0_i32, %c0_i32_0 : i32, i32
  }
  func.func @transform_2(%arg0: i32) -> (i32, i32) {
    %c0_i32 = arith.constant 0 : i32
    %c0_i32_0 = arith.constant 0 : i32
    %c0_i32_1 = arith.constant 0 : i32
    return %c0_i32, %c0_i32_0 : i32, i32
  }
  func.func @transform_3(%arg0: i32) -> (i32, i32) {
    %c0_i32 = arith.constant 0 : i32
    %c0_i32_0 = arith.constant 0 : i32
    return %arg0, %c0_i32 : i32, i32
  }
}

module attributes {stable_mosaic.version = 11 : i64} {
  func.func @_head_kernel(%arg0: memref<2x64xbf16, #tpu.memory_space<vmem>>, %arg1: memref<64x10xf32, #tpu.memory_space<vmem>>, %arg2: memref<1x10xf32, #tpu.memory_space<vmem>>, %arg3: memref<2x64xf32, #tpu.memory_space<vmem>>, %arg4: memref<2x10xf32, #tpu.memory_space<vmem>>) attributes {dimension_semantics = [], scalar_prefetch = 0 : i64, scratch_operands = 0 : i64, tpu.core_type = #tpu.core_type<tc>} {
    %c0 = arith.constant 0 : index
    %c0_0 = arith.constant 0 : index
    %0 = vector.load %arg0[%c0, %c0_0] : memref<2x64xbf16, #tpu.memory_space<vmem>>, vector<2x64xbf16>
    %1 = arith.extf %0 : vector<2x64xbf16> to vector<2x64xf32>
    %2 = arith.mulf %1, %1 : vector<2x64xf32>
    %cst = arith.constant dense<0.000000e+00> : vector<2xf32>
    %3 = vector.multi_reduction <add>, %2, %cst [1] : vector<2x64xf32> to vector<2xf32>
    %4 = vector.shape_cast %3 : vector<2xf32> to vector<2x1xf32>
    %cst_1 = arith.constant 1.000000e-10 : f32
    %5 = vector.broadcast %cst_1 : f32 to vector<2x1xf32>
    %6 = arith.addf %4, %5 : vector<2x1xf32>
    %7 = math.rsqrt %6 : vector<2x1xf32>
    %8 = vector.broadcast %7 : vector<2x1xf32> to vector<2x64xf32>
    %9 = arith.mulf %1, %8 : vector<2x64xf32>
    %cst_2 = arith.constant 1.000000e+00 : f32
    %10 = vector.broadcast %cst_2 : f32 to vector<2x64xf32>
    %11 = arith.mulf %9, %10 : vector<2x64xf32>
    %c0_3 = arith.constant 0 : index
    %c0_4 = arith.constant 0 : index
    %12 = vector.load %arg3[%c0_3, %c0_4] : memref<2x64xf32, #tpu.memory_space<vmem>>, vector<2x64xf32>
    tpu.vector_store %arg3[%c0_3, %c0_4], %11 {strides = array<i32>} : memref<2x64xf32, #tpu.memory_space<vmem>>, vector<2x64xf32>,
    %c0_5 = arith.constant 0 : index
    %c0_6 = arith.constant 0 : index
    %13 = vector.load %arg1[%c0_5, %c0_6] : memref<64x10xf32, #tpu.memory_space<vmem>>, vector<64x10xf32>
    %cst_7 = arith.constant dense<0.000000e+00> : vector<2x10xf32>
    %14 = tpu.matmul %9, %13, %cst_7 {dimension_numbers = #tpu.dot_dimension_numbers<[1], [0], [0], [1], [0, 0, 1, 1], [], []>} : vector<2x64xf32>, vector<64x10xf32>, vector<2x10xf32> -> vector<2x10xf32>
    %c0_8 = arith.constant 0 : index
    %c0_9 = arith.constant 0 : index
    %15 = vector.load %arg2[%c0_8, %c0_9] : memref<1x10xf32, #tpu.memory_space<vmem>>, vector<1x10xf32>
    %16 = vector.broadcast %15 : vector<1x10xf32> to vector<2x10xf32>
    %17 = arith.addf %14, %16 : vector<2x10xf32>
    %cst_10 = arith.constant 0.000000e+00 : f32
    %18 = vector.broadcast %cst_10 : f32 to vector<2x10xf32>
    %19 = arith.subf %18, %17 : vector<2x10xf32>
    %20 = math.exp %19 : vector<2x10xf32>
    %cst_11 = arith.constant 1.000000e+00 : f32
    %21 = vector.broadcast %cst_11 : f32 to vector<2x10xf32>
    %22 = arith.addf %21, %20 : vector<2x10xf32>
    %23 = tpu.reciprocal %22 {approx = true} : vector<2x10xf32> -> vector<2x10xf32>
    %c0_12 = arith.constant 0 : index
    %c0_13 = arith.constant 0 : index
    %24 = vector.load %arg4[%c0_12, %c0_13] : memref<2x10xf32, #tpu.memory_space<vmem>>, vector<2x10xf32>
    tpu.vector_store %arg4[%c0_12, %c0_13], %23 {strides = array<i32>} : memref<2x10xf32, #tpu.memory_space<vmem>>, vector<2x10xf32>,
    return
  }
}

</mosaic_0001>

<bundles_post_ra>
// kernel: _lambda_.6
= control target key start
LH: loop header
LB: loop body
LE: loop exit
PB: predicated region body
PF: predicated region fallthrough
CT: control target
= control target key end

     0   :  { %s2927_s12 = smov 0   ;;  %s3486_s0 = inlined_call_operand.vmem [shape: bf16[2048,48], index: 0, kind: input, shape index: {}]   ;;  %s3487_s1 = inlined_call_operand.vmem [shape: bf16[48,32], index: 1, kind: input, shape index: {}]   ;;  %s3488_s2 = inlined_call_operand.vmem [shape: f32[1,32], index: 2, kind: input, shape index: {}]   ;;  %s3489_s3 = inlined_call_operand.vmem [shape: bf16[2048,32], index: 3, kind: output, shape index: {}]  }
   0x1 LB: > { %s2217_s13 = sadd.s32 4294967295, %s2905_s12   ;;  %p2221_p0 = scmp.ge.s32.totalorder %s2905_s12, 1  ;;  %s2905_s12 = sphi %s2927_s12, %s13_s12  }
   0x2   : > { %p138_p1 = scmp.lt.s32.totalorder %s2905_s12, 3 }
   0x4   : > { %p139_p2 = pnand %p2221_p0, %p138_p1 }
   0x5   : > { %v2831_v0 = vld [vmem:[%s3487_s1] sm:$0xff] (!%p139_p2)   ;;  %s2222_s16 = sshll.u32 (!%p139_p2), %s2217_s13, 7  ;;  %v2832_v1 = vld [vmem:[%s3487_s1 + $0x8] sm:$0xff] (!%p139_p2)   ;;  %v2833_v2 = vld [vmem:[%s3487_s1 + $0x10] sm:$0xff] (!%p139_p2)   ;;  %vm654_vm0 = vcmask (!%p139_p2), 392192   ;;  %vm2032_vm1 = vcmask (!%p139_p2), 257024  }
   0x6   : > { %142 = sbr.rel (%p139_p2) target bundleno = 361 (0x169), region = 32  ;;  %p163_p3 = scmp.lt.s32.totalorder (!%p139_p2), %s2222_s16, 255  ;;  %2683 = vmatprep.subr.bf16.mxu0 (!%p139_p2), %v2831_v0  ;;  %2817 = vmatprep.subr.bf16.mxu1 (!%p139_p2), %v2831_v0 }
   0x7   : > { %2684 = vmatpush3.bf16.msra.mxu0 (!%p139_p2), %v2831_v0  ;;  %2820 = vmatpush3.bf16.msra.mxu1 (!%p139_p2), %v2831_v0 }
   0x8   : > { %2685 = vmatprep.subr.bf16.mxu0 (!%p139_p2), %v2832_v1  ;;  %2818 = vmatprep.subr.bf16.mxu1 (!%p139_p2), %v2832_v1 }
   0xb   : > { %2686 = vmatpush3.bf16.msra.mxu0 (!%p139_p2), %v2832_v1  ;;  %2821 = vmatpush3.bf16.msra.mxu1 (!%p139_p2), %v2832_v1 }
   0xc   : > { %2687 = vmatprep.subr.bf16.mxu0 (!%p139_p2), %v2833_v2  ;;  %2819 = vmatprep.subr.bf16.mxu1 (!%p139_p2), %v2833_v2 }
   0xd   : > { %s3491_s16 = smov (!%p163_p3, %s2222_s16), 255 }
   0xe   : > { %s2223_s21 = sshll.u32 %s3491_s16, 2 }
   0xf   : > { %s2952_s24 = scalar_lea.vmem %s3486_s0, %s2223_s21  ;;  %2688 = vmatpush3.bf16.msra.mxu0 %v2833_v2  ;;  %2822 = vmatpush3.bf16.msra.mxu1 %v2833_v2  ;;  %s3098_s29 = scalar_lea.vmem %s3489_s3, %s2223_s21 }
  0x10   : > { %v2834_v3 = vld [vmem:[%s2952_s24] sm:$0xff]   ;;  %v2836_v5 = vld [vmem:[%s2952_s24 + $0x8] sm:$0xff]   ;;  %v2838_v7 = vld [vmem:[%s2952_s24 + $0x10] sm:$0xff]  }
  0x11   : > { %v2835_v4 = vld [vmem:[%s2952_s24 + $0x100] sm:$0xff]   ;;  %2689 = vmatprep.mubr.msk.bf16.mxu0 %vm654_vm0, %v2834_v3  ;;  %v2837_v6 = vld [vmem:[%s2952_s24 + $0x108] sm:$0xff]   ;;  %v2839_v8 = vld [vmem:[%s2952_s24 + $0x110] sm:$0xff]  }
  0x12   : > { %2753 = vmatprep.mubr.msk.bf16.mxu1 %vm654_vm0, %v2835_v4  ;;  %2690 = vmatmul.mubr.msk.bf16.vlgmr.msra.gmra.mrb[0].mxu0 %vm654_vm0, %v2836_v5  ;;  %v2840_v9 = vld [vmem:[%s2952_s24 + $0x18] sm:$0xff]   ;;  %v2842_v11 = vld [vmem:[%s2952_s24 + $0x20] sm:$0xff]   ;;  %v2844_v13 = vld [vmem:[%s2952_s24 + $0x28] sm:$0xff]  }
  0x13   : > { %2754 = vmatmul.mubr.msk.bf16.vlgmr.msra.gmra.mrb[0].mxu1 %vm654_vm0, %v2837_v6  ;;  %2693 = vmatprep.mubr.msk.bf16.mxu0 %vm654_vm0, %v2838_v7  ;;  %v2841_v10 = vld [vmem:[%s2952_s24 + $0x118] sm:$0xff]   ;;  %v2843_v12 = vld [vmem:[%s2952_s24 + $0x120] sm:$0xff]   ;;  %v2845_v14 = vld [vmem:[%s2952_s24 + $0x128] sm:$0xff]  }
  0x14   : > { %2757 = vmatprep.mubr.msk.bf16.mxu1 %vm654_vm0, %v2839_v8  ;;  %v2846_v15 = vld [vmem:[%s2952_s24 + $0x30] sm:$0xff]   ;;  %v2848_v17 = vld [vmem:[%s2952_s24 + $0x38] sm:$0xff]   ;;  %v2850_v19 = vld [vmem:[%s2952_s24 + $0x40] sm:$0xff]  }
  0x15   : > { %v2847_v16 = vld [vmem:[%s2952_s24 + $0x130] sm:$0xff]   ;;  %v2849_v18 = vld [vmem:[%s2952_s24 + $0x138] sm:$0xff]   ;;  %v2851_v20 = vld [vmem:[%s2952_s24 + $0x140] sm:$0xff]  }
  0x16   : > { %v2852_v21 = vld [vmem:[%s2952_s24 + $0x48] sm:$0xff]   ;;  %v2854_v23 = vld [vmem:[%s2952_s24 + $0x50] sm:$0xff]   ;;  %v2856_v25 = vld [vmem:[%s2952_s24 + $0x58] sm:$0xff]  }
  0x17   : > { %v2853_v22 = vld [vmem:[%s2952_s24 + $0x148] sm:$0xff]   ;;  %v2855_v24 = vld [vmem:[%s2952_s24 + $0x150] sm:$0xff]   ;;  %v2857_v26 = vld [vmem:[%s2952_s24 + $0x158] sm:$0xff]  }
  0x18   : > { %v2858_v27 = vld [vmem:[%s2952_s24 + $0x60] sm:$0xff]   ;;  %v2860_v29 = vld [vmem:[%s2952_s24 + $0x68] sm:$0xff]   ;;  %v2862_v31 = vld [vmem:[%s2952_s24 + $0x70] sm:$0xff]  }
  0x19   : > { %v2859_v28 = vld [vmem:[%s2952_s24 + $0x160] sm:$0xff]   ;;  %v2861_v30 = vld [vmem:[%s2952_s24 + $0x168] sm:$0xff]   ;;  %v2863_v32 = vld [vmem:[%s2952_s24 + $0x170] sm:$0xff]  }
  0x1a   : > { %2694 = vmatmul.mubr.msk.bf16.gmra.mrb[4].mxu0 %vm654_vm0, %v2840_v9  ;;  %v2864_v33 = vld [vmem:[%s2952_s24 + $0x78] sm:$0xff]   ;;  %v2866_v35 = vld [vmem:[%s2952_s24 + $0x80] sm:$0xff]   ;;  %v2868_v37 = vld [vmem:[%s2952_s24 + $0x88] sm:$0xff]  }
  0x1b   : > { %2758 = vmatmul.mubr.msk.bf16.gmra.mrb[4].mxu1 %vm654_vm0, %v2841_v10  ;;  %2697 = vmatprep.mubr.msk.bf16.mxu0 %vm654_vm0, %v2842_v11  ;;  %v2865_v34 = vld [vmem:[%s2952_s24 + $0x178] sm:$0xff]   ;;  %v2867_v36 = vld [vmem:[%s2952_s24 + $0x180] sm:$0xff]   ;;  %v2869_v38 = vld [vmem:[%s2952_s24 + $0x188] sm:$0xff]  }
  0x1c   : > { %2761 = vmatprep.mubr.msk.bf16.mxu1 %vm654_vm0, %v2843_v12  ;;  %v2870_v39 = vld [vmem:[%s2952_s24 + $0x90] sm:$0xff]   ;;  %v2872_v41 = vld [vmem:[%s2952_s24 + $0x98] sm:$0xff]   ;;  %v2874_v43 = vld [vmem:[%s2952_s24 + $0xa0] sm:$0xff]  }
  0x1d   : > { %v2871_v40 = vld [vmem:[%s2952_s24 + $0x190] sm:$0xff]   ;;  %v2873_v42 = vld [vmem:[%s2952_s24 + $0x198] sm:$0xff]   ;;  %v2875_v44 = vld [vmem:[%s2952_s24 + $0x1a0] sm:$0xff]  }
  0x1e   : > { %v2876_v45 = vld [vmem:[%s2952_s24 + $0xa8] sm:$0xff]   ;;  %v2878_v47 = vld [vmem:[%s2952_s24 + $0xb0] sm:$0xff]   ;;  %v2880_v49 = vld [vmem:[%s2952_s24 + $0xb8] sm:$0xff]  }
  0x1f   : > { %v2877_v46 = vld [vmem:[%s2952_s24 + $0x1a8] sm:$0xff]   ;;  %v2879_v48 = vld [vmem:[%s2952_s24 + $0x1b0] sm:$0xff]   ;;  %v2881_v50 = vld [vmem:[%s2952_s24 + $0x1b8] sm:$0xff]  }
  0x20   : > { %v2882_v51 = vld [vmem:[%s2952_s24 + $0xc0] sm:$0xff]   ;;  %v2884_v53 = vld [vmem:[%s2952_s24 + $0xc8] sm:$0xff]   ;;  %v2886_v55 = vld [vmem:[%s2952_s24 + $0xd0] sm:$0xff]  }
  0x21   : > { %v2883_v52 = vld [vmem:[%s2952_s24 + $0x1c0] sm:$0xff]   ;;  %v2885_v54 = vld [vmem:[%s2952_s24 + $0x1c8] sm:$0xff]   ;;  %v2887_v56 = vld [vmem:[%s2952_s24 + $0x1d0] sm:$0xff]  }
  0x22   : > { %2698 = vmatmul.mubr.msk.bf16.gmra.mrb[8].mxu0 %vm654_vm0, %v2844_v13  ;;  %v2888_v57 = vld [vmem:[%s2952_s24 + $0xd8] sm:$0xff]   ;;  %v2890_v59 = vld [vmem:[%s2952_s24 + $0xe0] sm:$0xff]   ;;  %v2892_v61 = vld [vmem:[%s2952_s24 + $0xe8] sm:$0xff]  }
  0x23   : > { %2762 = vmatmul.mubr.msk.bf16.gmra.mrb[8].mxu1 %vm654_vm0, %v2845_v14  ;;  %2701 = vmatprep.mubr.msk.bf16.mxu0 %vm654_vm0, %v2846_v15  ;;  %v2889_v58 = vld [vmem:[%s2952_s24 + $0x1d8] sm:$0xff]   ;;  %v2891_v60 = vld [vmem:[%s2952_s24 + $0x1e0] sm:$0xff]   ;;  %v2893_v62 = vld [vmem:[%s2952_s24 + $0x1e8] sm:$0xff]  }
  0x24   : > { %2765 = vmatprep.mubr.msk.bf16.mxu1 %vm654_vm0, %v2847_v16  ;;  %v2894_v63 = vld [vmem:[%s2952_s24 + $0xf0] sm:$0xff]   ;;  %v2896_v1 = vld [vmem:[%s2952_s24 + $0xf8] sm:$0xff]   ;;  %v3085_v3 = vld [vmem:[%s3488_s2] ss:$0 sm:$0xff] }
  0x25   : > { %v2895_v0 = vld [vmem:[%s2952_s24 + $0x1f0] sm:$0xff]   ;;  %v2897_v2 = vld [vmem:[%s2952_s24 + $0x1f8] sm:$0xff]  }
  0x2a   : > { %2702 = vmatmul.mubr.msk.bf16.gmra.mrb[12].mxu0 %vm654_vm0, %v2848_v17 }
  0x2b   : > { %2766 = vmatmul.mubr.msk.bf16.gmra.mrb[12].mxu1 %vm654_vm0, %v2849_v18  ;;  %2705 = vmatprep.mubr.msk.bf16.mxu0 %vm654_vm0, %v2850_v19 }
  0x2c   : > { %2769 = vmatprep.mubr.msk.bf16.mxu1 %vm654_vm0, %v2851_v20 }
  0x32   : > { %2706 = vmatmul.mubr.msk.bf16.gmra.mrb[16].mxu0 %vm654_vm0, %v2852_v21 }
  0x33   : > { %2770 = vmatmul.mubr.msk.bf16.gmra.mrb[16].mxu1 %vm654_vm0, %v2853_v22  ;;  %2709 = vmatprep.mubr.msk.bf16.mxu0 %vm654_vm0, %v2854_v23 }
  0x34   : > { %2773 = vmatprep.mubr.msk.bf16.mxu1 %vm654_vm0, %v2855_v24 }
  0x3a   : > { %2710 = vmatmul.mubr.msk.bf16.gmra.mrb[20].mxu0 %vm654_vm0, %v2856_v25 }
  0x3b   : > { %2774 = vmatmul.mubr.msk.bf16.gmra.mrb[20].mxu1 %vm654_vm0, %v2857_v26  ;;  %2713 = vmatprep.mubr.msk.bf16.mxu0 %vm654_vm0, %v2858_v27 }
  0x3c   : > { %2777 = vmatprep.mubr.msk.bf16.mxu1 %vm654_vm0, %v2859_v28 }
  0x42   : > { %2714 = vmatmul.mubr.msk.bf16.gmra.mrb[24].mxu0 %vm654_vm0, %v2860_v29 }
  0x43   : > { %2778 = vmatmul.mubr.msk.bf16.gmra.mrb[24].mxu1 %vm654_vm0, %v2861_v30  ;;  %2717 = vmatprep.mubr.msk.bf16.mxu0 %vm654_vm0, %v2862_v31 }
  0x44   : > { %2781 = vmatprep.mubr.msk.bf16.mxu1 %vm654_vm0, %v2863_v32 }
  0x4a   : > { %2718 = vmatmul.mubr.msk.bf16.gmra.mrb[28].mxu0 %vm654_vm0, %v2864_v33 }
  0x4b   : > { %2782 = vmatmul.mubr.msk.bf16.gmra.mrb[28].mxu1 %vm654_vm0, %v2865_v34  ;;  %2721 = vmatprep.mubr.msk.bf16.mxu0 %vm654_vm0, %v2866_v35 }
  0x4c   : > { %2785 = vmatprep.mubr.msk.bf16.mxu1 %vm654_vm0, %v2867_v36 }
  0x52   : > { %2722 = vmatmul.mubr.msk.bf16.gmra.mrb[32].mxu0 %vm654_vm0, %v2868_v37 }
  0x53   : > { %2786 = vmatmul.mubr.msk.bf16.gmra.mrb[32].mxu1 %vm654_vm0, %v2869_v38  ;;  %2725 = vmatprep.mubr.msk.bf16.mxu0 %vm654_vm0, %v2870_v39 }
  0x54   : > { %2789 = vmatprep.mubr.msk.bf16.mxu1 %vm654_vm0, %v2871_v40 }
  0x5a   : > { %2726 = vmatmul.mubr.msk.bf16.gmra.mrb[36].mxu0 %vm654_vm0, %v2872_v41 }
  0x5b   : > { %2790 = vmatmul.mubr.msk.bf16.gmra.mrb[36].mxu1 %vm654_vm0, %v2873_v42  ;;  %2729 = vmatprep.mubr.msk.bf16.mxu0 %vm654_vm0, %v2874_v43 }
  0x5c   : > { %2793 = vmatprep.mubr.msk.bf16.mxu1 %vm654_vm0, %v2875_v44 }
  0x62   : > { %2730 = vmatmul.mubr.msk.bf16.gmra.mrb[40].mxu0 %vm654_vm0, %v2876_v45 }
  0x63   : > { %2794 = vmatmul.mubr.msk.bf16.gmra.mrb[40].mxu1 %vm654_vm0, %v2877_v46  ;;  %2733 = vmatprep.mubr.msk.bf16.mxu0 %vm654_vm0, %v2878_v47 }
  0x64   : > { %2797 = vmatprep.mubr.msk.bf16.mxu1 %vm654_vm0, %v2879_v48 }
  0x6a   : > { %2734 = vmatmul.mubr.msk.bf16.gmra.mrb[44].mxu0 %vm654_vm0, %v2880_v49 }
  0x6b   : > { %2798 = vmatmul.mubr.msk.bf16.gmra.mrb[44].mxu1 %vm654_vm0, %v2881_v50  ;;  %2737 = vmatprep.mubr.msk.bf16.mxu0 %vm654_vm0, %v2882_v51 }
  0x6c   : > { %2801 = vmatprep.mubr.msk.bf16.mxu1 %vm654_vm0, %v2883_v52 }
  0x72   : > { %2738 = vmatmul.mubr.msk.bf16.gmra.mrb[48].mxu0 %vm654_vm0, %v2884_v53 }
  0x73   : > { %2802 = vmatmul.mubr.msk.bf16.gmra.mrb[48].mxu1 %vm654_vm0, %v2885_v54  ;;  %2741 = vmatprep.mubr.msk.bf16.mxu0 %vm654_vm0, %v2886_v55 }
  0x74   : > { %2805 = vmatprep.mubr.msk.bf16.mxu1 %vm654_vm0, %v2887_v56 }
  0x7a   : > { %2742 = vmatmul.mubr.msk.bf16.gmra.mrb[52].mxu0 %vm654_vm0, %v2888_v57 }
  0x7b   : > { %2806 = vmatmul.mubr.msk.bf16.gmra.mrb[52].mxu1 %vm654_vm0, %v2889_v58  ;;  %2745 = vmatprep.mubr.msk.bf16.mxu0 %vm654_vm0, %v2890_v59 }
  0x7c   : > { %2809 = vmatprep.mubr.msk.bf16.mxu1 %vm654_vm0, %v2891_v60 }
  0x82   : > { %2746 = vmatmul.mubr.msk.bf16.gmra.mrb[56].mxu0 %vm654_vm0, %v2892_v61 }
  0x83   : > { %2810 = vmatmul.mubr.msk.bf16.gmra.mrb[56].mxu1 %vm654_vm0, %v2893_v62  ;;  %2749 = vmatprep.mubr.msk.bf16.mxu0 %vm654_vm0, %v2894_v63 }
  0x84   : > { %2813 = vmatprep.mubr.msk.bf16.mxu1 %vm654_vm0, %v2895_v0 }
  0x8a   : > { %2750 = vmatmul.mubr.msk.bf16.gmra.mrb[60].mxu0 %vm654_vm0, %v2896_v1 }
  0x8b   : > { %2814 = vmatmul.mubr.msk.bf16.gmra.mrb[60].mxu1 %vm654_vm0, %v2897_v2 }
  0xe5   : > { %v2691_v4 = vpop.f32.mrb[0].mxu0 }
  0xe6   : > { %v2755_v5 = vpop.f32.mrb[0].mxu1  ;;  %v890_v6 = vadd.f32 %v2691_v4, %v3085_v3  ;;  %v881_v8 = vpop.f32.mrb[1].mxu0 }
  0xe7   : > { %v1146_v7 = vadd.f32 %v2755_v5, %v3085_v3  ;;  %v1137_v9 = vpop.f32.mrb[1].mxu1  ;;  %v882_v10 = vadd.f32 %v3085_v3, %v881_v8  ;;  %v2692_v12 = vpop.f32.mrb[2].mxu0 }
  0xe8   : > { %v1138_v11 = vadd.f32 %v3085_v3, %v1137_v9  ;;  %v2756_v13 = vpop.f32.mrb[2].mxu1  ;;  %v1394_v14 = vmax.f32 %v890_v6, 0.0  ;;  %v893_v16 = vadd.f32 %v2692_v12, %v3085_v3  ;;  %v884_v18 = vpop.f32.mrb[3].mxu0 }
  0xe9   : > { %v1458_v15 = vmax.f32 %v1146_v7, 0.0  ;;  %v1149_v17 = vadd.f32 %v2756_v13, %v3085_v3  ;;  %v1140_v19 = vpop.f32.mrb[3].mxu1  ;;  %v1392_v20 = vmax.f32 %v882_v10, 0.0  ;;  %v885_v22 = vadd.f32 %v3085_v3, %v884_v18 }
  0xea   : > { %v1456_v21 = vmax.f32 %v1138_v11, 0.0  ;;  %v1141_v23 = vadd.f32 %v3085_v3, %v1140_v19  ;;  %v2490_v24 = vpack.c.bf16 %v1394_v14, %v1394_v14  ;;  %v1395_v26 = vmax.f32 %v893_v16, 0.0 }
  0xeb   : > { %v2554_v25 = vpack.c.bf16 %v1458_v15, %v1458_v15  ;;  %v1459_v27 = vmax.f32 %v1149_v17, 0.0  ;;  %v2488_v28 = vpack.c.bf16 %v1392_v20, %v1392_v20  ;;  %v1393_v30 = vmax.f32 %v885_v22, 0.0 }
  0xec   : > { %v2552_v29 = vpack.c.bf16 %v1456_v21, %v1456_v21  ;;  %v1457_v31 = vmax.f32 %v1141_v23, 0.0  ;;  %2035 = vst.msk [vmem:[%s3098_s29 + $0x8] sm:$0xf] %vm2032_vm1, %v2490_v24  ;;  %v2491_v32 = vpack.c.bf16 %v1395_v26, %v1395_v26 }
  0xed   : > { %2099 = vst.msk [vmem:[%s3098_s29 + $0x108] sm:$0xf] %vm2032_vm1, %v2554_v25  ;;  %v2555_v33 = vpack.c.bf16 %v1459_v27, %v1459_v27  ;;  %2033 = vst.msk [vmem:[%s3098_s29] sm:$0xf] %vm2032_vm1, %v2488_v28  ;;  %v2489_v34 = vpack.c.bf16 %v1393_v30, %v1393_v30  ;;  %v2695_v36 = vpop.f32.mrb[4].mxu0 }
  0xee   : > { %2097 = vst.msk [vmem:[%s3098_s29 + $0x100] sm:$0xf] %vm2032_vm1, %v2552_v29  ;;  %v2553_v35 = vpack.c.bf16 %v1457_v31, %v1457_v31  ;;  %v2759_v37 = vpop.f32.mrb[4].mxu1  ;;  %2036 = vst.msk [vmem:[%s3098_s29 + $0xc] sm:$0xf] %vm2032_vm1, %v2491_v32  ;;  %v906_v38 = vadd.f32 %v2695_v36, %v3085_v3  ;;  %v897_v40 = vpop.f32.mrb[5].mxu0 }
  0xef   : > { %2100 = vst.msk [vmem:[%s3098_s29 + $0x10c] sm:$0xf] %vm2032_vm1, %v2555_v33  ;;  %v1162_v39 = vadd.f32 %v2759_v37, %v3085_v3  ;;  %v1153_v41 = vpop.f32.mrb[5].mxu1  ;;  %2034 = vst.msk [vmem:[%s3098_s29 + $0x4] sm:$0xf] %vm2032_vm1, %v2489_v34  ;;  %v898_v42 = vadd.f32 %v3085_v3, %v897_v40  ;;  %v2696_v44 = vpop.f32.mrb[6].mxu0 }
  0xf0   : > { %2098 = vst.msk [vmem:[%s3098_s29 + $0x104] sm:$0xf] %vm2032_vm1, %v2553_v35  ;;  %v1154_v43 = vadd.f32 %v3085_v3, %v1153_v41  ;;  %v2760_v45 = vpop.f32.mrb[6].mxu1  ;;  %v1398_v46 = vmax.f32 %v906_v38, 0.0  ;;  %v909_v48 = vadd.f32 %v2696_v44, %v3085_v3  ;;  %v900_v50 = vpop.f32.mrb[7].mxu0 }
  0xf1   : > { %v1462_v47 = vmax.f32 %v1162_v39, 0.0  ;;  %v1165_v49 = vadd.f32 %v2760_v45, %v3085_v3  ;;  %v1156_v51 = vpop.f32.mrb[7].mxu1  ;;  %v1396_v52 = vmax.f32 %v898_v42, 0.0  ;;  %v901_v54 = vadd.f32 %v3085_v3, %v900_v50 }
  0xf2   : > { %v1460_v53 = vmax.f32 %v1154_v43, 0.0  ;;  %v1157_v55 = vadd.f32 %v3085_v3, %v1156_v51  ;;  %v2494_v56 = vpack.c.bf16 %v1398_v46, %v1398_v46  ;;  %v1399_v58 = vmax.f32 %v909_v48, 0.0 }
  0xf3   : > { %v2558_v57 = vpack.c.bf16 %v1462_v47, %v1462_v47  ;;  %v1463_v59 = vmax.f32 %v1165_v49, 0.0  ;;  %v2492_v60 = vpack.c.bf16 %v1396_v52, %v1396_v52  ;;  %v1397_v62 = vmax.f32 %v901_v54, 0.0 }
  0xf4   : > { %v2556_v61 = vpack.c.bf16 %v1460_v53, %v1460_v53  ;;  %v1461_v63 = vmax.f32 %v1157_v55, 0.0  ;;  %2039 = vst.msk [vmem:[%s3098_s29 + $0x18] sm:$0xf] %vm2032_vm1, %v2494_v56  ;;  %v2495_v0 = vpack.c.bf16 %v1399_v58, %v1399_v58 }
  0xf5   : > { %2103 = vst.msk [vmem:[%s3098_s29 + $0x118] sm:$0xf] %vm2032_vm1, %v2558_v57  ;;  %v2559_v1 = vpack.c.bf16 %v1463_v59, %v1463_v59  ;;  %2037 = vst.msk [vmem:[%s3098_s29 + $0x10] sm:$0xf] %vm2032_vm1, %v2492_v60  ;;  %v2493_v2 = vpack.c.bf16 %v1397_v62, %v1397_v62  ;;  %v2699_v5 = vpop.f32.mrb[8].mxu0 }
  0xf6   : > { %2101 = vst.msk [vmem:[%s3098_s29 + $0x110] sm:$0xf] %vm2032_vm1, %v2556_v61  ;;  %v2557_v4 = vpack.c.bf16 %v1461_v63, %v1461_v63  ;;  %v2763_v6 = vpop.f32.mrb[8].mxu1  ;;  %2040 = vst.msk [vmem:[%s3098_s29 + $0x1c] sm:$0xf] %vm2032_vm1, %v2495_v0  ;;  %v922_v7 = vadd.f32 %v2699_v5, %v3085_v3  ;;  %v913_v9 = vpop.f32.mrb[9].mxu0 }
  0xf7   : > { %2104 = vst.msk [vmem:[%s3098_s29 + $0x11c] sm:$0xf] %vm2032_vm1, %v2559_v1  ;;  %v1178_v8 = vadd.f32 %v2763_v6, %v3085_v3  ;;  %v1169_v10 = vpop.f32.mrb[9].mxu1  ;;  %2038 = vst.msk [vmem:[%s3098_s29 + $0x14] sm:$0xf] %vm2032_vm1, %v2493_v2  ;;  %v914_v11 = vadd.f32 %v3085_v3, %v913_v9  ;;  %v2700_v13 = vpop.f32.mrb[10].mxu0 }
  0xf8   : > { %2102 = vst.msk [vmem:[%s3098_s29 + $0x114] sm:$0xf] %vm2032_vm1, %v2557_v4  ;;  %v1170_v12 = vadd.f32 %v3085_v3, %v1169_v10  ;;  %v2764_v14 = vpop.f32.mrb[10].mxu1  ;;  %v1402_v15 = vmax.f32 %v922_v7, 0.0  ;;  %v925_v17 = vadd.f32 %v2700_v13, %v3085_v3  ;;  %v916_v19 = vpop.f32.mrb[11].mxu0 }
  0xf9   : > { %v1466_v16 = vmax.f32 %v1178_v8, 0.0  ;;  %v1181_v18 = vadd.f32 %v2764_v14, %v3085_v3  ;;  %v1172_v20 = vpop.f32.mrb[11].mxu1  ;;  %v1400_v21 = vmax.f32 %v914_v11, 0.0  ;;  %v917_v23 = vadd.f32 %v3085_v3, %v916_v19 }
  0xfa   : > { %v1464_v22 = vmax.f32 %v1170_v12, 0.0  ;;  %v1173_v24 = vadd.f32 %v3085_v3, %v1172_v20  ;;  %v2498_v25 = vpack.c.bf16 %v1402_v15, %v1402_v15  ;;  %v1403_v27 = vmax.f32 %v925_v17, 0.0 }
  0xfb   : > { %v2562_v26 = vpack.c.bf16 %v1466_v16, %v1466_v16  ;;  %v1467_v28 = vmax.f32 %v1181_v18, 0.0  ;;  %v2496_v29 = vpack.c.bf16 %v1400_v21, %v1400_v21  ;;  %v1401_v31 = vmax.f32 %v917_v23, 0.0 }
  0xfc   : > { %v2560_v30 = vpack.c.bf16 %v1464_v22, %v1464_v22  ;;  %v1465_v32 = vmax.f32 %v1173_v24, 0.0  ;;  %2043 = vst.msk [vmem:[%s3098_s29 + $0x28] sm:$0xf] %vm2032_vm1, %v2498_v25  ;;  %v2499_v33 = vpack.c.bf16 %v1403_v27, %v1403_v27 }
  0xfd   : > { %2107 = vst.msk [vmem:[%s3098_s29 + $0x128] sm:$0xf] %vm2032_vm1, %v2562_v26  ;;  %v2563_v34 = vpack.c.bf16 %v1467_v28, %v1467_v28  ;;  %2041 = vst.msk [vmem:[%s3098_s29 + $0x20] sm:$0xf] %vm2032_vm1, %v2496_v29  ;;  %v2497_v35 = vpack.c.bf16 %v1401_v31, %v1401_v31  ;;  %v2703_v37 = vpop.f32.mrb[12].mxu0 }
  0xfe   : > { %2105 = vst.msk [vmem:[%s3098_s29 + $0x120] sm:$0xf] %vm2032_vm1, %v2560_v30  ;;  %v2561_v36 = vpack.c.bf16 %v1465_v32, %v1465_v32  ;;  %v2767_v38 = vpop.f32.mrb[12].mxu1  ;;  %2044 = vst.msk [vmem:[%s3098_s29 + $0x2c] sm:$0xf] %vm2032_vm1, %v2499_v33  ;;  %v938_v39 = vadd.f32 %v2703_v37, %v3085_v3  ;;  %v929_v41 = vpop.f32.mrb[13].mxu0 }
  0xff   : > { %2108 = vst.msk [vmem:[%s3098_s29 + $0x12c] sm:$0xf] %vm2032_vm1, %v2563_v34  ;;  %v1194_v40 = vadd.f32 %v2767_v38, %v3085_v3  ;;  %v1185_v42 = vpop.f32.mrb[13].mxu1  ;;  %2042 = vst.msk [vmem:[%s3098_s29 + $0x24] sm:$0xf] %vm2032_vm1, %v2497_v35  ;;  %v930_v43 = vadd.f32 %v3085_v3, %v929_v41  ;;  %v2704_v45 = vpop.f32.mrb[14].mxu0 }
 0x100   : > { %2106 = vst.msk [vmem:[%s3098_s29 + $0x124] sm:$0xf] %vm2032_vm1, %v2561_v36  ;;  %v1186_v44 = vadd.f32 %v3085_v3, %v1185_v42  ;;  %v2768_v46 = vpop.f32.mrb[14].mxu1  ;;  %v1406_v47 = vmax.f32 %v938_v39, 0.0  ;;  %v941_v49 = vadd.f32 %v2704_v45, %v3085_v3  ;;  %v932_v51 = vpop.f32.mrb[15].mxu0 }
 0x101   : > { %v1470_v48 = vmax.f32 %v1194_v40, 0.0  ;;  %v1197_v50 = vadd.f32 %v2768_v46, %v3085_v3  ;;  %v1188_v52 = vpop.f32.mrb[15].mxu1  ;;  %v1404_v53 = vmax.f32 %v930_v43, 0.0  ;;  %v933_v55 = vadd.f32 %v3085_v3, %v932_v51 }
 0x102   : > { %v1468_v54 = vmax.f32 %v1186_v44, 0.0  ;;  %v1189_v56 = vadd.f32 %v3085_v3, %v1188_v52  ;;  %v2502_v57 = vpack.c.bf16 %v1406_v47, %v1406_v47  ;;  %v1407_v59 = vmax.f32 %v941_v49, 0.0 }
 0x103   : > { %v2566_v58 = vpack.c.bf16 %v1470_v48, %v1470_v48  ;;  %v1471_v60 = vmax.f32 %v1197_v50, 0.0  ;;  %v2500_v61 = vpack.c.bf16 %v1404_v53, %v1404_v53  ;;  %v1405_v63 = vmax.f32 %v933_v55, 0.0 }
 0x104   : > { %v2564_v62 = vpack.c.bf16 %v1468_v54, %v1468_v54  ;;  %v1469_v0 = vmax.f32 %v1189_v56, 0.0  ;;  %2047 = vst.msk [vmem:[%s3098_s29 + $0x38] sm:$0xf] %vm2032_vm1, %v2502_v57  ;;  %v2503_v1 = vpack.c.bf16 %v1407_v59, %v1407_v59 }
 0x105   : > { %2111 = vst.msk [vmem:[%s3098_s29 + $0x138] sm:$0xf] %vm2032_vm1, %v2566_v58  ;;  %v2567_v2 = vpack.c.bf16 %v1471_v60, %v1471_v60  ;;  %2045 = vst.msk [vmem:[%s3098_s29 + $0x30] sm:$0xf] %vm2032_vm1, %v2500_v61  ;;  %v2501_v4 = vpack.c.bf16 %v1405_v63, %v1405_v63  ;;  %v2707_v6 = vpop.f32.mrb[16].mxu0 }
 0x106   : > { %2109 = vst.msk [vmem:[%s3098_s29 + $0x130] sm:$0xf] %vm2032_vm1, %v2564_v62  ;;  %v2565_v5 = vpack.c.bf16 %v1469_v0, %v1469_v0  ;;  %v2771_v7 = vpop.f32.mrb[16].mxu1  ;;  %2048 = vst.msk [vmem:[%s3098_s29 + $0x3c] sm:$0xf] %vm2032_vm1, %v2503_v1  ;;  %v954_v8 = vadd.f32 %v2707_v6, %v3085_v3  ;;  %v945_v10 = vpop.f32.mrb[17].mxu0 }
 0x107   : > { %2112 = vst.msk [vmem:[%s3098_s29 + $0x13c] sm:$0xf] %vm2032_vm1, %v2567_v2  ;;  %v1210_v9 = vadd.f32 %v2771_v7, %v3085_v3  ;;  %v1201_v11 = vpop.f32.mrb[17].mxu1  ;;  %2046 = vst.msk [vmem:[%s3098_s29 + $0x34] sm:$0xf] %vm2032_vm1, %v2501_v4  ;;  %v946_v12 = vadd.f32 %v3085_v3, %v945_v10  ;;  %v2708_v14 = vpop.f32.mrb[18].mxu0 }
 0x108   : > { %2110 = vst.msk [vmem:[%s3098_s29 + $0x134] sm:$0xf] %vm2032_vm1, %v2565_v5  ;;  %v1202_v13 = vadd.f32 %v3085_v3, %v1201_v11  ;;  %v2772_v15 = vpop.f32.mrb[18].mxu1  ;;  %v1410_v16 = vmax.f32 %v954_v8, 0.0  ;;  %v957_v18 = vadd.f32 %v2708_v14, %v3085_v3  ;;  %v948_v20 = vpop.f32.mrb[19].mxu0 }
 0x109   : > { %v1474_v17 = vmax.f32 %v1210_v9, 0.0  ;;  %v1213_v19 = vadd.f32 %v2772_v15, %v3085_v3  ;;  %v1204_v21 = vpop.f32.mrb[19].mxu1  ;;  %v1408_v22 = vmax.f32 %v946_v12, 0.0  ;;  %v949_v24 = vadd.f32 %v3085_v3, %v948_v20 }
 0x10a   : > { %v1472_v23 = vmax.f32 %v1202_v13, 0.0  ;;  %v1205_v25 = vadd.f32 %v3085_v3, %v1204_v21  ;;  %v2506_v26 = vpack.c.bf16 %v1410_v16, %v1410_v16  ;;  %v1411_v28 = vmax.f32 %v957_v18, 0.0 }
 0x10b   : > { %v2570_v27 = vpack.c.bf16 %v1474_v17, %v1474_v17  ;;  %v1475_v29 = vmax.f32 %v1213_v19, 0.0  ;;  %v2504_v30 = vpack.c.bf16 %v1408_v22, %v1408_v22  ;;  %v1409_v32 = vmax.f32 %v949_v24, 0.0 }
 0x10c   : > { %v2568_v31 = vpack.c.bf16 %v1472_v23, %v1472_v23  ;;  %v1473_v33 = vmax.f32 %v1205_v25, 0.0  ;;  %2051 = vst.msk [vmem:[%s3098_s29 + $0x48] sm:$0xf] %vm2032_vm1, %v2506_v26  ;;  %v2507_v34 = vpack.c.bf16 %v1411_v28, %v1411_v28 }
 0x10d   : > { %2115 = vst.msk [vmem:[%s3098_s29 + $0x148] sm:$0xf] %vm2032_vm1, %v2570_v27  ;;  %v2571_v35 = vpack.c.bf16 %v1475_v29, %v1475_v29  ;;  %2049 = vst.msk [vmem:[%s3098_s29 + $0x40] sm:$0xf] %vm2032_vm1, %v2504_v30  ;;  %v2505_v36 = vpack.c.bf16 %v1409_v32, %v1409_v32  ;;  %v2711_v38 = vpop.f32.mrb[20].mxu0 }
 0x10e   : > { %2113 = vst.msk [vmem:[%s3098_s29 + $0x140] sm:$0xf] %vm2032_vm1, %v2568_v31  ;;  %v2569_v37 = vpack.c.bf16 %v1473_v33, %v1473_v33  ;;  %v2775_v39 = vpop.f32.mrb[20].mxu1  ;;  %2052 = vst.msk [vmem:[%s3098_s29 + $0x4c] sm:$0xf] %vm2032_vm1, %v2507_v34  ;;  %v970_v40 = vadd.f32 %v2711_v38, %v3085_v3  ;;  %v961_v42 = vpop.f32.mrb[21].mxu0 }
 0x10f   : > { %2116 = vst.msk [vmem:[%s3098_s29 + $0x14c] sm:$0xf] %vm2032_vm1, %v2571_v35  ;;  %v1226_v41 = vadd.f32 %v2775_v39, %v3085_v3  ;;  %v1217_v43 = vpop.f32.mrb[21].mxu1  ;;  %2050 = vst.msk [vmem:[%s3098_s29 + $0x44] sm:$0xf] %vm2032_vm1, %v2505_v36  ;;  %v962_v44 = vadd.f32 %v3085_v3, %v961_v42  ;;  %v2712_v46 = vpop.f32.mrb[22].mxu0 }
 0x110   : > { %2114 = vst.msk [vmem:[%s3098_s29 + $0x144] sm:$0xf] %vm2032_vm1, %v2569_v37  ;;  %v1218_v45 = vadd.f32 %v3085_v3, %v1217_v43  ;;  %v2776_v47 = vpop.f32.mrb[22].mxu1  ;;  %v1414_v48 = vmax.f32 %v970_v40, 0.0  ;;  %v973_v50 = vadd.f32 %v2712_v46, %v3085_v3  ;;  %v964_v52 = vpop.f32.mrb[23].mxu0 }
 0x111   : > { %v1478_v49 = vmax.f32 %v1226_v41, 0.0  ;;  %v1229_v51 = vadd.f32 %v2776_v47, %v3085_v3  ;;  %v1220_v53 = vpop.f32.mrb[23].mxu1  ;;  %v1412_v54 = vmax.f32 %v962_v44, 0.0  ;;  %v965_v56 = vadd.f32 %v3085_v3, %v964_v52 }
 0x112   : > { %v1476_v55 = vmax.f32 %v1218_v45, 0.0  ;;  %v1221_v57 = vadd.f32 %v3085_v3, %v1220_v53  ;;  %v2510_v58 = vpack.c.bf16 %v1414_v48, %v1414_v48  ;;  %v1415_v60 = vmax.f32 %v973_v50, 0.0 }
 0x113   : > { %v2574_v59 = vpack.c.bf16 %v1478_v49, %v1478_v49  ;;  %v1479_v61 = vmax.f32 %v1229_v51, 0.0  ;;  %v2508_v62 = vpack.c.bf16 %v1412_v54, %v1412_v54  ;;  %v1413_v0 = vmax.f32 %v965_v56, 0.0 }
 0x114   : > { %v2572_v63 = vpack.c.bf16 %v1476_v55, %v1476_v55  ;;  %v1477_v1 = vmax.f32 %v1221_v57, 0.0  ;;  %2055 = vst.msk [vmem:[%s3098_s29 + $0x58] sm:$0xf] %vm2032_vm1, %v2510_v58  ;;  %v2511_v2 = vpack.c.bf16 %v1415_v60, %v1415_v60 }
 0x115   : > { %2119 = vst.msk [vmem:[%s3098_s29 + $0x158] sm:$0xf] %vm2032_vm1, %v2574_v59  ;;  %v2575_v4 = vpack.c.bf16 %v1479_v61, %v1479_v61  ;;  %2053 = vst.msk [vmem:[%s3098_s29 + $0x50] sm:$0xf] %vm2032_vm1, %v2508_v62  ;;  %v2509_v5 = vpack.c.bf16 %v1413_v0, %v1413_v0  ;;  %v2715_v7 = vpop.f32.mrb[24].mxu0 }
 0x116   : > { %2117 = vst.msk [vmem:[%s3098_s29 + $0x150] sm:$0xf] %vm2032_vm1, %v2572_v63  ;;  %v2573_v6 = vpack.c.bf16 %v1477_v1, %v1477_v1  ;;  %v2779_v8 = vpop.f32.mrb[24].mxu1  ;;  %2056 = vst.msk [vmem:[%s3098_s29 + $0x5c] sm:$0xf] %vm2032_vm1, %v2511_v2  ;;  %v986_v9 = vadd.f32 %v2715_v7, %v3085_v3  ;;  %v977_v11 = vpop.f32.mrb[25].mxu0 }
 0x117   : > { %2120 = vst.msk [vmem:[%s3098_s29 + $0x15c] sm:$0xf] %vm2032_vm1, %v2575_v4  ;;  %v1242_v10 = vadd.f32 %v2779_v8, %v3085_v3  ;;  %v1233_v12 = vpop.f32.mrb[25].mxu1  ;;  %2054 = vst.msk [vmem:[%s3098_s29 + $0x54] sm:$0xf] %vm2032_vm1, %v2509_v5  ;;  %v978_v13 = vadd.f32 %v3085_v3, %v977_v11  ;;  %v2716_v15 = vpop.f32.mrb[26].mxu0 }
 0x118   : > { %2118 = vst.msk [vmem:[%s3098_s29 + $0x154] sm:$0xf] %vm2032_vm1, %v2573_v6  ;;  %v1234_v14 = vadd.f32 %v3085_v3, %v1233_v12  ;;  %v2780_v16 = vpop.f32.mrb[26].mxu1  ;;  %v1418_v17 = vmax.f32 %v986_v9, 0.0  ;;  %v989_v19 = vadd.f32 %v2716_v15, %v3085_v3  ;;  %v980_v21 = vpop.f32.mrb[27].mxu0 }
 0x119   : > { %v1482_v18 = vmax.f32 %v1242_v10, 0.0  ;;  %v1245_v20 = vadd.f32 %v2780_v16, %v3085_v3  ;;  %v1236_v22 = vpop.f32.mrb[27].mxu1  ;;  %v1416_v23 = vmax.f32 %v978_v13, 0.0  ;;  %v981_v25 = vadd.f32 %v3085_v3, %v980_v21 }
 0x11a   : > { %v1480_v24 = vmax.f32 %v1234_v14, 0.0  ;;  %v1237_v26 = vadd.f32 %v3085_v3, %v1236_v22  ;;  %v2514_v27 = vpack.c.bf16 %v1418_v17, %v1418_v17  ;;  %v1419_v29 = vmax.f32 %v989_v19, 0.0 }
 0x11b   : > { %v2578_v28 = vpack.c.bf16 %v1482_v18, %v1482_v18  ;;  %v1483_v30 = vmax.f32 %v1245_v20, 0.0  ;;  %v2512_v31 = vpack.c.bf16 %v1416_v23, %v1416_v23  ;;  %v1417_v33 = vmax.f32 %v981_v25, 0.0 }
 0x11c   : > { %v2576_v32 = vpack.c.bf16 %v1480_v24, %v1480_v24  ;;  %v1481_v34 = vmax.f32 %v1237_v26, 0.0  ;;  %2059 = vst.msk [vmem:[%s3098_s29 + $0x68] sm:$0xf] %vm2032_vm1, %v2514_v27  ;;  %v2515_v35 = vpack.c.bf16 %v1419_v29, %v1419_v29 }
 0x11d   : > { %2123 = vst.msk [vmem:[%s3098_s29 + $0x168] sm:$0xf] %vm2032_vm1, %v2578_v28  ;;  %v2579_v36 = vpack.c.bf16 %v1483_v30, %v1483_v30  ;;  %2057 = vst.msk [vmem:[%s3098_s29 + $0x60] sm:$0xf] %vm2032_vm1, %v2512_v31  ;;  %v2513_v37 = vpack.c.bf16 %v1417_v33, %v1417_v33  ;;  %v2719_v39 = vpop.f32.mrb[28].mxu0 }
 0x11e   : > { %2121 = vst.msk [vmem:[%s3098_s29 + $0x160] sm:$0xf] %vm2032_vm1, %v2576_v32  ;;  %v2577_v38 = vpack.c.bf16 %v1481_v34, %v1481_v34  ;;  %v2783_v40 = vpop.f32.mrb[28].mxu1  ;;  %2060 = vst.msk [vmem:[%s3098_s29 + $0x6c] sm:$0xf] %vm2032_vm1, %v2515_v35  ;;  %v1002_v41 = vadd.f32 %v2719_v39, %v3085_v3  ;;  %v993_v43 = vpop.f32.mrb[29].mxu0 }
 0x11f   : > { %2124 = vst.msk [vmem:[%s3098_s29 + $0x16c] sm:$0xf] %vm2032_vm1, %v2579_v36  ;;  %v1258_v42 = vadd.f32 %v2783_v40, %v3085_v3  ;;  %v1249_v44 = vpop.f32.mrb[29].mxu1  ;;  %2058 = vst.msk [vmem:[%s3098_s29 + $0x64] sm:$0xf] %vm2032_vm1, %v2513_v37  ;;  %v994_v45 = vadd.f32 %v3085_v3, %v993_v43  ;;  %v2720_v47 = vpop.f32.mrb[30].mxu0 }
 0x120   : > { %2122 = vst.msk [vmem:[%s3098_s29 + $0x164] sm:$0xf] %vm2032_vm1, %v2577_v38  ;;  %v1250_v46 = vadd.f32 %v3085_v3, %v1249_v44  ;;  %v2784_v48 = vpop.f32.mrb[30].mxu1  ;;  %v1422_v49 = vmax.f32 %v1002_v41, 0.0  ;;  %v1005_v51 = vadd.f32 %v2720_v47, %v3085_v3  ;;  %v996_v53 = vpop.f32.mrb[31].mxu0 }
 0x121   : > { %v1486_v50 = vmax.f32 %v1258_v42, 0.0  ;;  %v1261_v52 = vadd.f32 %v2784_v48, %v3085_v3  ;;  %v1252_v54 = vpop.f32.mrb[31].mxu1  ;;  %v1420_v55 = vmax.f32 %v994_v45, 0.0  ;;  %v997_v57 = vadd.f32 %v3085_v3, %v996_v53 }
 0x122   : > { %v1484_v56 = vmax.f32 %v1250_v46, 0.0  ;;  %v1253_v58 = vadd.f32 %v3085_v3, %v1252_v54  ;;  %v2518_v59 = vpack.c.bf16 %v1422_v49, %v1422_v49  ;;  %v1423_v61 = vmax.f32 %v1005_v51, 0.0 }
 0x123   : > { %v2582_v60 = vpack.c.bf16 %v1486_v50, %v1486_v50  ;;  %v1487_v62 = vmax.f32 %v1261_v52, 0.0  ;;  %v2516_v63 = vpack.c.bf16 %v1420_v55, %v1420_v55  ;;  %v1421_v1 = vmax.f32 %v997_v57, 0.0 }
 0x124   : > { %v2580_v0 = vpack.c.bf16 %v1484_v56, %v1484_v56  ;;  %v1485_v2 = vmax.f32 %v1253_v58, 0.0  ;;  %2063 = vst.msk [vmem:[%s3098_s29 + $0x78] sm:$0xf] %vm2032_vm1, %v2518_v59  ;;  %v2519_v4 = vpack.c.bf16 %v1423_v61, %v1423_v61 }
 0x125   : > { %2127 = vst.msk [vmem:[%s3098_s29 + $0x178] sm:$0xf] %vm2032_vm1, %v2582_v60  ;;  %v2583_v5 = vpack.c.bf16 %v1487_v62, %v1487_v62  ;;  %2061 = vst.msk [vmem:[%s3098_s29 + $0x70] sm:$0xf] %vm2032_vm1, %v2516_v63  ;;  %v2517_v6 = vpack.c.bf16 %v1421_v1, %v1421_v1  ;;  %v2723_v8 = vpop.f32.mrb[32].mxu0 }
 0x126   : > { %2125 = vst.msk [vmem:[%s3098_s29 + $0x170] sm:$0xf] %vm2032_vm1, %v2580_v0  ;;  %v2581_v7 = vpack.c.bf16 %v1485_v2, %v1485_v2  ;;  %v2787_v9 = vpop.f32.mrb[32].mxu1  ;;  %2064 = vst.msk [vmem:[%s3098_s29 + $0x7c] sm:$0xf] %vm2032_vm1, %v2519_v4  ;;  %v1018_v10 = vadd.f32 %v2723_v8, %v3085_v3  ;;  %v1009_v12 = vpop.f32.mrb[33].mxu0 }
 0x127   : > { %2128 = vst.msk [vmem:[%s3098_s29 + $0x17c] sm:$0xf] %vm2032_vm1, %v2583_v5  ;;  %v1274_v11 = vadd.f32 %v2787_v9, %v3085_v3  ;;  %v1265_v13 = vpop.f32.mrb[33].mxu1  ;;  %2062 = vst.msk [vmem:[%s3098_s29 + $0x74] sm:$0xf] %vm2032_vm1, %v2517_v6  ;;  %v1010_v14 = vadd.f32 %v3085_v3, %v1009_v12  ;;  %v2724_v16 = vpop.f32.mrb[34].mxu0 }
 0x128   : > { %2126 = vst.msk [vmem:[%s3098_s29 + $0x174] sm:$0xf] %vm2032_vm1, %v2581_v7  ;;  %v1266_v15 = vadd.f32 %v3085_v3, %v1265_v13  ;;  %v2788_v17 = vpop.f32.mrb[34].mxu1  ;;  %v1426_v18 = vmax.f32 %v1018_v10, 0.0  ;;  %v1021_v20 = vadd.f32 %v2724_v16, %v3085_v3  ;;  %v1012_v22 = vpop.f32.mrb[35].mxu0 }
 0x129   : > { %v1490_v19 = vmax.f32 %v1274_v11, 0.0  ;;  %v1277_v21 = vadd.f32 %v2788_v17, %v3085_v3  ;;  %v1268_v23 = vpop.f32.mrb[35].mxu1  ;;  %v1424_v24 = vmax.f32 %v1010_v14, 0.0  ;;  %v1013_v26 = vadd.f32 %v3085_v3, %v1012_v22 }
 0x12a   : > { %v1488_v25 = vmax.f32 %v1266_v15, 0.0  ;;  %v1269_v27 = vadd.f32 %v3085_v3, %v1268_v23  ;;  %v2522_v28 = vpack.c.bf16 %v1426_v18, %v1426_v18  ;;  %v1427_v30 = vmax.f32 %v1021_v20, 0.0 }
 0x12b   : > { %v2586_v29 = vpack.c.bf16 %v1490_v19, %v1490_v19  ;;  %v1491_v31 = vmax.f32 %v1277_v21, 0.0  ;;  %v2520_v32 = vpack.c.bf16 %v1424_v24, %v1424_v24  ;;  %v1425_v34 = vmax.f32 %v1013_v26, 0.0 }
 0x12c   : > { %v2584_v33 = vpack.c.bf16 %v1488_v25, %v1488_v25  ;;  %v1489_v35 = vmax.f32 %v1269_v27, 0.0  ;;  %2067 = vst.msk [vmem:[%s3098_s29 + $0x88] sm:$0xf] %vm2032_vm1, %v2522_v28  ;;  %v2523_v36 = vpack.c.bf16 %v1427_v30, %v1427_v30 }
 0x12d   : > { %2131 = vst.msk [vmem:[%s3098_s29 + $0x188] sm:$0xf] %vm2032_vm1, %v2586_v29  ;;  %v2587_v37 = vpack.c.bf16 %v1491_v31, %v1491_v31  ;;  %2065 = vst.msk [vmem:[%s3098_s29 + $0x80] sm:$0xf] %vm2032_vm1, %v2520_v32  ;;  %v2521_v38 = vpack.c.bf16 %v1425_v34, %v1425_v34  ;;  %v2727_v40 = vpop.f32.mrb[36].mxu0 }
 0x12e   : > { %2129 = vst.msk [vmem:[%s3098_s29 + $0x180] sm:$0xf] %vm2032_vm1, %v2584_v33  ;;  %v2585_v39 = vpack.c.bf16 %v1489_v35, %v1489_v35  ;;  %v2791_v41 = vpop.f32.mrb[36].mxu1  ;;  %2068 = vst.msk [vmem:[%s3098_s29 + $0x8c] sm:$0xf] %vm2032_vm1, %v2523_v36  ;;  %v1034_v42 = vadd.f32 %v2727_v40, %v3085_v3  ;;  %v1025_v44 = vpop.f32.mrb[37].mxu0 }
 0x12f   : > { %2132 = vst.msk [vmem:[%s3098_s29 + $0x18c] sm:$0xf] %vm2032_vm1, %v2587_v37  ;;  %v1290_v43 = vadd.f32 %v2791_v41, %v3085_v3  ;;  %v1281_v45 = vpop.f32.mrb[37].mxu1  ;;  %2066 = vst.msk [vmem:[%s3098_s29 + $0x84] sm:$0xf] %vm2032_vm1, %v2521_v38  ;;  %v1026_v46 = vadd.f32 %v3085_v3, %v1025_v44  ;;  %v2728_v48 = vpop.f32.mrb[38].mxu0 }
 0x130   : > { %2130 = vst.msk [vmem:[%s3098_s29 + $0x184] sm:$0xf] %vm2032_vm1, %v2585_v39  ;;  %v1282_v47 = vadd.f32 %v3085_v3, %v1281_v45  ;;  %v2792_v49 = vpop.f32.mrb[38].mxu1  ;;  %v1430_v50 = vmax.f32 %v1034_v42, 0.0  ;;  %v1037_v52 = vadd.f32 %v2728_v48, %v3085_v3  ;;  %v1028_v54 = vpop.f32.mrb[39].mxu0 }
 0x131   : > { %v1494_v51 = vmax.f32 %v1290_v43, 0.0  ;;  %v1293_v53 = vadd.f32 %v2792_v49, %v3085_v3  ;;  %v1284_v55 = vpop.f32.mrb[39].mxu1  ;;  %v1428_v56 = vmax.f32 %v1026_v46, 0.0  ;;  %v1029_v58 = vadd.f32 %v3085_v3, %v1028_v54 }
 0x132   : > { %v1492_v57 = vmax.f32 %v1282_v47, 0.0  ;;  %v1285_v59 = vadd.f32 %v3085_v3, %v1284_v55  ;;  %v2526_v60 = vpack.c.bf16 %v1430_v50, %v1430_v50  ;;  %v1431_v62 = vmax.f32 %v1037_v52, 0.0 }
 0x133   : > { %v2590_v61 = vpack.c.bf16 %v1494_v51, %v1494_v51  ;;  %v1495_v63 = vmax.f32 %v1293_v53, 0.0  ;;  %v2524_v0 = vpack.c.bf16 %v1428_v56, %v1428_v56  ;;  %v1429_v2 = vmax.f32 %v1029_v58, 0.0 }
 0x134   : > { %v2588_v1 = vpack.c.bf16 %v1492_v57, %v1492_v57  ;;  %v1493_v4 = vmax.f32 %v1285_v59, 0.0  ;;  %2071 = vst.msk [vmem:[%s3098_s29 + $0x98] sm:$0xf] %vm2032_vm1, %v2526_v60  ;;  %v2527_v5 = vpack.c.bf16 %v1431_v62, %v1431_v62 }
 0x135   : > { %2135 = vst.msk [vmem:[%s3098_s29 + $0x198] sm:$0xf] %vm2032_vm1, %v2590_v61  ;;  %v2591_v6 = vpack.c.bf16 %v1495_v63, %v1495_v63  ;;  %2069 = vst.msk [vmem:[%s3098_s29 + $0x90] sm:$0xf] %vm2032_vm1, %v2524_v0  ;;  %v2525_v7 = vpack.c.bf16 %v1429_v2, %v1429_v2  ;;  %v2731_v9 = vpop.f32.mrb[40].mxu0 }
 0x136   : > { %2133 = vst.msk [vmem:[%s3098_s29 + $0x190] sm:$0xf] %vm2032_vm1, %v2588_v1  ;;  %v2589_v8 = vpack.c.bf16 %v1493_v4, %v1493_v4  ;;  %v2795_v10 = vpop.f32.mrb[40].mxu1  ;;  %2072 = vst.msk [vmem:[%s3098_s29 + $0x9c] sm:$0xf] %vm2032_vm1, %v2527_v5  ;;  %v1050_v11 = vadd.f32 %v2731_v9, %v3085_v3  ;;  %v1041_v13 = vpop.f32.mrb[41].mxu0 }
 0x137   : > { %2136 = vst.msk [vmem:[%s3098_s29 + $0x19c] sm:$0xf] %vm2032_vm1, %v2591_v6  ;;  %v1306_v12 = vadd.f32 %v2795_v10, %v3085_v3  ;;  %v1297_v14 = vpop.f32.mrb[41].mxu1  ;;  %2070 = vst.msk [vmem:[%s3098_s29 + $0x94] sm:$0xf] %vm2032_vm1, %v2525_v7  ;;  %v1042_v15 = vadd.f32 %v3085_v3, %v1041_v13  ;;  %v2732_v17 = vpop.f32.mrb[42].mxu0 }
 0x138   : > { %2134 = vst.msk [vmem:[%s3098_s29 + $0x194] sm:$0xf] %vm2032_vm1, %v2589_v8  ;;  %v1298_v16 = vadd.f32 %v3085_v3, %v1297_v14  ;;  %v2796_v18 = vpop.f32.mrb[42].mxu1  ;;  %v1434_v19 = vmax.f32 %v1050_v11, 0.0  ;;  %v1053_v21 = vadd.f32 %v2732_v17, %v3085_v3  ;;  %v1044_v23 = vpop.f32.mrb[43].mxu0 }
 0x139   : > { %v1498_v20 = vmax.f32 %v1306_v12, 0.0  ;;  %v1309_v22 = vadd.f32 %v2796_v18, %v3085_v3  ;;  %v1300_v24 = vpop.f32.mrb[43].mxu1  ;;  %v1432_v25 = vmax.f32 %v1042_v15, 0.0  ;;  %v1045_v27 = vadd.f32 %v3085_v3, %v1044_v23 }
 0x13a   : > { %v1496_v26 = vmax.f32 %v1298_v16, 0.0  ;;  %v1301_v28 = vadd.f32 %v3085_v3, %v1300_v24  ;;  %v2530_v29 = vpack.c.bf16 %v1434_v19, %v1434_v19  ;;  %v1435_v31 = vmax.f32 %v1053_v21, 0.0 }
 0x13b   : > { %v2594_v30 = vpack.c.bf16 %v1498_v20, %v1498_v20  ;;  %v1499_v32 = vmax.f32 %v1309_v22, 0.0  ;;  %v2528_v33 = vpack.c.bf16 %v1432_v25, %v1432_v25  ;;  %v1433_v35 = vmax.f32 %v1045_v27, 0.0 }
 0x13c   : > { %v2592_v34 = vpack.c.bf16 %v1496_v26, %v1496_v26  ;;  %v1497_v36 = vmax.f32 %v1301_v28, 0.0  ;;  %2075 = vst.msk [vmem:[%s3098_s29 + $0xa8] sm:$0xf] %vm2032_vm1, %v2530_v29  ;;  %v2531_v37 = vpack.c.bf16 %v1435_v31, %v1435_v31 }
 0x13d   : > { %2139 = vst.msk [vmem:[%s3098_s29 + $0x1a8] sm:$0xf] %vm2032_vm1, %v2594_v30  ;;  %v2595_v38 = vpack.c.bf16 %v1499_v32, %v1499_v32  ;;  %2073 = vst.msk [vmem:[%s3098_s29 + $0xa0] sm:$0xf] %vm2032_vm1, %v2528_v33  ;;  %v2529_v39 = vpack.c.bf16 %v1433_v35, %v1433_v35  ;;  %v2735_v41 = vpop.f32.mrb[44].mxu0 }
 0x13e   : > { %2137 = vst.msk [vmem:[%s3098_s29 + $0x1a0] sm:$0xf] %vm2032_vm1, %v2592_v34  ;;  %v2593_v40 = vpack.c.bf16 %v1497_v36, %v1497_v36  ;;  %v2799_v42 = vpop.f32.mrb[44].mxu1  ;;  %2076 = vst.msk [vmem:[%s3098_s29 + $0xac] sm:$0xf] %vm2032_vm1, %v2531_v37  ;;  %v1066_v43 = vadd.f32 %v2735_v41, %v3085_v3  ;;  %v1057_v45 = vpop.f32.mrb[45].mxu0 }
 0x13f   : > { %2140 = vst.msk [vmem:[%s3098_s29 + $0x1ac] sm:$0xf] %vm2032_vm1, %v2595_v38  ;;  %v1322_v44 = vadd.f32 %v2799_v42, %v3085_v3  ;;  %v1313_v46 = vpop.f32.mrb[45].mxu1  ;;  %2074 = vst.msk [vmem:[%s3098_s29 + $0xa4] sm:$0xf] %vm2032_vm1, %v2529_v39  ;;  %v1058_v47 = vadd.f32 %v3085_v3, %v1057_v45  ;;  %v2736_v49 = vpop.f32.mrb[46].mxu0 }
 0x140   : > { %2138 = vst.msk [vmem:[%s3098_s29 + $0x1a4] sm:$0xf] %vm2032_vm1, %v2593_v40  ;;  %v1314_v48 = vadd.f32 %v3085_v3, %v1313_v46  ;;  %v2800_v50 = vpop.f32.mrb[46].mxu1  ;;  %v1438_v51 = vmax.f32 %v1066_v43, 0.0  ;;  %v1069_v53 = vadd.f32 %v2736_v49, %v3085_v3  ;;  %v1060_v55 = vpop.f32.mrb[47].mxu0 }
 0x141   : > { %v1502_v52 = vmax.f32 %v1322_v44, 0.0  ;;  %v1325_v54 = vadd.f32 %v2800_v50, %v3085_v3  ;;  %v1316_v56 = vpop.f32.mrb[47].mxu1  ;;  %v1436_v57 = vmax.f32 %v1058_v47, 0.0  ;;  %v1061_v59 = vadd.f32 %v3085_v3, %v1060_v55  ;;  %v3405_v43 = vld [vmem:[%s3488_s2] ss:$0 sm:$0xff] }
 0x142   : > { %v1500_v58 = vmax.f32 %v1314_v48, 0.0  ;;  %v1317_v60 = vadd.f32 %v3085_v3, %v1316_v56  ;;  %v2534_v61 = vpack.c.bf16 %v1438_v51, %v1438_v51  ;;  %v1439_v63 = vmax.f32 %v1069_v53, 0.0 }
 0x143   : > { %v2598_v62 = vpack.c.bf16 %v1502_v52, %v1502_v52  ;;  %v1503_v0 = vmax.f32 %v1325_v54, 0.0  ;;  %v2532_v1 = vpack.c.bf16 %v1436_v57, %v1436_v57  ;;  %v1437_v4 = vmax.f32 %v1061_v59, 0.0 }
 0x144   : > { %v2596_v2 = vpack.c.bf16 %v1500_v58, %v1500_v58  ;;  %v1501_v5 = vmax.f32 %v1317_v60, 0.0  ;;  %2079 = vst.msk [vmem:[%s3098_s29 + $0xb8] sm:$0xf] %vm2032_vm1, %v2534_v61  ;;  %v2535_v6 = vpack.c.bf16 %v1439_v63, %v1439_v63 }
 0x145   : > { %2143 = vst.msk [vmem:[%s3098_s29 + $0x1b8] sm:$0xf] %vm2032_vm1, %v2598_v62  ;;  %v2599_v7 = vpack.c.bf16 %v1503_v0, %v1503_v0  ;;  %2077 = vst.msk [vmem:[%s3098_s29 + $0xb0] sm:$0xf] %vm2032_vm1, %v2532_v1  ;;  %v2533_v8 = vpack.c.bf16 %v1437_v4, %v1437_v4  ;;  %v2739_v10 = vpop.f32.mrb[48].mxu0 }
 0x146   : > { %2141 = vst.msk [vmem:[%s3098_s29 + $0x1b0] sm:$0xf] %vm2032_vm1, %v2596_v2  ;;  %v2597_v9 = vpack.c.bf16 %v1501_v5, %v1501_v5  ;;  %v2803_v11 = vpop.f32.mrb[48].mxu1  ;;  %2080 = vst.msk [vmem:[%s3098_s29 + $0xbc] sm:$0xf] %vm2032_vm1, %v2535_v6  ;;  %v1082_v12 = vadd.f32 %v2739_v10, %v3085_v3  ;;  %v1073_v14 = vpop.f32.mrb[49].mxu0 }
 0x147   : > { %2144 = vst.msk [vmem:[%s3098_s29 + $0x1bc] sm:$0xf] %vm2032_vm1, %v2599_v7  ;;  %v1338_v13 = vadd.f32 %v2803_v11, %v3085_v3  ;;  %v1329_v15 = vpop.f32.mrb[49].mxu1  ;;  %2078 = vst.msk [vmem:[%s3098_s29 + $0xb4] sm:$0xf] %vm2032_vm1, %v2533_v8  ;;  %v1074_v16 = vadd.f32 %v3085_v3, %v1073_v14  ;;  %v2740_v18 = vpop.f32.mrb[50].mxu0 }
 0x148   : > { %2142 = vst.msk [vmem:[%s3098_s29 + $0x1b4] sm:$0xf] %vm2032_vm1, %v2597_v9  ;;  %v1330_v17 = vadd.f32 %v3085_v3, %v1329_v15  ;;  %v2804_v19 = vpop.f32.mrb[50].mxu1  ;;  %v1442_v20 = vmax.f32 %v1082_v12, 0.0  ;;  %v1085_v22 = vadd.f32 %v2740_v18, %v3085_v3  ;;  %v1076_v24 = vpop.f32.mrb[51].mxu0 }
 0x149   : > { %v1506_v21 = vmax.f32 %v1338_v13, 0.0  ;;  %v1341_v23 = vadd.f32 %v2804_v19, %v3085_v3  ;;  %v1332_v25 = vpop.f32.mrb[51].mxu1  ;;  %v1440_v26 = vmax.f32 %v1074_v16, 0.0  ;;  %v1077_v28 = vadd.f32 %v3085_v3, %v1076_v24 }
 0x14a   : > { %v1504_v27 = vmax.f32 %v1330_v17, 0.0  ;;  %v1333_v29 = vadd.f32 %v3085_v3, %v1332_v25  ;;  %v2538_v30 = vpack.c.bf16 %v1442_v20, %v1442_v20  ;;  %v1443_v32 = vmax.f32 %v1085_v22, 0.0 }
 0x14b   : > { %v2602_v31 = vpack.c.bf16 %v1506_v21, %v1506_v21  ;;  %v1507_v33 = vmax.f32 %v1341_v23, 0.0  ;;  %v2536_v34 = vpack.c.bf16 %v1440_v26, %v1440_v26  ;;  %v1441_v36 = vmax.f32 %v1077_v28, 0.0 }
 0x14c   : > { %v2600_v35 = vpack.c.bf16 %v1504_v27, %v1504_v27  ;;  %v1505_v37 = vmax.f32 %v1333_v29, 0.0  ;;  %2083 = vst.msk [vmem:[%s3098_s29 + $0xc8] sm:$0xf] %vm2032_vm1, %v2538_v30  ;;  %v2539_v38 = vpack.c.bf16 %v1443_v32, %v1443_v32 }
 0x14d   : > { %2147 = vst.msk [vmem:[%s3098_s29 + $0x1c8] sm:$0xf] %vm2032_vm1, %v2602_v31  ;;  %v2603_v39 = vpack.c.bf16 %v1507_v33, %v1507_v33  ;;  %2081 = vst.msk [vmem:[%s3098_s29 + $0xc0] sm:$0xf] %vm2032_vm1, %v2536_v34  ;;  %v2537_v3 = vpack.c.bf16 %v1441_v36, %v1441_v36  ;;  %v2743_v41 = vpop.f32.mrb[52].mxu0 }
 0x14e   : > { %2145 = vst.msk [vmem:[%s3098_s29 + $0x1c0] sm:$0xf] %vm2032_vm1, %v2600_v35  ;;  %v2601_v40 = vpack.c.bf16 %v1505_v37, %v1505_v37  ;;  %v2807_v42 = vpop.f32.mrb[52].mxu1  ;;  %2084 = vst.msk [vmem:[%s3098_s29 + $0xcc] sm:$0xf] %vm2032_vm1, %v2539_v38  ;;  %v1098_v44 = vadd.f32 %v3405_v43, %v2743_v41  ;;  %v1089_v46 = vpop.f32.mrb[53].mxu0 }
 0x14f   : > { %2148 = vst.msk [vmem:[%s3098_s29 + $0x1cc] sm:$0xf] %vm2032_vm1, %v2603_v39  ;;  %v1354_v45 = vadd.f32 %v3405_v43, %v2807_v42  ;;  %v1345_v47 = vpop.f32.mrb[53].mxu1  ;;  %2082 = vst.msk [vmem:[%s3098_s29 + $0xc4] sm:$0xf] %vm2032_vm1, %v2537_v3  ;;  %v1090_v48 = vadd.f32 %v3405_v43, %v1089_v46  ;;  %v2744_v50 = vpop.f32.mrb[54].mxu0 }
 0x150   : > { %2146 = vst.msk [vmem:[%s3098_s29 + $0x1c4] sm:$0xf] %vm2032_vm1, %v2601_v40  ;;  %v1346_v49 = vadd.f32 %v3405_v43, %v1345_v47  ;;  %v2808_v51 = vpop.f32.mrb[54].mxu1  ;;  %v1446_v52 = vmax.f32 %v1098_v44, 0.0  ;;  %v1101_v54 = vadd.f32 %v3405_v43, %v2744_v50  ;;  %v1092_v56 = vpop.f32.mrb[55].mxu0 }
 0x151   : > { %v1510_v53 = vmax.f32 %v1354_v45, 0.0  ;;  %v1357_v55 = vadd.f32 %v3405_v43, %v2808_v51  ;;  %v1348_v57 = vpop.f32.mrb[55].mxu1  ;;  %v1444_v58 = vmax.f32 %v1090_v48, 0.0  ;;  %v1093_v60 = vadd.f32 %v3405_v43, %v1092_v56 }
 0x152   : > { %v1508_v59 = vmax.f32 %v1346_v49, 0.0  ;;  %v1349_v61 = vadd.f32 %v3405_v43, %v1348_v57  ;;  %v2542_v62 = vpack.c.bf16 %v1446_v52, %v1446_v52  ;;  %v1447_v0 = vmax.f32 %v1101_v54, 0.0 }
 0x153   : > { %v2606_v63 = vpack.c.bf16 %v1510_v53, %v1510_v53  ;;  %v1511_v1 = vmax.f32 %v1357_v55, 0.0  ;;  %v2540_v2 = vpack.c.bf16 %v1444_v58, %v1444_v58  ;;  %v1445_v5 = vmax.f32 %v1093_v60, 0.0 }
 0x154   : > { %v2604_v4 = vpack.c.bf16 %v1508_v59, %v1508_v59  ;;  %v1509_v6 = vmax.f32 %v1349_v61, 0.0  ;;  %2087 = vst.msk [vmem:[%s3098_s29 + $0xd8] sm:$0xf] %vm2032_vm1, %v2542_v62  ;;  %v2543_v7 = vpack.c.bf16 %v1447_v0, %v1447_v0 }
 0x155   : > { %2151 = vst.msk [vmem:[%s3098_s29 + $0x1d8] sm:$0xf] %vm2032_vm1, %v2606_v63  ;;  %v2607_v8 = vpack.c.bf16 %v1511_v1, %v1511_v1  ;;  %2085 = vst.msk [vmem:[%s3098_s29 + $0xd0] sm:$0xf] %vm2032_vm1, %v2540_v2  ;;  %v2541_v9 = vpack.c.bf16 %v1445_v5, %v1445_v5  ;;  %v2747_v11 = vpop.f32.mrb[56].mxu0 }
 0x156   : > { %2149 = vst.msk [vmem:[%s3098_s29 + $0x1d0] sm:$0xf] %vm2032_vm1, %v2604_v4  ;;  %v2605_v10 = vpack.c.bf16 %v1509_v6, %v1509_v6  ;;  %v2811_v12 = vpop.f32.mrb[56].mxu1  ;;  %2088 = vst.msk [vmem:[%s3098_s29 + $0xdc] sm:$0xf] %vm2032_vm1, %v2543_v7  ;;  %v1114_v13 = vadd.f32 %v3405_v43, %v2747_v11  ;;  %v1105_v15 = vpop.f32.mrb[57].mxu0 }
 0x157   : > { %2152 = vst.msk [vmem:[%s3098_s29 + $0x1dc] sm:$0xf] %vm2032_vm1, %v2607_v8  ;;  %v1370_v14 = vadd.f32 %v3405_v43, %v2811_v12  ;;  %v1361_v16 = vpop.f32.mrb[57].mxu1  ;;  %2086 = vst.msk [vmem:[%s3098_s29 + $0xd4] sm:$0xf] %vm2032_vm1, %v2541_v9  ;;  %v1106_v17 = vadd.f32 %v3405_v43, %v1105_v15  ;;  %v2748_v19 = vpop.f32.mrb[58].mxu0 }
 0x158   : > { %2150 = vst.msk [vmem:[%s3098_s29 + $0x1d4] sm:$0xf] %vm2032_vm1, %v2605_v10  ;;  %v1362_v18 = vadd.f32 %v3405_v43, %v1361_v16  ;;  %v2812_v20 = vpop.f32.mrb[58].mxu1  ;;  %v1450_v21 = vmax.f32 %v1114_v13, 0.0  ;;  %v1117_v23 = vadd.f32 %v3405_v43, %v2748_v19  ;;  %v1108_v25 = vpop.f32.mrb[59].mxu0 }
 0x159   : > { %v1514_v22 = vmax.f32 %v1370_v14, 0.0  ;;  %v1373_v24 = vadd.f32 %v3405_v43, %v2812_v20  ;;  %v1364_v26 = vpop.f32.mrb[59].mxu1  ;;  %v1448_v27 = vmax.f32 %v1106_v17, 0.0  ;;  %v1109_v29 = vadd.f32 %v3405_v43, %v1108_v25 }
 0x15a   : > { %v1512_v28 = vmax.f32 %v1362_v18, 0.0  ;;  %v1365_v30 = vadd.f32 %v3405_v43, %v1364_v26  ;;  %v2546_v31 = vpack.c.bf16 %v1450_v21, %v1450_v21  ;;  %v1451_v33 = vmax.f32 %v1117_v23, 0.0 }
 0x15b   : > { %v2610_v32 = vpack.c.bf16 %v1514_v22, %v1514_v22  ;;  %v1515_v34 = vmax.f32 %v1373_v24, 0.0  ;;  %v2544_v35 = vpack.c.bf16 %v1448_v27, %v1448_v27  ;;  %v1449_v37 = vmax.f32 %v1109_v29, 0.0 }
 0x15c   : > { %v2608_v36 = vpack.c.bf16 %v1512_v28, %v1512_v28  ;;  %v1513_v38 = vmax.f32 %v1365_v30, 0.0  ;;  %2091 = vst.msk [vmem:[%s3098_s29 + $0xe8] sm:$0xf] %vm2032_vm1, %v2546_v31  ;;  %v2547_v39 = vpack.c.bf16 %v1451_v33, %v1451_v33 }
 0x15d   : > { %2155 = vst.msk [vmem:[%s3098_s29 + $0x1e8] sm:$0xf] %vm2032_vm1, %v2610_v32  ;;  %v2611_v3 = vpack.c.bf16 %v1515_v34, %v1515_v34  ;;  %2089 = vst.msk [vmem:[%s3098_s29 + $0xe0] sm:$0xf] %vm2032_vm1, %v2544_v35  ;;  %v2545_v40 = vpack.c.bf16 %v1449_v37, %v1449_v37  ;;  %v2751_v42 = vpop.f32.mrb[60].mxu0 }
 0x15e   : > { %2153 = vst.msk [vmem:[%s3098_s29 + $0x1e0] sm:$0xf] %vm2032_vm1, %v2608_v36  ;;  %v2609_v41 = vpack.c.bf16 %v1513_v38, %v1513_v38  ;;  %v2815_v44 = vpop.f32.mrb[60].mxu1  ;;  %2092 = vst.msk [vmem:[%s3098_s29 + $0xec] sm:$0xf] %vm2032_vm1, %v2547_v39  ;;  %v1130_v45 = vadd.f32 %v3405_v43, %v2751_v42  ;;  %v1121_v47 = vpop.f32.mrb[61].mxu0 }
 0x15f   : > { %2156 = vst.msk [vmem:[%s3098_s29 + $0x1ec] sm:$0xf] %vm2032_vm1, %v2611_v3  ;;  %v1386_v46 = vadd.f32 %v3405_v43, %v2815_v44  ;;  %v1377_v48 = vpop.f32.mrb[61].mxu1  ;;  %2090 = vst.msk [vmem:[%s3098_s29 + $0xe4] sm:$0xf] %vm2032_vm1, %v2545_v40  ;;  %v1122_v49 = vadd.f32 %v3405_v43, %v1121_v47  ;;  %v2752_v51 = vpop.f32.mrb[62].mxu0 }
 0x160   : > { %2154 = vst.msk [vmem:[%s3098_s29 + $0x1e4] sm:$0xf] %vm2032_vm1, %v2609_v41  ;;  %v1378_v50 = vadd.f32 %v3405_v43, %v1377_v48  ;;  %v2816_v52 = vpop.f32.mrb[62].mxu1  ;;  %v1454_v53 = vmax.f32 %v1130_v45, 0.0  ;;  %v1133_v55 = vadd.f32 %v3405_v43, %v2752_v51  ;;  %v1124_v57 = vpop.f32.mrb[63].mxu0 }
 0x161   : > { %v1518_v54 = vmax.f32 %v1386_v46, 0.0  ;;  %v1389_v56 = vadd.f32 %v3405_v43, %v2816_v52  ;;  %v1380_v58 = vpop.f32.mrb[63].mxu1  ;;  %v1452_v59 = vmax.f32 %v1122_v49, 0.0  ;;  %v1125_v61 = vadd.f32 %v3405_v43, %v1124_v57 }
 0x162   : > { %v1516_v60 = vmax.f32 %v1378_v50, 0.0  ;;  %v1381_v62 = vadd.f32 %v3405_v43, %v1380_v58  ;;  %v2550_v63 = vpack.c.bf16 %v1454_v53, %v1454_v53  ;;  %v1455_v1 = vmax.f32 %v1133_v55, 0.0 }
 0x163   : > { %v2614_v0 = vpack.c.bf16 %v1518_v54, %v1518_v54  ;;  %v1519_v2 = vmax.f32 %v1389_v56, 0.0  ;;  %v2548_v4 = vpack.c.bf16 %v1452_v59, %v1452_v59  ;;  %v1453_v6 = vmax.f32 %v1125_v61, 0.0 }
 0x164   : > { %v2612_v5 = vpack.c.bf16 %v1516_v60, %v1516_v60  ;;  %v1517_v7 = vmax.f32 %v1381_v62, 0.0  ;;  %2095 = vst.msk [vmem:[%s3098_s29 + $0xf8] sm:$0xf] %vm2032_vm1, %v2550_v63  ;;  %v2551_v8 = vpack.c.bf16 %v1455_v1, %v1455_v1 }
 0x165   : > { %2159 = vst.msk [vmem:[%s3098_s29 + $0x1f8] sm:$0xf] %vm2032_vm1, %v2614_v0  ;;  %v2615_v9 = vpack.c.bf16 %v1519_v2, %v1519_v2  ;;  %2093 = vst.msk [vmem:[%s3098_s29 + $0xf0] sm:$0xf] %vm2032_vm1, %v2548_v4  ;;  %v2549_v43 = vpack.c.bf16 %v1453_v6, %v1453_v6 }
 0x166   : > { %2157 = vst.msk [vmem:[%s3098_s29 + $0x1f0] sm:$0xf] %vm2032_vm1, %v2612_v5  ;;  %v2613_v10 = vpack.c.bf16 %v1517_v7, %v1517_v7  ;;  %2096 = vst.msk [vmem:[%s3098_s29 + $0xfc] sm:$0xf] %vm2032_vm1, %v2551_v8 }
 0x167   : > { %2160 = vst.msk [vmem:[%s3098_s29 + $0x1fc] sm:$0xf] %vm2032_vm1, %v2615_v9  ;;  %2094 = vst.msk [vmem:[%s3098_s29 + $0xf4] sm:$0xf] %vm2032_vm1, %v2549_v43 }
 0x168   : > { %2158 = vst.msk [vmem:[%s3098_s29 + $0x1f4] sm:$0xf] %vm2032_vm1, %v2613_v10 }
 0x169 PF: > { %s13_s12 = sadd.s32 1, %s2905_s12  }
 0x16a   : > { %p10_p4 = scmp.ge.s32.totalorder %s13_s12, 4  }
 0x16c   :  { %12 = sbr.rel (!%p10_p4) target bundleno = 1 (0x1), region = 62 }

// kernel: _lambda_.7
= control target key start
LH: loop header
LB: loop body
LE: loop exit
PB: predicated region body
PF: predicated region fallthrough
CT: control target
= control target key end

     0   :  { %v2656_v0 = vmov 0   ;;  %vm1944_vm0 = vcmask 519168   ;;  %s3519_s1 = inlined_call_operand.vmem [shape: bf16[512,64], index: 1, kind: input, shape index: {}]   ;;  %s3520_s0 = inlined_call_operand.vmem [shape: bf16[512,512], index: 0, kind: input, shape index: {}]   ;;  %s3521_s2 = inlined_call_operand.vmem [shape: f32[1,64], index: 2, kind: input, shape index: {}]   ;;  %s3522_s3 = inlined_call_operand.vmem [shape: bf16[512,64], index: 3, kind: output, shape index: {}]  }
   0x1   :  { %1046 = vmatprep.subr.bf16.mxu1 %v2656_v0  ;;  %1335 = vmatprep.subr.bf16.mxu0 %v2656_v0  ;;  %v2431_v1 = vld [vmem:[%s3519_s1] sm:$0xff]   ;;  %v2433_v3 = vld [vmem:[%s3519_s1 + $0x8] sm:$0xff]   ;;  %v2435_v5 = vld [vmem:[%s3519_s1 + $0x10] sm:$0xff]  }
   0x2   :  { %v2432_v2 = vld [vmem:[%s3519_s1 + $0x80] sm:$0xff]   ;;  %1047 = vmatpush1.bf16.msra.mxu1 %v2431_v1  ;;  %v2434_v4 = vld [vmem:[%s3519_s1 + $0x88] sm:$0xff]   ;;  %v2436_v6 = vld [vmem:[%s3519_s1 + $0x90] sm:$0xff]  }
   0x3   :  { %1336 = vmatpush1.bf16.msra.mxu0 %v2432_v2  ;;  %1048 = vmatprep.subr.bf16.mxu1 %v2656_v0  ;;  %v2437_v7 = vld [vmem:[%s3519_s1 + $0x18] sm:$0xff]   ;;  %v2439_v9 = vld [vmem:[%s3519_s1 + $0x20] sm:$0xff]   ;;  %v2441_v11 = vld [vmem:[%s3519_s1 + $0x28] sm:$0xff]  }
   0x4   :  { %1337 = vmatprep.subr.bf16.mxu0 %v2656_v0  ;;  %v2438_v8 = vld [vmem:[%s3519_s1 + $0x98] sm:$0xff]   ;;  %v2440_v10 = vld [vmem:[%s3519_s1 + $0xa0] sm:$0xff]   ;;  %v2442_v12 = vld [vmem:[%s3519_s1 + $0xa8] sm:$0xff]  }
   0x5   :  { %v2443_v13 = vld [vmem:[%s3519_s1 + $0x30] sm:$0xff]   ;;  %v2445_v15 = vld [vmem:[%s3519_s1 + $0x38] sm:$0xff]   ;;  %v2447_v17 = vld [vmem:[%s3519_s1 + $0x40] sm:$0xff]  }
   0x6   :  { %1049 = vmatpush1.bf16.msra.mxu1 %v2433_v3  ;;  %v2444_v14 = vld [vmem:[%s3519_s1 + $0xb0] sm:$0xff]   ;;  %v2446_v16 = vld [vmem:[%s3519_s1 + $0xb8] sm:$0xff]   ;;  %v2448_v18 = vld [vmem:[%s3519_s1 + $0xc0] sm:$0xff]  }
   0x7   :  { %1338 = vmatpush1.bf16.msra.mxu0 %v2434_v4  ;;  %1050 = vmatprep.subr.bf16.mxu1 %v2656_v0  ;;  %v2465_v19 = vld [vmem:[%s3520_s0 + $0x4] ss:$16 sps:$4 sm:$0xff]   ;;  %v2449_v20 = vld [vmem:[%s3519_s1 + $0x48] sm:$0xff]   ;;  %v2453_v25 = vld [vmem:[%s3519_s1 + $0x58] sm:$0xff]  }
   0x8   :  { %1339 = vmatprep.subr.bf16.mxu0 %v2656_v0  ;;  %v2468_v21 = vld [vmem:[%s3520_s0 + $0xc] ss:$16 sps:$4 sm:$0xff]   ;;  %1078 = vmatprep.mubr.bf16.mxu1 %v2465_v19  ;;  %v2451_v23 = vld [vmem:[%s3519_s1 + $0x50] sm:$0xff]   ;;  %v2455_v27 = vld [vmem:[%s3519_s1 + $0x60] sm:$0xff]  }
   0x9   :  { %v2450_v22 = vld [vmem:[%s3519_s1 + $0xc8] sm:$0xff]   ;;  %1367 = vmatprep.mubr.bf16.mxu0 %v2468_v21  ;;  %v2452_v24 = vld [vmem:[%s3519_s1 + $0xd0] sm:$0xff]   ;;  %v2454_v26 = vld [vmem:[%s3519_s1 + $0xd8] sm:$0xff]  }
   0xa   :  { %1051 = vmatpush1.bf16.msra.mxu1 %v2435_v5  ;;  %v2456_v28 = vld [vmem:[%s3519_s1 + $0xe0] sm:$0xff]   ;;  %v2457_v29 = vld [vmem:[%s3519_s1 + $0x68] sm:$0xff]   ;;  %v2459_v31 = vld [vmem:[%s3519_s1 + $0x70] sm:$0xff]  }
   0xb   :  { %1340 = vmatpush1.bf16.msra.mxu0 %v2436_v6  ;;  %1052 = vmatprep.subr.bf16.mxu1 %v2656_v0  ;;  %v2458_v30 = vld [vmem:[%s3519_s1 + $0xe8] sm:$0xff]   ;;  %v2460_v32 = vld [vmem:[%s3519_s1 + $0xf0] sm:$0xff]   ;;  %v2461_v33 = vld [vmem:[%s3519_s1 + $0x78] sm:$0xff]  }
   0xc   :  { %1341 = vmatprep.subr.bf16.mxu0 %v2656_v0  ;;  %v2462_v34 = vld [vmem:[%s3519_s1 + $0xf8] sm:$0xff]   ;;  %v2463_v35 = vld [vmem:[%s3520_s0] ss:$16 sps:$4 sm:$0xff]   ;;  %v2469_v37 = vld [vmem:[%s3520_s0 + $0x24] ss:$16 sps:$4 sm:$0xff]  }
   0xd   :  { %v2466_v36 = vld [vmem:[%s3520_s0 + $0x8] ss:$16 sps:$4 sm:$0xff]   ;;  %v2471_v38 = vld [vmem:[%s3520_s0 + $0x2c] ss:$16 sps:$4 sm:$0xff]   ;;  %v2473_v39 = vld [vmem:[%s3520_s0 + $0x20] ss:$16 sps:$4 sm:$0xff]  }
   0xe   :  { %1053 = vmatpush1.bf16.msra.mxu1 %v2437_v7  ;;  %v2474_v40 = vld [vmem:[%s3520_s0 + $0x28] ss:$16 sps:$4 sm:$0xff]   ;;  %v2475_v41 = vld [vmem:[%s3520_s0 + $0x44] ss:$16 sps:$4 sm:$0xff]   ;;  %v2477_v42 = vld [vmem:[%s3520_s0 + $0x4c] ss:$16 sps:$4 sm:$0xff]  }
   0xf   :  { %1342 = vmatpush1.bf16.msra.mxu0 %v2438_v8  ;;  %1054 = vmatprep.subr.bf16.mxu1 %v2656_v0  ;;  %v2479_v43 = vld [vmem:[%s3520_s0 + $0x40] ss:$16 sps:$4 sm:$0xff]   ;;  %v2480_v44 = vld [vmem:[%s3520_s0 + $0x48] ss:$16 sps:$4 sm:$0xff]   ;;  %v2481_v45 = vld [vmem:[%s3520_s0 + $0x64] ss:$16 sps:$4 sm:$0xff]  }
  0x10   :  { %1343 = vmatprep.subr.bf16.mxu0 %v2656_v0  ;;  %v2483_v46 = vld [vmem:[%s3520_s0 + $0x6c] ss:$16 sps:$4 sm:$0xff]   ;;  %v2485_v47 = vld [vmem:[%s3520_s0 + $0x60] ss:$16 sps:$4 sm:$0xff]   ;;  %v2486_v48 = vld [vmem:[%s3520_s0 + $0x68] ss:$16 sps:$4 sm:$0xff]  }
  0x11   :  { %v2487_v49 = vld [vmem:[%s3520_s0 + $0x84] ss:$16 sps:$4 sm:$0xff]   ;;  %v2489_v50 = vld [vmem:[%s3520_s0 + $0x8c] ss:$16 sps:$4 sm:$0xff]   ;;  %v2491_v51 = vld [vmem:[%s3520_s0 + $0x80] ss:$16 sps:$4 sm:$0xff]  }
  0x12   :  { %1055 = vmatpush1.bf16.msra.mxu1 %v2439_v9  ;;  %v2492_v52 = vld [vmem:[%s3520_s0 + $0x88] ss:$16 sps:$4 sm:$0xff]   ;;  %v2493_v53 = vld [vmem:[%s3520_s0 + $0xa4] ss:$16 sps:$4 sm:$0xff]   ;;  %v2495_v54 = vld [vmem:[%s3520_s0 + $0xac] ss:$16 sps:$4 sm:$0xff]  }
  0x13   :  { %1344 = vmatpush1.bf16.msra.mxu0 %v2440_v10  ;;  %1056 = vmatprep.subr.bf16.mxu1 %v2656_v0  ;;  %v2497_v55 = vld [vmem:[%s3520_s0 + $0xa0] ss:$16 sps:$4 sm:$0xff]   ;;  %v2498_v56 = vld [vmem:[%s3520_s0 + $0xa8] ss:$16 sps:$4 sm:$0xff]   ;;  %v2499_v57 = vld [vmem:[%s3520_s0 + $0xc4] ss:$16 sps:$4 sm:$0xff]  }
  0x14   :  { %1345 = vmatprep.subr.bf16.mxu0 %v2656_v0  ;;  %v2501_v58 = vld [vmem:[%s3520_s0 + $0xcc] ss:$16 sps:$4 sm:$0xff]   ;;  %v2503_v59 = vld [vmem:[%s3520_s0 + $0xc0] ss:$16 sps:$4 sm:$0xff]   ;;  %v2504_v60 = vld [vmem:[%s3520_s0 + $0xc8] ss:$16 sps:$4 sm:$0xff]  }
  0x15   :  { %v2505_v61 = vld [vmem:[%s3520_s0 + $0xe4] ss:$16 sps:$4 sm:$0xff]   ;;  %v2507_v62 = vld [vmem:[%s3520_s0 + $0xec] ss:$16 sps:$4 sm:$0xff]   ;;  %v2509_v63 = vld [vmem:[%s3520_s0 + $0xe0] ss:$16 sps:$4 sm:$0xff]  }
  0x16   :  { %1057 = vmatpush1.bf16.msra.mxu1 %v2441_v11  ;;  %v2511_v1 = vld [vmem:[%s3520_s0 + $0x104] ss:$16 sps:$4 sm:$0xff]   ;;  %v2513_v2 = vld [vmem:[%s3520_s0 + $0x10c] ss:$16 sps:$4 sm:$0xff]   ;;  %v2515_v3 = vld [vmem:[%s3520_s0 + $0x100] ss:$16 sps:$4 sm:$0xff]  }
  0x17   :  { %1346 = vmatpush1.bf16.msra.mxu0 %v2442_v12  ;;  %1058 = vmatprep.subr.bf16.mxu1 %v2656_v0  ;;  %v2516_v4 = vld [vmem:[%s3520_s0 + $0x108] ss:$16 sps:$4 sm:$0xff]   ;;  %v2517_v5 = vld [vmem:[%s3520_s0 + $0x124] ss:$16 sps:$4 sm:$0xff]   ;;  %v2519_v6 = vld [vmem:[%s3520_s0 + $0x12c] ss:$16 sps:$4 sm:$0xff]  }
  0x18   :  { %1347 = vmatprep.subr.bf16.mxu0 %v2656_v0  ;;  %v2521_v7 = vld [vmem:[%s3520_s0 + $0x120] ss:$16 sps:$4 sm:$0xff]   ;;  %v2522_v8 = vld [vmem:[%s3520_s0 + $0x128] ss:$16 sps:$4 sm:$0xff]   ;;  %v2523_v9 = vld [vmem:[%s3520_s0 + $0x144] ss:$16 sps:$4 sm:$0xff]  }
  0x19   :  { %v2525_v10 = vld [vmem:[%s3520_s0 + $0x14c] ss:$16 sps:$4 sm:$0xff]   ;;  %v2527_v11 = vld [vmem:[%s3520_s0 + $0x140] ss:$16 sps:$4 sm:$0xff]   ;;  %v2528_v12 = vld [vmem:[%s3520_s0 + $0x148] ss:$16 sps:$4 sm:$0xff]  }
  0x1a   :  { %1059 = vmatpush1.bf16.msra.mxu1 %v2443_v13  ;;  %v2529_v13 = vld [vmem:[%s3520_s0 + $0x164] ss:$16 sps:$4 sm:$0xff]   ;;  %v2539_v19 = vld [vmem:[%s3520_s0 + $0x180] ss:$16 sps:$4 sm:$0xff]  }
  0x1b   :  { %1348 = vmatpush1.bf16.msra.mxu0 %v2444_v14  ;;  %1060 = vmatprep.subr.bf16.mxu1 %v2656_v0  ;;  %v2531_v14 = vld [vmem:[%s3520_s0 + $0x16c] ss:$16 sps:$4 sm:$0xff]   ;;  %v2541_v21 = vld [vmem:[%s3520_s0 + $0x1a4] ss:$16 sps:$4 sm:$0xff]  }
  0x1c   :  { %1349 = vmatprep.subr.bf16.mxu0 %v2656_v0 }
  0x1e   :  { %1061 = vmatpush1.bf16.msra.mxu1 %v2445_v15  ;;  %v2533_v15 = vld [vmem:[%s3520_s0 + $0x160] ss:$16 sps:$4 sm:$0xff]  }
  0x1f   :  { %1350 = vmatpush1.bf16.msra.mxu0 %v2446_v16  ;;  %1062 = vmatprep.subr.bf16.mxu1 %v2656_v0  ;;  %v2534_v16 = vld [vmem:[%s3520_s0 + $0x168] ss:$16 sps:$4 sm:$0xff]  }
  0x20   :  { %1351 = vmatprep.subr.bf16.mxu0 %v2656_v0 }
  0x22   :  { %1063 = vmatpush1.bf16.msra.mxu1 %v2447_v17  ;;  %v2535_v17 = vld [vmem:[%s3520_s0 + $0x184] ss:$16 sps:$4 sm:$0xff]  }
  0x23   :  { %1352 = vmatpush1.bf16.msra.mxu0 %v2448_v18  ;;  %1064 = vmatprep.subr.bf16.mxu1 %v2656_v0  ;;  %v2537_v18 = vld [vmem:[%s3520_s0 + $0x18c] ss:$16 sps:$4 sm:$0xff]  }
  0x24   :  { %1353 = vmatprep.subr.bf16.mxu0 %v2656_v0 }
  0x26   :  { %1065 = vmatpush1.bf16.msra.mxu1 %v2449_v20  ;;  %v2540_v20 = vld [vmem:[%s3520_s0 + $0x188] ss:$16 sps:$4 sm:$0xff]  }
  0x27   :  { %1354 = vmatpush1.bf16.msra.mxu0 %v2450_v22  ;;  %1066 = vmatprep.subr.bf16.mxu1 %v2656_v0  ;;  %v2543_v22 = vld [vmem:[%s3520_s0 + $0x1ac] ss:$16 sps:$4 sm:$0xff]  }
  0x28   :  { %1355 = vmatprep.subr.bf16.mxu0 %v2656_v0 }
  0x2a   :  { %1067 = vmatpush1.bf16.msra.mxu1 %v2451_v23  ;;  %v2545_v23 = vld [vmem:[%s3520_s0 + $0x1a0] ss:$16 sps:$4 sm:$0xff]  }
  0x2b   :  { %1356 = vmatpush1.bf16.msra.mxu0 %v2452_v24  ;;  %1068 = vmatprep.subr.bf16.mxu1 %v2656_v0  ;;  %v2546_v24 = vld [vmem:[%s3520_s0 + $0x1a8] ss:$16 sps:$4 sm:$0xff]  }
  0x2c   :  { %1357 = vmatprep.subr.bf16.mxu0 %v2656_v0 }
  0x2e   :  { %1069 = vmatpush1.bf16.msra.mxu1 %v2453_v25  ;;  %v2547_v25 = vld [vmem:[%s3520_s0 + $0x1c4] ss:$16 sps:$4 sm:$0xff]  }
  0x2f   :  { %1358 = vmatpush1.bf16.msra.mxu0 %v2454_v26  ;;  %1070 = vmatprep.subr.bf16.mxu1 %v2656_v0  ;;  %v2549_v26 = vld [vmem:[%s3520_s0 + $0x1cc] ss:$16 sps:$4 sm:$0xff]  }
  0x30   :  { %1359 = vmatprep.subr.bf16.mxu0 %v2656_v0 }
  0x32   :  { %1071 = vmatpush1.bf16.msra.mxu1 %v2455_v27  ;;  %v2551_v27 = vld [vmem:[%s3520_s0 + $0x1c0] ss:$16 sps:$4 sm:$0xff]  }
  0x33   :  { %1360 = vmatpush1.bf16.msra.mxu0 %v2456_v28  ;;  %1072 = vmatprep.subr.bf16.mxu1 %v2656_v0  ;;  %v2552_v28 = vld [vmem:[%s3520_s0 + $0x1c8] ss:$16 sps:$4 sm:$0xff]  }
  0x34   :  { %1361 = vmatprep.subr.bf16.mxu0 %v2656_v0 }
  0x36   :  { %1073 = vmatpush1.bf16.msra.mxu1 %v2457_v29  ;;  %v2553_v29 = vld [vmem:[%s3520_s0 + $0x1e4] ss:$16 sps:$4 sm:$0xff]  }
  0x37   :  { %1362 = vmatpush1.bf16.msra.mxu0 %v2458_v30  ;;  %1074 = vmatprep.subr.bf16.mxu1 %v2656_v0  ;;  %v2555_v30 = vld [vmem:[%s3520_s0 + $0x1ec] ss:$16 sps:$4 sm:$0xff]  }
  0x38   :  { %1363 = vmatprep.subr.bf16.mxu0 %v2656_v0 }
  0x3a   :  { %1075 = vmatpush1.bf16.msra.mxu1 %v2459_v31  ;;  %v2557_v31 = vld [vmem:[%s3520_s0 + $0x1e0] ss:$16 sps:$4 sm:$0xff]  }
  0x3b   :  { %1364 = vmatpush1.bf16.msra.mxu0 %v2460_v32  ;;  %1076 = vmatprep.subr.bf16.mxu1 %v2656_v0  ;;  %v2558_v32 = vld [vmem:[%s3520_s0 + $0x1e8] ss:$16 sps:$4 sm:$0xff]  }
  0x3c   :  { %1365 = vmatprep.subr.bf16.mxu0 %v2656_v0  ;;  %v2510_v0 = vld [vmem:[%s3520_s0 + $0xe8] ss:$16 sps:$4 sm:$0xff]  }
  0x3e   :  { %1077 = vmatpush1.bf16.msra.mxu1 %v2461_v33  ;;  %v2559_v33 = vld [vmem:[%s3520_s0 + $0x204] ss:$16 sps:$4 sm:$0xff]  }
  0x3f   :  { %1366 = vmatpush1.bf16.msra.mxu0 %v2462_v34  ;;  %v2561_v34 = vld [vmem:[%s3520_s0 + $0x20c] ss:$16 sps:$4 sm:$0xff]  }
  0x41   :  { %1079 = vmatmul.mubr.bf16.vlgmr.msra.gmra.mrb[0].mxu1 %v2463_v35  ;;  %v2563_v35 = vld [vmem:[%s3520_s0 + $0x200] ss:$16 sps:$4 sm:$0xff]  }
  0x42   :  { %1368 = vmatmul.mubr.bf16.vlgmr.msra.gmra.mrb[0].mxu0 %v2466_v36  ;;  %1086 = vmatprep.mubr.bf16.mxu1 %v2469_v37  ;;  %v2564_v36 = vld [vmem:[%s3520_s0 + $0x208] ss:$16 sps:$4 sm:$0xff]   ;;  %v2565_v37 = vld [vmem:[%s3520_s0 + $0x224] ss:$16 sps:$4 sm:$0xff]  }
  0x43   :  { %1375 = vmatprep.mubr.bf16.mxu0 %v2471_v38  ;;  %v2567_v38 = vld [vmem:[%s3520_s0 + $0x22c] ss:$16 sps:$4 sm:$0xff]  }
  0x49   :  { %1087 = vmatmul.mubr.bf16.gmra.mrb[4].mxu1 %v2473_v39  ;;  %v2569_v39 = vld [vmem:[%s3520_s0 + $0x220] ss:$16 sps:$4 sm:$0xff]  }
  0x4a   :  { %1376 = vmatmul.mubr.bf16.gmra.mrb[4].mxu0 %v2474_v40  ;;  %1094 = vmatprep.mubr.bf16.mxu1 %v2475_v41  ;;  %v2570_v40 = vld [vmem:[%s3520_s0 + $0x228] ss:$16 sps:$4 sm:$0xff]   ;;  %v2571_v41 = vld [vmem:[%s3520_s0 + $0x244] ss:$16 sps:$4 sm:$0xff]  }
  0x4b   :  { %1383 = vmatprep.mubr.bf16.mxu0 %v2477_v42  ;;  %v2573_v42 = vld [vmem:[%s3520_s0 + $0x24c] ss:$16 sps:$4 sm:$0xff]  }
  0x51   :  { %1095 = vmatmul.mubr.bf16.gmra.mrb[8].mxu1 %v2479_v43  ;;  %v2575_v43 = vld [vmem:[%s3520_s0 + $0x240] ss:$16 sps:$4 sm:$0xff]  }
  0x52   :  { %1384 = vmatmul.mubr.bf16.gmra.mrb[8].mxu0 %v2480_v44  ;;  %1102 = vmatprep.mubr.bf16.mxu1 %v2481_v45  ;;  %v2576_v44 = vld [vmem:[%s3520_s0 + $0x248] ss:$16 sps:$4 sm:$0xff]   ;;  %v2577_v45 = vld [vmem:[%s3520_s0 + $0x264] ss:$16 sps:$4 sm:$0xff]  }
  0x53   :  { %1391 = vmatprep.mubr.bf16.mxu0 %v2483_v46  ;;  %v2579_v46 = vld [vmem:[%s3520_s0 + $0x26c] ss:$16 sps:$4 sm:$0xff]  }
  0x59   :  { %1103 = vmatmul.mubr.bf16.gmra.mrb[12].mxu1 %v2485_v47  ;;  %v2581_v47 = vld [vmem:[%s3520_s0 + $0x260] ss:$16 sps:$4 sm:$0xff]  }
  0x5a   :  { %1392 = vmatmul.mubr.bf16.gmra.mrb[12].mxu0 %v2486_v48  ;;  %1110 = vmatprep.mubr.bf16.mxu1 %v2487_v49  ;;  %v2582_v48 = vld [vmem:[%s3520_s0 + $0x268] ss:$16 sps:$4 sm:$0xff]   ;;  %v2583_v49 = vld [vmem:[%s3520_s0 + $0x284] ss:$16 sps:$4 sm:$0xff]  }
  0x5b   :  { %1399 = vmatprep.mubr.bf16.mxu0 %v2489_v50  ;;  %v2585_v50 = vld [vmem:[%s3520_s0 + $0x28c] ss:$16 sps:$4 sm:$0xff]  }
  0x61   :  { %1111 = vmatmul.mubr.bf16.gmra.mrb[16].mxu1 %v2491_v51  ;;  %v2587_v51 = vld [vmem:[%s3520_s0 + $0x280] ss:$16 sps:$4 sm:$0xff]  }
  0x62   :  { %1400 = vmatmul.mubr.bf16.gmra.mrb[16].mxu0 %v2492_v52  ;;  %1118 = vmatprep.mubr.bf16.mxu1 %v2493_v53  ;;  %v2588_v52 = vld [vmem:[%s3520_s0 + $0x288] ss:$16 sps:$4 sm:$0xff]   ;;  %v2589_v53 = vld [vmem:[%s3520_s0 + $0x2a4] ss:$16 sps:$4 sm:$0xff]  }
  0x63   :  { %1407 = vmatprep.mubr.bf16.mxu0 %v2495_v54  ;;  %v2591_v54 = vld [vmem:[%s3520_s0 + $0x2ac] ss:$16 sps:$4 sm:$0xff]  }
  0x69   :  { %1119 = vmatmul.mubr.bf16.gmra.mrb[20].mxu1 %v2497_v55  ;;  %v2593_v55 = vld [vmem:[%s3520_s0 + $0x2a0] ss:$16 sps:$4 sm:$0xff]  }
  0x6a   :  { %1408 = vmatmul.mubr.bf16.gmra.mrb[20].mxu0 %v2498_v56  ;;  %1126 = vmatprep.mubr.bf16.mxu1 %v2499_v57  ;;  %v2594_v56 = vld [vmem:[%s3520_s0 + $0x2a8] ss:$16 sps:$4 sm:$0xff]   ;;  %v2595_v57 = vld [vmem:[%s3520_s0 + $0x2c4] ss:$16 sps:$4 sm:$0xff]  }
  0x6b   :  { %1415 = vmatprep.mubr.bf16.mxu0 %v2501_v58  ;;  %v2597_v58 = vld [vmem:[%s3520_s0 + $0x2cc] ss:$16 sps:$4 sm:$0xff]  }
  0x71   :  { %1127 = vmatmul.mubr.bf16.gmra.mrb[24].mxu1 %v2503_v59  ;;  %v2599_v59 = vld [vmem:[%s3520_s0 + $0x2c0] ss:$16 sps:$4 sm:$0xff]  }
  0x72   :  { %1416 = vmatmul.mubr.bf16.gmra.mrb[24].mxu0 %v2504_v60  ;;  %1134 = vmatprep.mubr.bf16.mxu1 %v2505_v61  ;;  %v2600_v60 = vld [vmem:[%s3520_s0 + $0x2c8] ss:$16 sps:$4 sm:$0xff]   ;;  %v2601_v61 = vld [vmem:[%s3520_s0 + $0x2e4] ss:$16 sps:$4 sm:$0xff]  }
  0x73   :  { %1423 = vmatprep.mubr.bf16.mxu0 %v2507_v62  ;;  %v2603_v62 = vld [vmem:[%s3520_s0 + $0x2ec] ss:$16 sps:$4 sm:$0xff]  }
  0x79   :  { %1135 = vmatmul.mubr.bf16.gmra.mrb[28].mxu1 %v2509_v63  ;;  %v2605_v63 = vld [vmem:[%s3520_s0 + $0x2e0] ss:$16 sps:$4 sm:$0xff]  }
  0x7a   :  { %1424 = vmatmul.mubr.bf16.gmra.mrb[28].mxu0 %v2510_v0  ;;  %1142 = vmatprep.mubr.bf16.mxu1 %v2511_v1  ;;  %v2606_v0 = vld [vmem:[%s3520_s0 + $0x2e8] ss:$16 sps:$4 sm:$0xff]   ;;  %v2607_v1 = vld [vmem:[%s3520_s0 + $0x304] ss:$16 sps:$4 sm:$0xff]  }
  0x7b   :  { %1431 = vmatprep.mubr.bf16.mxu0 %v2513_v2  ;;  %v2609_v2 = vld [vmem:[%s3520_s0 + $0x30c] ss:$16 sps:$4 sm:$0xff]  }
  0x81   :  { %1143 = vmatmul.mubr.bf16.gmra.mrb[32].mxu1 %v2515_v3  ;;  %v2611_v3 = vld [vmem:[%s3520_s0 + $0x300] ss:$16 sps:$4 sm:$0xff]  }
  0x82   :  { %1432 = vmatmul.mubr.bf16.gmra.mrb[32].mxu0 %v2516_v4  ;;  %1150 = vmatprep.mubr.bf16.mxu1 %v2517_v5  ;;  %v2612_v4 = vld [vmem:[%s3520_s0 + $0x308] ss:$16 sps:$4 sm:$0xff]   ;;  %v2613_v5 = vld [vmem:[%s3520_s0 + $0x324] ss:$16 sps:$4 sm:$0xff]  }
  0x83   :  { %1439 = vmatprep.mubr.bf16.mxu0 %v2519_v6  ;;  %v2615_v6 = vld [vmem:[%s3520_s0 + $0x32c] ss:$16 sps:$4 sm:$0xff]  }
  0x89   :  { %1151 = vmatmul.mubr.bf16.gmra.mrb[36].mxu1 %v2521_v7  ;;  %v2617_v7 = vld [vmem:[%s3520_s0 + $0x320] ss:$16 sps:$4 sm:$0xff]  }
  0x8a   :  { %1440 = vmatmul.mubr.bf16.gmra.mrb[36].mxu0 %v2522_v8  ;;  %1158 = vmatprep.mubr.bf16.mxu1 %v2523_v9  ;;  %v2618_v8 = vld [vmem:[%s3520_s0 + $0x328] ss:$16 sps:$4 sm:$0xff]   ;;  %v2619_v9 = vld [vmem:[%s3520_s0 + $0x344] ss:$16 sps:$4 sm:$0xff]  }
  0x8b   :  { %1447 = vmatprep.mubr.bf16.mxu0 %v2525_v10  ;;  %v2621_v10 = vld [vmem:[%s3520_s0 + $0x34c] ss:$16 sps:$4 sm:$0xff]  }
  0x91   :  { %1159 = vmatmul.mubr.bf16.gmra.mrb[40].mxu1 %v2527_v11  ;;  %v2623_v11 = vld [vmem:[%s3520_s0 + $0x340] ss:$16 sps:$4 sm:$0xff]  }
  0x92   :  { %1448 = vmatmul.mubr.bf16.gmra.mrb[40].mxu0 %v2528_v12  ;;  %1166 = vmatprep.mubr.bf16.mxu1 %v2529_v13  ;;  %v2624_v12 = vld [vmem:[%s3520_s0 + $0x348] ss:$16 sps:$4 sm:$0xff]   ;;  %v2625_v13 = vld [vmem:[%s3520_s0 + $0x364] ss:$16 sps:$4 sm:$0xff]  }
  0x93   :  { %1455 = vmatprep.mubr.bf16.mxu0 %v2531_v14  ;;  %v2627_v14 = vld [vmem:[%s3520_s0 + $0x36c] ss:$16 sps:$4 sm:$0xff]  }
  0x99   :  { %1167 = vmatmul.mubr.bf16.gmra.mrb[44].mxu1 %v2533_v15  ;;  %v3138_v15 = vld [vmem:[%s3521_s2] ss:$0 sm:$0xff] }
  0x9a   :  { %1456 = vmatmul.mubr.bf16.gmra.mrb[44].mxu0 %v2534_v16  ;;  %1174 = vmatprep.mubr.bf16.mxu1 %v2535_v17 }
  0x9b   :  { %1463 = vmatprep.mubr.bf16.mxu0 %v2537_v18 }
  0xa1   :  { %1175 = vmatmul.mubr.bf16.gmra.mrb[48].mxu1 %v2539_v19 }
  0xa2   :  { %1464 = vmatmul.mubr.bf16.gmra.mrb[48].mxu0 %v2540_v20  ;;  %1182 = vmatprep.mubr.bf16.mxu1 %v2541_v21  ;;  %v2629_v20 = vld [vmem:[%s3520_s0 + $0x360] ss:$16 sps:$4 sm:$0xff]  }
  0xa3   :  { %1471 = vmatprep.mubr.bf16.mxu0 %v2543_v22 }
  0xa9   :  { %1183 = vmatmul.mubr.bf16.gmra.mrb[52].mxu1 %v2545_v23  ;;  %v2630_v23 = vld [vmem:[%s3520_s0 + $0x368] ss:$16 sps:$4 sm:$0xff]  }
  0xaa   :  { %1472 = vmatmul.mubr.bf16.gmra.mrb[52].mxu0 %v2546_v24  ;;  %1190 = vmatprep.mubr.bf16.mxu1 %v2547_v25  ;;  %v2631_v24 = vld [vmem:[%s3520_s0 + $0x384] ss:$16 sps:$4 sm:$0xff]  }
  0xab   :  { %1479 = vmatprep.mubr.bf16.mxu0 %v2549_v26 }
  0xb1   :  { %1191 = vmatmul.mubr.bf16.gmra.mrb[56].mxu1 %v2551_v27 }
  0xb2   :  { %1480 = vmatmul.mubr.bf16.gmra.mrb[56].mxu0 %v2552_v28  ;;  %1198 = vmatprep.mubr.bf16.mxu1 %v2553_v29  ;;  %v2633_v29 = vld [vmem:[%s3520_s0 + $0x38c] ss:$16 sps:$4 sm:$0xff]  }
  0xb3   :  { %1487 = vmatprep.mubr.bf16.mxu0 %v2555_v30 }
  0xb9   :  { %1199 = vmatmul.mubr.bf16.gmra.mrb[60].mxu1 %v2557_v31 }
  0xba   :  { %1488 = vmatmul.mubr.bf16.gmra.mrb[60].mxu0 %v2558_v32  ;;  %1206 = vmatprep.mubr.bf16.mxu1 %v2559_v33 }
  0xbb   :  { %1495 = vmatprep.mubr.bf16.mxu0 %v2561_v34 }
  0xc1   :  { %1207 = vmatmul.mubr.bf16.gmra.mrb[64].mxu1 %v2563_v35 }
  0xc2   :  { %1496 = vmatmul.mubr.bf16.gmra.mrb[64].mxu0 %v2564_v36  ;;  %1214 = vmatprep.mubr.bf16.mxu1 %v2565_v37 }
  0xc3   :  { %1503 = vmatprep.mubr.bf16.mxu0 %v2567_v38 }
  0xc9   :  { %1215 = vmatmul.mubr.bf16.gmra.mrb[68].mxu1 %v2569_v39 }
  0xca   :  { %1504 = vmatmul.mubr.bf16.gmra.mrb[68].mxu0 %v2570_v40  ;;  %1222 = vmatprep.mubr.bf16.mxu1 %v2571_v41  ;;  %v2635_v40 = vld [vmem:[%s3520_s0 + $0x380] ss:$16 sps:$4 sm:$0xff]  }
  0xcb   :  { %1511 = vmatprep.mubr.bf16.mxu0 %v2573_v42 }
  0xd1   :  { %1223 = vmatmul.mubr.bf16.gmra.mrb[72].mxu1 %v2575_v43  ;;  %v2636_v43 = vld [vmem:[%s3520_s0 + $0x388] ss:$16 sps:$4 sm:$0xff]  }
  0xd2   :  { %1512 = vmatmul.mubr.bf16.gmra.mrb[72].mxu0 %v2576_v44  ;;  %1230 = vmatprep.mubr.bf16.mxu1 %v2577_v45  ;;  %v2637_v44 = vld [vmem:[%s3520_s0 + $0x3a4] ss:$16 sps:$4 sm:$0xff]  }
  0xd3   :  { %1519 = vmatprep.mubr.bf16.mxu0 %v2579_v46 }
  0xd9   :  { %1231 = vmatmul.mubr.bf16.gmra.mrb[76].mxu1 %v2581_v47 }
  0xda   :  { %1520 = vmatmul.mubr.bf16.gmra.mrb[76].mxu0 %v2582_v48  ;;  %1238 = vmatprep.mubr.bf16.mxu1 %v2583_v49  ;;  %v2639_v49 = vld [vmem:[%s3520_s0 + $0x3ac] ss:$16 sps:$4 sm:$0xff]  }
  0xdb   :  { %1527 = vmatprep.mubr.bf16.mxu0 %v2585_v50 }
  0xe1   :  { %1239 = vmatmul.mubr.bf16.gmra.mrb[80].mxu1 %v2587_v51 }
  0xe2   :  { %1528 = vmatmul.mubr.bf16.gmra.mrb[80].mxu0 %v2588_v52  ;;  %1246 = vmatprep.mubr.bf16.mxu1 %v2589_v53 }
  0xe3   :  { %1535 = vmatprep.mubr.bf16.mxu0 %v2591_v54 }
  0xe9   :  { %1247 = vmatmul.mubr.bf16.gmra.mrb[84].mxu1 %v2593_v55 }
  0xea   :  { %1536 = vmatmul.mubr.bf16.gmra.mrb[84].mxu0 %v2594_v56  ;;  %1254 = vmatprep.mubr.bf16.mxu1 %v2595_v57 }
  0xeb   :  { %1543 = vmatprep.mubr.bf16.mxu0 %v2597_v58 }
  0xf1   :  { %1255 = vmatmul.mubr.bf16.gmra.mrb[88].mxu1 %v2599_v59 }
  0xf2   :  { %1544 = vmatmul.mubr.bf16.gmra.mrb[88].mxu0 %v2600_v60  ;;  %1262 = vmatprep.mubr.bf16.mxu1 %v2601_v61  ;;  %v2641_v60 = vld [vmem:[%s3520_s0 + $0x3a0] ss:$16 sps:$4 sm:$0xff]  }
  0xf3   :  { %1551 = vmatprep.mubr.bf16.mxu0 %v2603_v62 }
  0xf9   :  { %1263 = vmatmul.mubr.bf16.gmra.mrb[92].mxu1 %v2605_v63  ;;  %v2642_v63 = vld [vmem:[%s3520_s0 + $0x3a8] ss:$16 sps:$4 sm:$0xff]  }
  0xfa   :  { %1552 = vmatmul.mubr.bf16.gmra.mrb[92].mxu0 %v2606_v0  ;;  %1270 = vmatprep.mubr.bf16.mxu1 %v2607_v1  ;;  %v2643_v0 = vld [vmem:[%s3520_s0 + $0x3c4] ss:$16 sps:$4 sm:$0xff]  }
  0xfb   :  { %1559 = vmatprep.mubr.bf16.mxu0 %v2609_v2 }
 0x101   :  { %1271 = vmatmul.mubr.bf16.gmra.mrb[96].mxu1 %v2611_v3 }
 0x102   :  { %1560 = vmatmul.mubr.bf16.gmra.mrb[96].mxu0 %v2612_v4  ;;  %1278 = vmatprep.mubr.bf16.mxu1 %v2613_v5  ;;  %v2645_v5 = vld [vmem:[%s3520_s0 + $0x3cc] ss:$16 sps:$4 sm:$0xff]  }
 0x103   :  { %1567 = vmatprep.mubr.bf16.mxu0 %v2615_v6 }
 0x109   :  { %1279 = vmatmul.mubr.bf16.gmra.mrb[100].mxu1 %v2617_v7 }
 0x10a   :  { %1568 = vmatmul.mubr.bf16.gmra.mrb[100].mxu0 %v2618_v8  ;;  %1286 = vmatprep.mubr.bf16.mxu1 %v2619_v9 }
 0x10b   :  { %1575 = vmatprep.mubr.bf16.mxu0 %v2621_v10 }
 0x111   :  { %1287 = vmatmul.mubr.bf16.gmra.mrb[104].mxu1 %v2623_v11 }
 0x112   :  { %1576 = vmatmul.mubr.bf16.gmra.mrb[104].mxu0 %v2624_v12  ;;  %1294 = vmatprep.mubr.bf16.mxu1 %v2625_v13 }
 0x113   :  { %1583 = vmatprep.mubr.bf16.mxu0 %v2627_v14 }
 0x114   :  { %v1080_v16 = vpop.f32.mrb[0].mxu1 }
 0x115   :  { %v1081_v17 = vadd.f32 %v3138_v15, %v1080_v16  ;;  %v1369_v18 = vpop.f32.mrb[0].mxu0  ;;  %v1082_v19 = vpop.f32.mrb[1].mxu1 }
 0x116   :  { %v1371_v21 = vpop.f32.mrb[1].mxu0  ;;  %v1083_v22 = vpop.f32.mrb[2].mxu1 }
 0x117   :  { %v1370_v25 = vadd.f32 %v1369_v18, %v1081_v17  ;;  %v1084_v26 = vadd.f32 %v3138_v15, %v1083_v22  ;;  %v1372_v27 = vpop.f32.mrb[2].mxu0  ;;  %v1085_v28 = vpop.f32.mrb[3].mxu1  ;;  %v2647_v17 = vld [vmem:[%s3520_s0 + $0x3c0] ss:$16 sps:$4 sm:$0xff]   ;;  %v2649_v21 = vld [vmem:[%s3520_s0 + $0x3e4] ss:$16 sps:$4 sm:$0xff]  }
 0x118   :  { %v1374_v30 = vpop.f32.mrb[3].mxu0 }
 0x119   :  { %v1624_v31 = vmax.f32 %v1370_v25, 0.0  ;;  %v1373_v32 = vadd.f32 %v1372_v27, %v1084_v26  ;;  %1295 = vmatmul.mubr.bf16.gmra.mrb[108].mxu1 %v2629_v20  ;;  %v2648_v20 = vld [vmem:[%s3520_s0 + $0x3c8] ss:$16 sps:$4 sm:$0xff]   ;;  %v2651_v26 = vld [vmem:[%s3520_s0 + $0x3ec] ss:$16 sps:$4 sm:$0xff]  }
 0x11a   :  { %1584 = vmatmul.mubr.bf16.gmra.mrb[108].mxu0 %v2630_v23  ;;  %1302 = vmatprep.mubr.bf16.mxu1 %v2631_v24 }
 0x11b   :  { %v2238_v33 = vpack.c.bf16 %v1624_v31, %v1624_v31  ;;  %v1625_v34 = vmax.f32 %v1373_v32, 0.0  ;;  %1591 = vmatprep.mubr.bf16.mxu0 %v2633_v29 }
 0x11c   :  { %v1088_v35 = vpop.f32.mrb[4].mxu1 }
 0x11d   :  { %1945 = vst.msk [vmem:[%s3522_s3] sm:$0xf] %vm1944_vm0, %v2238_v33  ;;  %v2239_v36 = vpack.c.bf16 %v1625_v34, %v1625_v34  ;;  %v1089_v37 = vadd.f32 %v3138_v15, %v1088_v35  ;;  %v1377_v38 = vpop.f32.mrb[4].mxu0  ;;  %v1090_v39 = vpop.f32.mrb[5].mxu1 }
 0x11e   :  { %v1379_v41 = vpop.f32.mrb[5].mxu0  ;;  %v1091_v42 = vpop.f32.mrb[6].mxu1 }
 0x11f   :  { %1946 = vst.msk [vmem:[%s3522_s3 + $0x4] sm:$0xf] %vm1944_vm0, %v2239_v36  ;;  %v1378_v45 = vadd.f32 %v1377_v38, %v1089_v37  ;;  %v1092_v46 = vadd.f32 %v3138_v15, %v1091_v42  ;;  %v1380_v47 = vpop.f32.mrb[6].mxu0  ;;  %v1093_v48 = vpop.f32.mrb[7].mxu1  ;;  %v2653_v37 = vld [vmem:[%s3520_s0 + $0x3e0] ss:$16 sps:$4 sm:$0xff]  }
 0x120   :  { %v1382_v50 = vpop.f32.mrb[7].mxu0 }
 0x121   :  { %v1626_v51 = vmax.f32 %v1378_v45, 0.0  ;;  %v1381_v52 = vadd.f32 %v1380_v47, %v1092_v46  ;;  %1303 = vmatmul.mubr.bf16.gmra.mrb[112].mxu1 %v2635_v40  ;;  %v2654_v40 = vld [vmem:[%s3520_s0 + $0x3e8] ss:$16 sps:$4 sm:$0xff]  }
 0x122   :  { %1592 = vmatmul.mubr.bf16.gmra.mrb[112].mxu0 %v2636_v43  ;;  %1310 = vmatprep.mubr.bf16.mxu1 %v2637_v44 }
 0x123   :  { %v2240_v53 = vpack.c.bf16 %v1626_v51, %v1626_v51  ;;  %v1627_v54 = vmax.f32 %v1381_v52, 0.0  ;;  %1599 = vmatprep.mubr.bf16.mxu0 %v2639_v49 }
 0x124   :  { %v1096_v55 = vpop.f32.mrb[8].mxu1 }
 0x125   :  { %1947 = vst.msk [vmem:[%s3522_s3 + $0x8] sm:$0xf] %vm1944_vm0, %v2240_v53  ;;  %v2241_v56 = vpack.c.bf16 %v1627_v54, %v1627_v54  ;;  %v1097_v57 = vadd.f32 %v3138_v15, %v1096_v55  ;;  %v1385_v58 = vpop.f32.mrb[8].mxu0  ;;  %v1098_v59 = vpop.f32.mrb[9].mxu1 }
 0x126   :  { %v1387_v61 = vpop.f32.mrb[9].mxu0  ;;  %v1099_v62 = vpop.f32.mrb[10].mxu1 }
 0x127   :  { %1948 = vst.msk [vmem:[%s3522_s3 + $0xc] sm:$0xf] %vm1944_vm0, %v2241_v56  ;;  %v1386_v1 = vadd.f32 %v1385_v58, %v1097_v57  ;;  %v1100_v2 = vadd.f32 %v3138_v15, %v1099_v62  ;;  %v1388_v3 = vpop.f32.mrb[10].mxu0  ;;  %v1101_v4 = vpop.f32.mrb[11].mxu1 }
 0x128   :  { %v1390_v6 = vpop.f32.mrb[11].mxu0 }
 0x129   :  { %v1628_v7 = vmax.f32 %v1386_v1, 0.0  ;;  %v1389_v8 = vadd.f32 %v1388_v3, %v1100_v2  ;;  %1311 = vmatmul.mubr.bf16.gmra.mrb[116].mxu1 %v2641_v60 }
 0x12a   :  { %1600 = vmatmul.mubr.bf16.gmra.mrb[116].mxu0 %v2642_v63  ;;  %1318 = vmatprep.mubr.bf16.mxu1 %v2643_v0 }
 0x12b   :  { %v2242_v9 = vpack.c.bf16 %v1628_v7, %v1628_v7  ;;  %v1629_v10 = vmax.f32 %v1389_v8, 0.0  ;;  %1607 = vmatprep.mubr.bf16.mxu0 %v2645_v5 }
 0x12c   :  { %v1104_v11 = vpop.f32.mrb[12].mxu1 }
 0x12d   :  { %1949 = vst.msk [vmem:[%s3522_s3 + $0x10] sm:$0xf] %vm1944_vm0, %v2242_v9  ;;  %v2243_v12 = vpack.c.bf16 %v1629_v10, %v1629_v10  ;;  %v1105_v13 = vadd.f32 %v3138_v15, %v1104_v11  ;;  %v1393_v14 = vpop.f32.mrb[12].mxu0  ;;  %v1106_v16 = vpop.f32.mrb[13].mxu1 }
 0x12e   :  { %v1395_v18 = vpop.f32.mrb[13].mxu0  ;;  %v1107_v19 = vpop.f32.mrb[14].mxu1 }
 0x12f   :  { %1950 = vst.msk [vmem:[%s3522_s3 + $0x14] sm:$0xf] %vm1944_vm0, %v2243_v12  ;;  %v1394_v22 = vadd.f32 %v1393_v14, %v1105_v13  ;;  %v1108_v23 = vadd.f32 %v3138_v15, %v1107_v19  ;;  %v1396_v24 = vpop.f32.mrb[14].mxu0  ;;  %v1109_v25 = vpop.f32.mrb[15].mxu1 }
 0x130   :  { %v1398_v27 = vpop.f32.mrb[15].mxu0 }
 0x131   :  { %v1630_v28 = vmax.f32 %v1394_v22, 0.0  ;;  %v1397_v29 = vadd.f32 %v1396_v24, %v1108_v23  ;;  %1319 = vmatmul.mubr.bf16.gmra.mrb[120].mxu1 %v2647_v17 }
 0x132   :  { %1608 = vmatmul.mubr.bf16.gmra.mrb[120].mxu0 %v2648_v20  ;;  %1326 = vmatprep.mubr.bf16.mxu1 %v2649_v21 }
 0x133   :  { %v2244_v30 = vpack.c.bf16 %v1630_v28, %v1630_v28  ;;  %v1631_v31 = vmax.f32 %v1397_v29, 0.0  ;;  %1615 = vmatprep.mubr.bf16.mxu0 %v2651_v26 }
 0x134   :  { %v1112_v32 = vpop.f32.mrb[16].mxu1 }
 0x135   :  { %1951 = vst.msk [vmem:[%s3522_s3 + $0x18] sm:$0xf] %vm1944_vm0, %v2244_v30  ;;  %v2245_v33 = vpack.c.bf16 %v1631_v31, %v1631_v31  ;;  %v1113_v34 = vadd.f32 %v3138_v15, %v1112_v32  ;;  %v1401_v35 = vpop.f32.mrb[16].mxu0  ;;  %v1114_v36 = vpop.f32.mrb[17].mxu1 }
 0x136   :  { %v1403_v38 = vpop.f32.mrb[17].mxu0  ;;  %v1115_v39 = vpop.f32.mrb[18].mxu1 }
 0x137   :  { %1952 = vst.msk [vmem:[%s3522_s3 + $0x1c] sm:$0xf] %vm1944_vm0, %v2245_v33  ;;  %v1402_v41 = vadd.f32 %v1401_v35, %v1113_v34  ;;  %v1116_v42 = vadd.f32 %v3138_v15, %v1115_v39  ;;  %v1404_v43 = vpop.f32.mrb[18].mxu0  ;;  %v1117_v44 = vpop.f32.mrb[19].mxu1 }
 0x138   :  { %v1406_v45 = vpop.f32.mrb[19].mxu0 }
 0x139   :  { %v1632_v46 = vmax.f32 %v1402_v41, 0.0  ;;  %v1405_v47 = vadd.f32 %v1404_v43, %v1116_v42  ;;  %1327 = vmatmul.mubr.bf16.gmra.mrb[124].mxu1 %v2653_v37 }
 0x13a   :  { %1616 = vmatmul.mubr.bf16.gmra.mrb[124].mxu0 %v2654_v40 }
 0x13b   :  { %v2246_v48 = vpack.c.bf16 %v1632_v46, %v1632_v46  ;;  %v1633_v49 = vmax.f32 %v1405_v47, 0.0 }
 0x13c   :  { %v1120_v50 = vpop.f32.mrb[20].mxu1 }
 0x13d   :  { %1953 = vst.msk [vmem:[%s3522_s3 + $0x20] sm:$0xf] %vm1944_vm0, %v2246_v48  ;;  %v2247_v51 = vpack.c.bf16 %v1633_v49, %v1633_v49  ;;  %v1121_v52 = vadd.f32 %v3138_v15, %v1120_v50  ;;  %v1409_v53 = vpop.f32.mrb[20].mxu0  ;;  %v1122_v54 = vpop.f32.mrb[21].mxu1 }
 0x13e   :  { %v1411_v55 = vpop.f32.mrb[21].mxu0  ;;  %v1123_v56 = vpop.f32.mrb[22].mxu1 }
 0x13f   :  { %1954 = vst.msk [vmem:[%s3522_s3 + $0x24] sm:$0xf] %vm1944_vm0, %v2247_v51  ;;  %v1410_v57 = vadd.f32 %v1409_v53, %v1121_v52  ;;  %v1124_v58 = vadd.f32 %v3138_v15, %v1123_v56  ;;  %v1412_v59 = vpop.f32.mrb[22].mxu0  ;;  %v1125_v60 = vpop.f32.mrb[23].mxu1 }
 0x140   :  { %v1414_v61 = vpop.f32.mrb[23].mxu0 }
 0x141   :  { %v1634_v62 = vmax.f32 %v1410_v57, 0.0  ;;  %v1413_v63 = vadd.f32 %v1412_v59, %v1124_v58 }
 0x143   :  { %v2248_v0 = vpack.c.bf16 %v1634_v62, %v1634_v62  ;;  %v1635_v1 = vmax.f32 %v1413_v63, 0.0 }
 0x144   :  { %v1128_v2 = vpop.f32.mrb[24].mxu1 }
 0x145   :  { %1955 = vst.msk [vmem:[%s3522_s3 + $0x28] sm:$0xf] %vm1944_vm0, %v2248_v0  ;;  %v2249_v3 = vpack.c.bf16 %v1635_v1, %v1635_v1  ;;  %v1129_v4 = vadd.f32 %v3138_v15, %v1128_v2  ;;  %v1417_v5 = vpop.f32.mrb[24].mxu0  ;;  %v1130_v6 = vpop.f32.mrb[25].mxu1 }
 0x146   :  { %v1419_v7 = vpop.f32.mrb[25].mxu0  ;;  %v1131_v8 = vpop.f32.mrb[26].mxu1 }
 0x147   :  { %1956 = vst.msk [vmem:[%s3522_s3 + $0x2c] sm:$0xf] %vm1944_vm0, %v2249_v3  ;;  %v1418_v9 = vadd.f32 %v1417_v5, %v1129_v4  ;;  %v1132_v10 = vadd.f32 %v3138_v15, %v1131_v8  ;;  %v1420_v11 = vpop.f32.mrb[26].mxu0  ;;  %v1133_v12 = vpop.f32.mrb[27].mxu1 }
 0x148   :  { %v1422_v13 = vpop.f32.mrb[27].mxu0 }
 0x149   :  { %v1636_v14 = vmax.f32 %v1418_v9, 0.0  ;;  %v1421_v16 = vadd.f32 %v1420_v11, %v1132_v10 }
 0x14b   :  { %v2250_v17 = vpack.c.bf16 %v1636_v14, %v1636_v14  ;;  %v1637_v18 = vmax.f32 %v1421_v16, 0.0 }
 0x14c   :  { %v1136_v19 = vpop.f32.mrb[28].mxu1 }
 0x14d   :  { %1957 = vst.msk [vmem:[%s3522_s3 + $0x30] sm:$0xf] %vm1944_vm0, %v2250_v17  ;;  %v2251_v20 = vpack.c.bf16 %v1637_v18, %v1637_v18  ;;  %v1137_v21 = vadd.f32 %v3138_v15, %v1136_v19  ;;  %v1425_v22 = vpop.f32.mrb[28].mxu0  ;;  %v1138_v23 = vpop.f32.mrb[29].mxu1 }
 0x14e   :  { %v1427_v24 = vpop.f32.mrb[29].mxu0  ;;  %v1139_v25 = vpop.f32.mrb[30].mxu1 }
 0x14f   :  { %1958 = vst.msk [vmem:[%s3522_s3 + $0x34] sm:$0xf] %vm1944_vm0, %v2251_v20  ;;  %v1426_v26 = vadd.f32 %v1425_v22, %v1137_v21  ;;  %v1140_v27 = vadd.f32 %v3138_v15, %v1139_v25  ;;  %v1428_v28 = vpop.f32.mrb[30].mxu0  ;;  %v1141_v29 = vpop.f32.mrb[31].mxu1 }
 0x150   :  { %v1430_v30 = vpop.f32.mrb[31].mxu0 }
 0x151   :  { %v1638_v31 = vmax.f32 %v1426_v26, 0.0  ;;  %v1429_v32 = vadd.f32 %v1428_v28, %v1140_v27 }
 0x153   :  { %v2252_v33 = vpack.c.bf16 %v1638_v31, %v1638_v31  ;;  %v1639_v34 = vmax.f32 %v1429_v32, 0.0 }
 0x154   :  { %v1144_v35 = vpop.f32.mrb[32].mxu1 }
 0x155   :  { %1959 = vst.msk [vmem:[%s3522_s3 + $0x38] sm:$0xf] %vm1944_vm0, %v2252_v33  ;;  %v2253_v36 = vpack.c.bf16 %v1639_v34, %v1639_v34  ;;  %v1145_v37 = vadd.f32 %v3138_v15, %v1144_v35  ;;  %v1433_v38 = vpop.f32.mrb[32].mxu0  ;;  %v1146_v39 = vpop.f32.mrb[33].mxu1 }
 0x156   :  { %v1435_v40 = vpop.f32.mrb[33].mxu0  ;;  %v1147_v41 = vpop.f32.mrb[34].mxu1 }
 0x157   :  { %1960 = vst.msk [vmem:[%s3522_s3 + $0x3c] sm:$0xf] %vm1944_vm0, %v2253_v36  ;;  %v1434_v42 = vadd.f32 %v1433_v38, %v1145_v37  ;;  %v1148_v43 = vadd.f32 %v3138_v15, %v1147_v41  ;;  %v1436_v44 = vpop.f32.mrb[34].mxu0  ;;  %v1149_v45 = vpop.f32.mrb[35].mxu1 }
 0x158   :  { %v1438_v46 = vpop.f32.mrb[35].mxu0 }
 0x159   :  { %v1640_v47 = vmax.f32 %v1434_v42, 0.0  ;;  %v1437_v48 = vadd.f32 %v1436_v44, %v1148_v43 }
 0x15b   :  { %v2254_v49 = vpack.c.bf16 %v1640_v47, %v1640_v47  ;;  %v1641_v50 = vmax.f32 %v1437_v48, 0.0 }
 0x15c   :  { %v1152_v51 = vpop.f32.mrb[36].mxu1 }
 0x15d   :  { %1961 = vst.msk [vmem:[%s3522_s3 + $0x40] sm:$0xf] %vm1944_vm0, %v2254_v49  ;;  %v2255_v52 = vpack.c.bf16 %v1641_v50, %v1641_v50  ;;  %v1153_v53 = vadd.f32 %v3138_v15, %v1152_v51  ;;  %v1441_v54 = vpop.f32.mrb[36].mxu0  ;;  %v1154_v55 = vpop.f32.mrb[37].mxu1 }
 0x15e   :  { %v1443_v56 = vpop.f32.mrb[37].mxu0  ;;  %v1155_v57 = vpop.f32.mrb[38].mxu1 }
 0x15f   :  { %1962 = vst.msk [vmem:[%s3522_s3 + $0x44] sm:$0xf] %vm1944_vm0, %v2255_v52  ;;  %v1442_v58 = vadd.f32 %v1441_v54, %v1153_v53  ;;  %v1156_v59 = vadd.f32 %v3138_v15, %v1155_v57  ;;  %v1444_v60 = vpop.f32.mrb[38].mxu0  ;;  %v1157_v61 = vpop.f32.mrb[39].mxu1 }
 0x160   :  { %v1446_v62 = vpop.f32.mrb[39].mxu0 }
 0x161   :  { %v1642_v63 = vmax.f32 %v1442_v58, 0.0  ;;  %v1445_v0 = vadd.f32 %v1444_v60, %v1156_v59 }
 0x163   :  { %v2256_v1 = vpack.c.bf16 %v1642_v63, %v1642_v63  ;;  %v1643_v2 = vmax.f32 %v1445_v0, 0.0 }
 0x164   :  { %v1160_v3 = vpop.f32.mrb[40].mxu1 }
 0x165   :  { %1963 = vst.msk [vmem:[%s3522_s3 + $0x48] sm:$0xf] %vm1944_vm0, %v2256_v1  ;;  %v2257_v4 = vpack.c.bf16 %v1643_v2, %v1643_v2  ;;  %v1161_v5 = vadd.f32 %v3138_v15, %v1160_v3  ;;  %v1449_v6 = vpop.f32.mrb[40].mxu0  ;;  %v1162_v7 = vpop.f32.mrb[41].mxu1 }
 0x166   :  { %v1451_v8 = vpop.f32.mrb[41].mxu0  ;;  %v1163_v9 = vpop.f32.mrb[42].mxu1 }
 0x167   :  { %1964 = vst.msk [vmem:[%s3522_s3 + $0x4c] sm:$0xf] %vm1944_vm0, %v2257_v4  ;;  %v1450_v10 = vadd.f32 %v1449_v6, %v1161_v5  ;;  %v1164_v11 = vadd.f32 %v3138_v15, %v1163_v9  ;;  %v1452_v12 = vpop.f32.mrb[42].mxu0  ;;  %v1165_v13 = vpop.f32.mrb[43].mxu1 }
 0x168   :  { %v1454_v14 = vpop.f32.mrb[43].mxu0 }
 0x169   :  { %v1644_v16 = vmax.f32 %v1450_v10, 0.0  ;;  %v1453_v17 = vadd.f32 %v1452_v12, %v1164_v11 }
 0x16b   :  { %v2258_v18 = vpack.c.bf16 %v1644_v16, %v1644_v16  ;;  %v1645_v19 = vmax.f32 %v1453_v17, 0.0 }
 0x16c   :  { %v1168_v20 = vpop.f32.mrb[44].mxu1 }
 0x16d   :  { %1965 = vst.msk [vmem:[%s3522_s3 + $0x50] sm:$0xf] %vm1944_vm0, %v2258_v18  ;;  %v2259_v21 = vpack.c.bf16 %v1645_v19, %v1645_v19  ;;  %v1169_v22 = vadd.f32 %v3138_v15, %v1168_v20  ;;  %v1457_v23 = vpop.f32.mrb[44].mxu0  ;;  %v1170_v24 = vpop.f32.mrb[45].mxu1 }
 0x16e   :  { %v1459_v25 = vpop.f32.mrb[45].mxu0  ;;  %v1171_v26 = vpop.f32.mrb[46].mxu1 }
 0x16f   :  { %1966 = vst.msk [vmem:[%s3522_s3 + $0x54] sm:$0xf] %vm1944_vm0, %v2259_v21  ;;  %v1458_v27 = vadd.f32 %v1457_v23, %v1169_v22  ;;  %v1172_v28 = vadd.f32 %v3138_v15, %v1171_v26  ;;  %v1460_v29 = vpop.f32.mrb[46].mxu0  ;;  %v1173_v30 = vpop.f32.mrb[47].mxu1 }
 0x170   :  { %v1462_v31 = vpop.f32.mrb[47].mxu0 }
 0x171   :  { %v1646_v32 = vmax.f32 %v1458_v27, 0.0  ;;  %v1461_v33 = vadd.f32 %v1460_v29, %v1172_v28 }
 0x173   :  { %v2260_v34 = vpack.c.bf16 %v1646_v32, %v1646_v32  ;;  %v1647_v35 = vmax.f32 %v1461_v33, 0.0 }
 0x174   :  { %v1176_v36 = vpop.f32.mrb[48].mxu1 }
 0x175   :  { %1967 = vst.msk [vmem:[%s3522_s3 + $0x58] sm:$0xf] %vm1944_vm0, %v2260_v34  ;;  %v2261_v37 = vpack.c.bf16 %v1647_v35, %v1647_v35  ;;  %v1177_v38 = vadd.f32 %v3138_v15, %v1176_v36  ;;  %v1465_v39 = vpop.f32.mrb[48].mxu0  ;;  %v1178_v40 = vpop.f32.mrb[49].mxu1 }
 0x176   :  { %v1467_v41 = vpop.f32.mrb[49].mxu0  ;;  %v1179_v42 = vpop.f32.mrb[50].mxu1 }
 0x177   :  { %1968 = vst.msk [vmem:[%s3522_s3 + $0x5c] sm:$0xf] %vm1944_vm0, %v2261_v37  ;;  %v1466_v43 = vadd.f32 %v1465_v39, %v1177_v38  ;;  %v1180_v44 = vadd.f32 %v3138_v15, %v1179_v42  ;;  %v1468_v45 = vpop.f32.mrb[50].mxu0  ;;  %v1181_v46 = vpop.f32.mrb[51].mxu1 }
 0x178   :  { %v1470_v47 = vpop.f32.mrb[51].mxu0 }
 0x179   :  { %v1648_v48 = vmax.f32 %v1466_v43, 0.0  ;;  %v1469_v49 = vadd.f32 %v1468_v45, %v1180_v44 }
 0x17b   :  { %v2262_v50 = vpack.c.bf16 %v1648_v48, %v1648_v48  ;;  %v1649_v51 = vmax.f32 %v1469_v49, 0.0 }
 0x17c   :  { %v1184_v52 = vpop.f32.mrb[52].mxu1 }
 0x17d   :  { %1969 = vst.msk [vmem:[%s3522_s3 + $0x60] sm:$0xf] %vm1944_vm0, %v2262_v50  ;;  %v2263_v53 = vpack.c.bf16 %v1649_v51, %v1649_v51  ;;  %v1185_v54 = vadd.f32 %v3138_v15, %v1184_v52  ;;  %v1473_v55 = vpop.f32.mrb[52].mxu0  ;;  %v1186_v56 = vpop.f32.mrb[53].mxu1 }
 0x17e   :  { %v1475_v57 = vpop.f32.mrb[53].mxu0  ;;  %v1187_v58 = vpop.f32.mrb[54].mxu1 }
 0x17f   :  { %1970 = vst.msk [vmem:[%s3522_s3 + $0x64] sm:$0xf] %vm1944_vm0, %v2263_v53  ;;  %v1474_v59 = vadd.f32 %v1473_v55, %v1185_v54  ;;  %v1188_v60 = vadd.f32 %v3138_v15, %v1187_v58  ;;  %v1476_v61 = vpop.f32.mrb[54].mxu0  ;;  %v1189_v62 = vpop.f32.mrb[55].mxu1 }
 0x180   :  { %v1478_v63 = vpop.f32.mrb[55].mxu0 }
 0x181   :  { %v1650_v0 = vmax.f32 %v1474_v59, 0.0  ;;  %v1477_v1 = vadd.f32 %v1476_v61, %v1188_v60 }
 0x183   :  { %v2264_v2 = vpack.c.bf16 %v1650_v0, %v1650_v0  ;;  %v1651_v3 = vmax.f32 %v1477_v1, 0.0 }
 0x184   :  { %v1192_v4 = vpop.f32.mrb[56].mxu1 }
 0x185   :  { %1971 = vst.msk [vmem:[%s3522_s3 + $0x68] sm:$0xf] %vm1944_vm0, %v2264_v2  ;;  %v2265_v5 = vpack.c.bf16 %v1651_v3, %v1651_v3  ;;  %v1193_v6 = vadd.f32 %v3138_v15, %v1192_v4  ;;  %v1481_v7 = vpop.f32.mrb[56].mxu0  ;;  %v1194_v8 = vpop.f32.mrb[57].mxu1 }
 0x186   :  { %v1483_v9 = vpop.f32.mrb[57].mxu0  ;;  %v1195_v10 = vpop.f32.mrb[58].mxu1 }
 0x187   :  { %1972 = vst.msk [vmem:[%s3522_s3 + $0x6c] sm:$0xf] %vm1944_vm0, %v2265_v5  ;;  %v1482_v11 = vadd.f32 %v1481_v7, %v1193_v6  ;;  %v1196_v12 = vadd.f32 %v3138_v15, %v1195_v10  ;;  %v1484_v13 = vpop.f32.mrb[58].mxu0  ;;  %v1197_v14 = vpop.f32.mrb[59].mxu1 }
 0x188   :  { %v1486_v16 = vpop.f32.mrb[59].mxu0 }
 0x189   :  { %v1652_v17 = vmax.f32 %v1482_v11, 0.0  ;;  %v1485_v18 = vadd.f32 %v1484_v13, %v1196_v12 }
 0x18b   :  { %v2266_v19 = vpack.c.bf16 %v1652_v17, %v1652_v17  ;;  %v1653_v20 = vmax.f32 %v1485_v18, 0.0 }
 0x18c   :  { %v1200_v21 = vpop.f32.mrb[60].mxu1 }
 0x18d   :  { %1973 = vst.msk [vmem:[%s3522_s3 + $0x70] sm:$0xf] %vm1944_vm0, %v2266_v19  ;;  %v2267_v22 = vpack.c.bf16 %v1653_v20, %v1653_v20  ;;  %v1201_v23 = vadd.f32 %v3138_v15, %v1200_v21  ;;  %v1489_v24 = vpop.f32.mrb[60].mxu0  ;;  %v1202_v25 = vpop.f32.mrb[61].mxu1 }
 0x18e   :  { %v1491_v26 = vpop.f32.mrb[61].mxu0  ;;  %v1203_v27 = vpop.f32.mrb[62].mxu1 }
 0x18f   :  { %1974 = vst.msk [vmem:[%s3522_s3 + $0x74] sm:$0xf] %vm1944_vm0, %v2267_v22  ;;  %v1490_v28 = vadd.f32 %v1489_v24, %v1201_v23  ;;  %v1204_v29 = vadd.f32 %v3138_v15, %v1203_v27  ;;  %v1492_v30 = vpop.f32.mrb[62].mxu0  ;;  %v1205_v31 = vpop.f32.mrb[63].mxu1 }
 0x190   :  { %v1494_v32 = vpop.f32.mrb[63].mxu0 }
 0x191   :  { %v1654_v33 = vmax.f32 %v1490_v28, 0.0  ;;  %v1493_v34 = vadd.f32 %v1492_v30, %v1204_v29 }
 0x193   :  { %v2268_v35 = vpack.c.bf16 %v1654_v33, %v1654_v33  ;;  %v1655_v36 = vmax.f32 %v1493_v34, 0.0 }
 0x194   :  { %v1208_v37 = vpop.f32.mrb[64].mxu1 }
 0x195   :  { %1975 = vst.msk [vmem:[%s3522_s3 + $0x78] sm:$0xf] %vm1944_vm0, %v2268_v35  ;;  %v2269_v38 = vpack.c.bf16 %v1655_v36, %v1655_v36  ;;  %v1209_v39 = vadd.f32 %v3138_v15, %v1208_v37  ;;  %v1497_v40 = vpop.f32.mrb[64].mxu0  ;;  %v1210_v41 = vpop.f32.mrb[65].mxu1 }
 0x196   :  { %v1499_v42 = vpop.f32.mrb[65].mxu0  ;;  %v1211_v43 = vpop.f32.mrb[66].mxu1 }
 0x197   :  { %1976 = vst.msk [vmem:[%s3522_s3 + $0x7c] sm:$0xf] %vm1944_vm0, %v2269_v38  ;;  %v1498_v44 = vadd.f32 %v1497_v40, %v1209_v39  ;;  %v1212_v45 = vadd.f32 %v3138_v15, %v1211_v43  ;;  %v1500_v46 = vpop.f32.mrb[66].mxu0  ;;  %v1213_v47 = vpop.f32.mrb[67].mxu1 }
 0x198   :  { %v1502_v48 = vpop.f32.mrb[67].mxu0 }
 0x199   :  { %v1656_v49 = vmax.f32 %v1498_v44, 0.0  ;;  %v1501_v50 = vadd.f32 %v1500_v46, %v1212_v45 }
 0x19b   :  { %v2270_v51 = vpack.c.bf16 %v1656_v49, %v1656_v49  ;;  %v1657_v52 = vmax.f32 %v1501_v50, 0.0 }
 0x19c   :  { %v1216_v53 = vpop.f32.mrb[68].mxu1 }
 0x19d   :  { %1977 = vst.msk [vmem:[%s3522_s3 + $0x80] sm:$0xf] %vm1944_vm0, %v2270_v51  ;;  %v2271_v54 = vpack.c.bf16 %v1657_v52, %v1657_v52  ;;  %v1217_v55 = vadd.f32 %v3138_v15, %v1216_v53  ;;  %v1505_v56 = vpop.f32.mrb[68].mxu0  ;;  %v1218_v57 = vpop.f32.mrb[69].mxu1 }
 0x19e   :  { %v1507_v58 = vpop.f32.mrb[69].mxu0  ;;  %v1219_v59 = vpop.f32.mrb[70].mxu1 }
 0x19f   :  { %1978 = vst.msk [vmem:[%s3522_s3 + $0x84] sm:$0xf] %vm1944_vm0, %v2271_v54  ;;  %v1506_v60 = vadd.f32 %v1505_v56, %v1217_v55  ;;  %v1220_v61 = vadd.f32 %v3138_v15, %v1219_v59  ;;  %v1508_v62 = vpop.f32.mrb[70].mxu0  ;;  %v1221_v63 = vpop.f32.mrb[71].mxu1 }
 0x1a0   :  { %v1510_v0 = vpop.f32.mrb[71].mxu0 }
 0x1a1   :  { %v1658_v1 = vmax.f32 %v1506_v60, 0.0  ;;  %v1509_v2 = vadd.f32 %v1508_v62, %v1220_v61 }
 0x1a3   :  { %v2272_v3 = vpack.c.bf16 %v1658_v1, %v1658_v1  ;;  %v1659_v4 = vmax.f32 %v1509_v2, 0.0 }
 0x1a4   :  { %v1224_v5 = vpop.f32.mrb[72].mxu1 }
 0x1a5   :  { %1979 = vst.msk [vmem:[%s3522_s3 + $0x88] sm:$0xf] %vm1944_vm0, %v2272_v3  ;;  %v2273_v6 = vpack.c.bf16 %v1659_v4, %v1659_v4  ;;  %v1225_v7 = vadd.f32 %v3138_v15, %v1224_v5  ;;  %v1513_v8 = vpop.f32.mrb[72].mxu0  ;;  %v1226_v9 = vpop.f32.mrb[73].mxu1 }
 0x1a6   :  { %v1515_v10 = vpop.f32.mrb[73].mxu0  ;;  %v1227_v11 = vpop.f32.mrb[74].mxu1 }
 0x1a7   :  { %1980 = vst.msk [vmem:[%s3522_s3 + $0x8c] sm:$0xf] %vm1944_vm0, %v2273_v6  ;;  %v1514_v12 = vadd.f32 %v1513_v8, %v1225_v7  ;;  %v1228_v13 = vadd.f32 %v3138_v15, %v1227_v11  ;;  %v1516_v14 = vpop.f32.mrb[74].mxu0  ;;  %v1229_v16 = vpop.f32.mrb[75].mxu1 }
 0x1a8   :  { %v1518_v17 = vpop.f32.mrb[75].mxu0 }
 0x1a9   :  { %v1660_v18 = vmax.f32 %v1514_v12, 0.0  ;;  %v1517_v19 = vadd.f32 %v1516_v14, %v1228_v13 }
 0x1ab   :  { %v2274_v20 = vpack.c.bf16 %v1660_v18, %v1660_v18  ;;  %v1661_v21 = vmax.f32 %v1517_v19, 0.0 }
 0x1ac   :  { %v1232_v22 = vpop.f32.mrb[76].mxu1 }
 0x1ad   :  { %1981 = vst.msk [vmem:[%s3522_s3 + $0x90] sm:$0xf] %vm1944_vm0, %v2274_v20  ;;  %v2275_v23 = vpack.c.bf16 %v1661_v21, %v1661_v21  ;;  %v1233_v24 = vadd.f32 %v3138_v15, %v1232_v22  ;;  %v1521_v25 = vpop.f32.mrb[76].mxu0  ;;  %v1234_v26 = vpop.f32.mrb[77].mxu1 }
 0x1ae   :  { %v1523_v27 = vpop.f32.mrb[77].mxu0  ;;  %v1235_v28 = vpop.f32.mrb[78].mxu1 }
 0x1af   :  { %1982 = vst.msk [vmem:[%s3522_s3 + $0x94] sm:$0xf] %vm1944_vm0, %v2275_v23  ;;  %v1522_v29 = vadd.f32 %v1521_v25, %v1233_v24  ;;  %v1236_v30 = vadd.f32 %v3138_v15, %v1235_v28  ;;  %v1524_v31 = vpop.f32.mrb[78].mxu0  ;;  %v1237_v32 = vpop.f32.mrb[79].mxu1 }
 0x1b0   :  { %v1526_v33 = vpop.f32.mrb[79].mxu0 }
 0x1b1   :  { %v1662_v34 = vmax.f32 %v1522_v29, 0.0  ;;  %v1525_v35 = vadd.f32 %v1524_v31, %v1236_v30 }
 0x1b3   :  { %v2276_v36 = vpack.c.bf16 %v1662_v34, %v1662_v34  ;;  %v1663_v37 = vmax.f32 %v1525_v35, 0.0 }
 0x1b4   :  { %v1240_v38 = vpop.f32.mrb[80].mxu1 }
 0x1b5   :  { %1983 = vst.msk [vmem:[%s3522_s3 + $0x98] sm:$0xf] %vm1944_vm0, %v2276_v36  ;;  %v2277_v39 = vpack.c.bf16 %v1663_v37, %v1663_v37  ;;  %v1241_v40 = vadd.f32 %v3138_v15, %v1240_v38  ;;  %v1529_v41 = vpop.f32.mrb[80].mxu0  ;;  %v1242_v42 = vpop.f32.mrb[81].mxu1 }
 0x1b6   :  { %v1531_v43 = vpop.f32.mrb[81].mxu0  ;;  %v1243_v44 = vpop.f32.mrb[82].mxu1 }
 0x1b7   :  { %1984 = vst.msk [vmem:[%s3522_s3 + $0x9c] sm:$0xf] %vm1944_vm0, %v2277_v39  ;;  %v1530_v45 = vadd.f32 %v1529_v41, %v1241_v40  ;;  %v1244_v46 = vadd.f32 %v3138_v15, %v1243_v44  ;;  %v1532_v47 = vpop.f32.mrb[82].mxu0  ;;  %v1245_v48 = vpop.f32.mrb[83].mxu1 }
 0x1b8   :  { %v1534_v49 = vpop.f32.mrb[83].mxu0 }
 0x1b9   :  { %v1664_v50 = vmax.f32 %v1530_v45, 0.0  ;;  %v1533_v51 = vadd.f32 %v1532_v47, %v1244_v46 }
 0x1bb   :  { %v2278_v52 = vpack.c.bf16 %v1664_v50, %v1664_v50  ;;  %v1665_v53 = vmax.f32 %v1533_v51, 0.0 }
 0x1bc   :  { %v1248_v54 = vpop.f32.mrb[84].mxu1 }
 0x1bd   :  { %1985 = vst.msk [vmem:[%s3522_s3 + $0xa0] sm:$0xf] %vm1944_vm0, %v2278_v52  ;;  %v2279_v55 = vpack.c.bf16 %v1665_v53, %v1665_v53  ;;  %v1249_v56 = vadd.f32 %v3138_v15, %v1248_v54  ;;  %v1537_v57 = vpop.f32.mrb[84].mxu0  ;;  %v1250_v58 = vpop.f32.mrb[85].mxu1 }
 0x1be   :  { %v1539_v59 = vpop.f32.mrb[85].mxu0  ;;  %v1251_v60 = vpop.f32.mrb[86].mxu1 }
 0x1bf   :  { %1986 = vst.msk [vmem:[%s3522_s3 + $0xa4] sm:$0xf] %vm1944_vm0, %v2279_v55  ;;  %v1538_v61 = vadd.f32 %v1537_v57, %v1249_v56  ;;  %v1252_v62 = vadd.f32 %v3138_v15, %v1251_v60  ;;  %v1540_v63 = vpop.f32.mrb[86].mxu0  ;;  %v1253_v0 = vpop.f32.mrb[87].mxu1 }
 0x1c0   :  { %v1542_v1 = vpop.f32.mrb[87].mxu0 }
 0x1c1   :  { %v1666_v2 = vmax.f32 %v1538_v61, 0.0  ;;  %v1541_v3 = vadd.f32 %v1540_v63, %v1252_v62 }
 0x1c3   :  { %v2280_v4 = vpack.c.bf16 %v1666_v2, %v1666_v2  ;;  %v1667_v5 = vmax.f32 %v1541_v3, 0.0 }
 0x1c4   :  { %v1256_v6 = vpop.f32.mrb[88].mxu1 }
 0x1c5   :  { %1987 = vst.msk [vmem:[%s3522_s3 + $0xa8] sm:$0xf] %vm1944_vm0, %v2280_v4  ;;  %v2281_v7 = vpack.c.bf16 %v1667_v5, %v1667_v5  ;;  %v1257_v8 = vadd.f32 %v3138_v15, %v1256_v6  ;;  %v1545_v9 = vpop.f32.mrb[88].mxu0  ;;  %v1258_v10 = vpop.f32.mrb[89].mxu1 }
 0x1c6   :  { %v1547_v11 = vpop.f32.mrb[89].mxu0  ;;  %v1259_v12 = vpop.f32.mrb[90].mxu1 }
 0x1c7   :  { %1988 = vst.msk [vmem:[%s3522_s3 + $0xac] sm:$0xf] %vm1944_vm0, %v2281_v7  ;;  %v1546_v13 = vadd.f32 %v1545_v9, %v1257_v8  ;;  %v1260_v14 = vadd.f32 %v3138_v15, %v1259_v12  ;;  %v1548_v16 = vpop.f32.mrb[90].mxu0  ;;  %v1261_v17 = vpop.f32.mrb[91].mxu1 }
 0x1c8   :  { %v1550_v18 = vpop.f32.mrb[91].mxu0 }
 0x1c9   :  { %v1668_v19 = vmax.f32 %v1546_v13, 0.0  ;;  %v1549_v20 = vadd.f32 %v1548_v16, %v1260_v14  ;;  %v3458_v16 = vld [vmem:[%s3521_s2] ss:$0 sm:$0xff] }
 0x1cb   :  { %v2282_v21 = vpack.c.bf16 %v1668_v19, %v1668_v19  ;;  %v1669_v22 = vmax.f32 %v1549_v20, 0.0 }
 0x1cc   :  { %v1264_v23 = vpop.f32.mrb[92].mxu1 }
 0x1cd   :  { %1989 = vst.msk [vmem:[%s3522_s3 + $0xb0] sm:$0xf] %vm1944_vm0, %v2282_v21  ;;  %v2283_v24 = vpack.c.bf16 %v1669_v22, %v1669_v22  ;;  %v1265_v25 = vadd.f32 %v3138_v15, %v1264_v23  ;;  %v1553_v26 = vpop.f32.mrb[92].mxu0  ;;  %v1266_v27 = vpop.f32.mrb[93].mxu1 }
 0x1ce   :  { %v1555_v28 = vpop.f32.mrb[93].mxu0  ;;  %v1267_v29 = vpop.f32.mrb[94].mxu1 }
 0x1cf   :  { %1990 = vst.msk [vmem:[%s3522_s3 + $0xb4] sm:$0xf] %vm1944_vm0, %v2283_v24  ;;  %v1554_v30 = vadd.f32 %v1553_v26, %v1265_v25  ;;  %v1268_v31 = vadd.f32 %v3138_v15, %v1267_v29  ;;  %v1556_v32 = vpop.f32.mrb[94].mxu0  ;;  %v1269_v33 = vpop.f32.mrb[95].mxu1 }
 0x1d0   :  { %v1558_v34 = vpop.f32.mrb[95].mxu0 }
 0x1d1   :  { %v1670_v35 = vmax.f32 %v1554_v30, 0.0  ;;  %v1557_v36 = vadd.f32 %v1556_v32, %v1268_v31 }
 0x1d3   :  { %v2284_v37 = vpack.c.bf16 %v1670_v35, %v1670_v35  ;;  %v1671_v38 = vmax.f32 %v1557_v36, 0.0 }
 0x1d4   :  { %v1272_v39 = vpop.f32.mrb[96].mxu1 }
 0x1d5   :  { %1991 = vst.msk [vmem:[%s3522_s3 + $0xb8] sm:$0xf] %vm1944_vm0, %v2284_v37  ;;  %v2285_v40 = vpack.c.bf16 %v1671_v38, %v1671_v38  ;;  %v1273_v41 = vadd.f32 %v3138_v15, %v1272_v39  ;;  %v1561_v42 = vpop.f32.mrb[96].mxu0  ;;  %v1274_v43 = vpop.f32.mrb[97].mxu1 }
 0x1d6   :  { %v1563_v44 = vpop.f32.mrb[97].mxu0  ;;  %v1275_v45 = vpop.f32.mrb[98].mxu1 }
 0x1d7   :  { %1992 = vst.msk [vmem:[%s3522_s3 + $0xbc] sm:$0xf] %vm1944_vm0, %v2285_v40  ;;  %v1562_v46 = vadd.f32 %v1561_v42, %v1273_v41  ;;  %v1276_v47 = vadd.f32 %v3138_v15, %v1275_v45  ;;  %v1564_v48 = vpop.f32.mrb[98].mxu0  ;;  %v1277_v49 = vpop.f32.mrb[99].mxu1 }
 0x1d8   :  { %v1566_v50 = vpop.f32.mrb[99].mxu0 }
 0x1d9   :  { %v1672_v51 = vmax.f32 %v1562_v46, 0.0  ;;  %v1565_v52 = vadd.f32 %v1564_v48, %v1276_v47 }
 0x1db   :  { %v2286_v53 = vpack.c.bf16 %v1672_v51, %v1672_v51  ;;  %v1673_v54 = vmax.f32 %v1565_v52, 0.0 }
 0x1dc   :  { %v1280_v55 = vpop.f32.mrb[100].mxu1 }
 0x1dd   :  { %1993 = vst.msk [vmem:[%s3522_s3 + $0xc0] sm:$0xf] %vm1944_vm0, %v2286_v53  ;;  %v2287_v56 = vpack.c.bf16 %v1673_v54, %v1673_v54  ;;  %v1281_v57 = vadd.f32 %v3138_v15, %v1280_v55  ;;  %v1569_v58 = vpop.f32.mrb[100].mxu0  ;;  %v1282_v59 = vpop.f32.mrb[101].mxu1 }
 0x1de   :  { %v1571_v60 = vpop.f32.mrb[101].mxu0  ;;  %v1283_v61 = vpop.f32.mrb[102].mxu1 }
 0x1df   :  { %1994 = vst.msk [vmem:[%s3522_s3 + $0xc4] sm:$0xf] %vm1944_vm0, %v2287_v56  ;;  %v1570_v62 = vadd.f32 %v1569_v58, %v1281_v57  ;;  %v1284_v63 = vadd.f32 %v3138_v15, %v1283_v61  ;;  %v1572_v0 = vpop.f32.mrb[102].mxu0  ;;  %v1285_v1 = vpop.f32.mrb[103].mxu1 }
 0x1e0   :  { %v1574_v2 = vpop.f32.mrb[103].mxu0 }
 0x1e1   :  { %v1674_v3 = vmax.f32 %v1570_v62, 0.0  ;;  %v1573_v4 = vadd.f32 %v1572_v0, %v1284_v63 }
 0x1e3   :  { %v2288_v5 = vpack.c.bf16 %v1674_v3, %v1674_v3  ;;  %v1675_v6 = vmax.f32 %v1573_v4, 0.0 }
 0x1e4   :  { %v1288_v7 = vpop.f32.mrb[104].mxu1 }
 0x1e5   :  { %1995 = vst.msk [vmem:[%s3522_s3 + $0xc8] sm:$0xf] %vm1944_vm0, %v2288_v5  ;;  %v2289_v8 = vpack.c.bf16 %v1675_v6, %v1675_v6  ;;  %v1289_v9 = vadd.f32 %v3138_v15, %v1288_v7  ;;  %v1577_v10 = vpop.f32.mrb[104].mxu0  ;;  %v1290_v11 = vpop.f32.mrb[105].mxu1 }
 0x1e6   :  { %v1579_v12 = vpop.f32.mrb[105].mxu0  ;;  %v1291_v13 = vpop.f32.mrb[106].mxu1 }
 0x1e7   :  { %1996 = vst.msk [vmem:[%s3522_s3 + $0xcc] sm:$0xf] %vm1944_vm0, %v2289_v8  ;;  %v1578_v14 = vadd.f32 %v1577_v10, %v1289_v9  ;;  %v1292_v17 = vadd.f32 %v3458_v16, %v1291_v13  ;;  %v1580_v18 = vpop.f32.mrb[106].mxu0  ;;  %v1293_v19 = vpop.f32.mrb[107].mxu1 }
 0x1e8   :  { %v1582_v15 = vpop.f32.mrb[107].mxu0 }
 0x1e9   :  { %v1676_v20 = vmax.f32 %v1578_v14, 0.0  ;;  %v1581_v21 = vadd.f32 %v1580_v18, %v1292_v17 }
 0x1eb   :  { %v2290_v22 = vpack.c.bf16 %v1676_v20, %v1676_v20  ;;  %v1677_v23 = vmax.f32 %v1581_v21, 0.0 }
 0x1ec   :  { %v1296_v24 = vpop.f32.mrb[108].mxu1 }
 0x1ed   :  { %1997 = vst.msk [vmem:[%s3522_s3 + $0xd0] sm:$0xf] %vm1944_vm0, %v2290_v22  ;;  %v2291_v25 = vpack.c.bf16 %v1677_v23, %v1677_v23  ;;  %v1297_v26 = vadd.f32 %v3458_v16, %v1296_v24  ;;  %v1585_v27 = vpop.f32.mrb[108].mxu0  ;;  %v1298_v28 = vpop.f32.mrb[109].mxu1 }
 0x1ee   :  { %v1587_v29 = vpop.f32.mrb[109].mxu0  ;;  %v1299_v30 = vpop.f32.mrb[110].mxu1 }
 0x1ef   :  { %1998 = vst.msk [vmem:[%s3522_s3 + $0xd4] sm:$0xf] %vm1944_vm0, %v2291_v25  ;;  %v1586_v31 = vadd.f32 %v1585_v27, %v1297_v26  ;;  %v1300_v32 = vadd.f32 %v3458_v16, %v1299_v30  ;;  %v1588_v33 = vpop.f32.mrb[110].mxu0  ;;  %v1301_v34 = vpop.f32.mrb[111].mxu1 }
 0x1f0   :  { %v1590_v35 = vpop.f32.mrb[111].mxu0 }
 0x1f1   :  { %v1678_v36 = vmax.f32 %v1586_v31, 0.0  ;;  %v1589_v37 = vadd.f32 %v1588_v33, %v1300_v32 }
 0x1f3   :  { %v2292_v38 = vpack.c.bf16 %v1678_v36, %v1678_v36  ;;  %v1679_v39 = vmax.f32 %v1589_v37, 0.0 }
 0x1f4   :  { %v1304_v40 = vpop.f32.mrb[112].mxu1 }
 0x1f5   :  { %1999 = vst.msk [vmem:[%s3522_s3 + $0xd8] sm:$0xf] %vm1944_vm0, %v2292_v38  ;;  %v2293_v41 = vpack.c.bf16 %v1679_v39, %v1679_v39  ;;  %v1305_v42 = vadd.f32 %v3458_v16, %v1304_v40  ;;  %v1593_v43 = vpop.f32.mrb[112].mxu0  ;;  %v1306_v44 = vpop.f32.mrb[113].mxu1 }
 0x1f6   :  { %v1595_v45 = vpop.f32.mrb[113].mxu0  ;;  %v1307_v46 = vpop.f32.mrb[114].mxu1 }
 0x1f7   :  { %2000 = vst.msk [vmem:[%s3522_s3 + $0xdc] sm:$0xf] %vm1944_vm0, %v2293_v41  ;;  %v1594_v47 = vadd.f32 %v1593_v43, %v1305_v42  ;;  %v1308_v48 = vadd.f32 %v3458_v16, %v1307_v46  ;;  %v1596_v49 = vpop.f32.mrb[114].mxu0  ;;  %v1309_v50 = vpop.f32.mrb[115].mxu1 }
 0x1f8   :  { %v1598_v51 = vpop.f32.mrb[115].mxu0 }
 0x1f9   :  { %v1680_v52 = vmax.f32 %v1594_v47, 0.0  ;;  %v1597_v53 = vadd.f32 %v1596_v49, %v1308_v48 }
 0x1fb   :  { %v2294_v54 = vpack.c.bf16 %v1680_v52, %v1680_v52  ;;  %v1681_v55 = vmax.f32 %v1597_v53, 0.0 }
 0x1fc   :  { %v1312_v56 = vpop.f32.mrb[116].mxu1 }
 0x1fd   :  { %2001 = vst.msk [vmem:[%s3522_s3 + $0xe0] sm:$0xf] %vm1944_vm0, %v2294_v54  ;;  %v2295_v57 = vpack.c.bf16 %v1681_v55, %v1681_v55  ;;  %v1313_v58 = vadd.f32 %v3458_v16, %v1312_v56  ;;  %v1601_v59 = vpop.f32.mrb[116].mxu0  ;;  %v1314_v60 = vpop.f32.mrb[117].mxu1 }
 0x1fe   :  { %v1603_v61 = vpop.f32.mrb[117].mxu0  ;;  %v1315_v62 = vpop.f32.mrb[118].mxu1 }
 0x1ff   :  { %2002 = vst.msk [vmem:[%s3522_s3 + $0xe4] sm:$0xf] %vm1944_vm0, %v2295_v57  ;;  %v1602_v63 = vadd.f32 %v1601_v59, %v1313_v58  ;;  %v1316_v0 = vadd.f32 %v3458_v16, %v1315_v62  ;;  %v1604_v1 = vpop.f32.mrb[118].mxu0  ;;  %v1317_v2 = vpop.f32.mrb[119].mxu1 }
 0x200   :  { %v1606_v3 = vpop.f32.mrb[119].mxu0 }
 0x201   :  { %v1682_v4 = vmax.f32 %v1602_v63, 0.0  ;;  %v1605_v5 = vadd.f32 %v1604_v1, %v1316_v0 }
 0x203   :  { %v2296_v6 = vpack.c.bf16 %v1682_v4, %v1682_v4  ;;  %v1683_v7 = vmax.f32 %v1605_v5, 0.0 }
 0x204   :  { %v1320_v8 = vpop.f32.mrb[120].mxu1 }
 0x205   :  { %2003 = vst.msk [vmem:[%s3522_s3 + $0xe8] sm:$0xf] %vm1944_vm0, %v2296_v6  ;;  %v2297_v9 = vpack.c.bf16 %v1683_v7, %v1683_v7  ;;  %v1321_v10 = vadd.f32 %v3458_v16, %v1320_v8  ;;  %v1609_v11 = vpop.f32.mrb[120].mxu0  ;;  %v1322_v12 = vpop.f32.mrb[121].mxu1 }
 0x206   :  { %v1611_v13 = vpop.f32.mrb[121].mxu0  ;;  %v1323_v14 = vpop.f32.mrb[122].mxu1 }
 0x207   :  { %2004 = vst.msk [vmem:[%s3522_s3 + $0xec] sm:$0xf] %vm1944_vm0, %v2297_v9  ;;  %v1610_v17 = vadd.f32 %v1609_v11, %v1321_v10  ;;  %v1324_v18 = vadd.f32 %v3458_v16, %v1323_v14  ;;  %v1612_v19 = vpop.f32.mrb[122].mxu0  ;;  %v1325_v15 = vpop.f32.mrb[123].mxu1 }
 0x208   :  { %v1614_v20 = vpop.f32.mrb[123].mxu0 }
 0x209   :  { %v1684_v21 = vmax.f32 %v1610_v17, 0.0  ;;  %v1613_v22 = vadd.f32 %v1612_v19, %v1324_v18 }
 0x20b   :  { %v2298_v23 = vpack.c.bf16 %v1684_v21, %v1684_v21  ;;  %v1685_v24 = vmax.f32 %v1613_v22, 0.0 }
 0x20c   :  { %v1328_v25 = vpop.f32.mrb[124].mxu1 }
 0x20d   :  { %2005 = vst.msk [vmem:[%s3522_s3 + $0xf0] sm:$0xf] %vm1944_vm0, %v2298_v23  ;;  %v2299_v26 = vpack.c.bf16 %v1685_v24, %v1685_v24  ;;  %v1329_v27 = vadd.f32 %v3458_v16, %v1328_v25  ;;  %v1617_v28 = vpop.f32.mrb[124].mxu0  ;;  %v1330_v29 = vpop.f32.mrb[125].mxu1 }
 0x20e   :  { %v1619_v30 = vpop.f32.mrb[125].mxu0  ;;  %v1331_v31 = vpop.f32.mrb[126].mxu1 }
 0x20f   :  { %2006 = vst.msk [vmem:[%s3522_s3 + $0xf4] sm:$0xf] %vm1944_vm0, %v2299_v26  ;;  %v1618_v32 = vadd.f32 %v1617_v28, %v1329_v27  ;;  %v1332_v33 = vadd.f32 %v3458_v16, %v1331_v31  ;;  %v1620_v34 = vpop.f32.mrb[126].mxu0  ;;  %v1333_v35 = vpop.f32.mrb[127].mxu1 }
 0x210   :  { %v1622_v36 = vpop.f32.mrb[127].mxu0 }
 0x211   :  { %v1686_v37 = vmax.f32 %v1618_v32, 0.0  ;;  %v1621_v38 = vadd.f32 %v1620_v34, %v1332_v33 }
 0x213   :  { %v2300_v39 = vpack.c.bf16 %v1686_v37, %v1686_v37  ;;  %v1687_v40 = vmax.f32 %v1621_v38, 0.0 }
 0x215   :  { %2007 = vst.msk [vmem:[%s3522_s3 + $0xf8] sm:$0xf] %vm1944_vm0, %v2300_v39  ;;  %v2301_v41 = vpack.c.bf16 %v1687_v40, %v1687_v40 }
 0x217   :  { %2008 = vst.msk [vmem:[%s3522_s3 + $0xfc] sm:$0xf] %vm1944_vm0, %v2301_v41 }

// kernel: _lambda_.8
= control target key start
LH: loop header
LB: loop body
LE: loop exit
PB: predicated region body
PF: predicated region fallthrough
CT: control target
= control target key end

     0   :  { %s2431_s1 = inlined_call_operand.vmem [shape: bf16[1024,128], index: 1, kind: input, shape index: {}]   ;;  %s2432_s0 = inlined_call_operand.vmem [shape: bf16[128,1024], index: 0, kind: input, shape index: {}]   ;;  %s2433_s2 = inlined_call_operand.vmem [shape: f32[1,128], index: 2, kind: input, shape index: {}]   ;;  %s2434_s3 = inlined_call_operand.vmem [shape: bf16[128,128], index: 3, kind: output, shape index: {}]  }
   0x1   :  { %v1870_v0 = vld [vmem:[%s2431_s1 + $0x40] sm:$0xff]   ;;  %v1874_v4 = vld [vmem:[%s2431_s1 + $0x48] sm:$0xff]   ;;  %v1878_v8 = vld [vmem:[%s2431_s1 + $0x50] sm:$0xff]  }
   0x2   :  { %v1871_v1 = vld [vmem:[%s2431_s1 + $0xc0] sm:$0xff]   ;;  %1614 = vmatprep.subr.bf16.mxu0 %v1870_v0  ;;  %v1875_v5 = vld [vmem:[%s2431_s1 + $0xc8] sm:$0xff]   ;;  %v1879_v9 = vld [vmem:[%s2431_s1 + $0xd0] sm:$0xff]  }
   0x3   :  { %v1872_v2 = vld [vmem:[%s2431_s1] sm:$0xff]   ;;  %1678 = vmatprep.subr.bf16.mxu1 %v1871_v1  ;;  %v1876_v6 = vld [vmem:[%s2431_s1 + $0x8] sm:$0xff]   ;;  %v1880_v10 = vld [vmem:[%s2431_s1 + $0x10] sm:$0xff]  }
   0x4   :  { %v1873_v3 = vld [vmem:[%s2431_s1 + $0x80] sm:$0xff]   ;;  %1615 = vmatpush3.bf16.msra.mxu0 %v1872_v2  ;;  %v1877_v7 = vld [vmem:[%s2431_s1 + $0x88] sm:$0xff]   ;;  %v1881_v11 = vld [vmem:[%s2431_s1 + $0x90] sm:$0xff]  }
   0x5   :  { %1679 = vmatpush3.bf16.msra.mxu1 %v1873_v3  ;;  %1616 = vmatprep.subr.bf16.mxu0 %v1874_v4  ;;  %v1882_v12 = vld [vmem:[%s2431_s1 + $0x58] sm:$0xff]   ;;  %v1886_v16 = vld [vmem:[%s2431_s1 + $0x60] sm:$0xff]   ;;  %v1890_v20 = vld [vmem:[%s2431_s1 + $0x68] sm:$0xff]  }
   0x6   :  { %1680 = vmatprep.subr.bf16.mxu1 %v1875_v5  ;;  %v1883_v13 = vld [vmem:[%s2431_s1 + $0xd8] sm:$0xff]   ;;  %v1887_v17 = vld [vmem:[%s2431_s1 + $0xe0] sm:$0xff]   ;;  %v1891_v21 = vld [vmem:[%s2431_s1 + $0xe8] sm:$0xff]  }
   0x7   :  { %v1884_v14 = vld [vmem:[%s2431_s1 + $0x18] sm:$0xff]   ;;  %v1888_v18 = vld [vmem:[%s2431_s1 + $0x20] sm:$0xff]   ;;  %v1892_v22 = vld [vmem:[%s2431_s1 + $0x28] sm:$0xff]  }
   0x8   :  { %1617 = vmatpush3.bf16.msra.mxu0 %v1876_v6  ;;  %v1885_v15 = vld [vmem:[%s2431_s1 + $0x98] sm:$0xff]   ;;  %v1889_v19 = vld [vmem:[%s2431_s1 + $0xa0] sm:$0xff]   ;;  %v1893_v23 = vld [vmem:[%s2431_s1 + $0xa8] sm:$0xff]  }
   0x9   :  { %1681 = vmatpush3.bf16.msra.mxu1 %v1877_v7  ;;  %1618 = vmatprep.subr.bf16.mxu0 %v1878_v8  ;;  %v1894_v24 = vld [vmem:[%s2431_s1 + $0x70] sm:$0xff]   ;;  %v1898_v28 = vld [vmem:[%s2431_s1 + $0x78] sm:$0xff]   ;;  %v15_v32 = vld [vmem:[%s2432_s0] sm:$0xff] }
   0xa   :  { %1682 = vmatprep.subr.bf16.mxu1 %v1879_v9  ;;  %v1895_v25 = vld [vmem:[%s2431_s1 + $0xf0] sm:$0xff]   ;;  %v1899_v29 = vld [vmem:[%s2431_s1 + $0xf8] sm:$0xff]   ;;  %v19_v33 = vld [vmem:[%s2432_s0 + $0x20] sm:$0xff] }
   0xb   :  { %v1896_v26 = vld [vmem:[%s2431_s1 + $0x30] sm:$0xff]   ;;  %v1900_v30 = vld [vmem:[%s2431_s1 + $0x38] sm:$0xff]   ;;  %v16_v34 = vld [vmem:[%s2432_s0 + $0x8] sm:$0xff]  ;;  %v1407_v35 = vcombine.low %v15_v32, %v19_v33  ;;  %v1408_v36 = vcombine.high %v15_v32, %v19_v33 }
   0xc   :  { %1619 = vmatpush3.bf16.msra.mxu0 %v1880_v10  ;;  %v1897_v27 = vld [vmem:[%s2431_s1 + $0xb0] sm:$0xff]   ;;  %v1901_v31 = vld [vmem:[%s2431_s1 + $0xb8] sm:$0xff]   ;;  %v20_v37 = vld [vmem:[%s2432_s0 + $0x28] sm:$0xff] }
   0xd   :  { %1683 = vmatpush3.bf16.msra.mxu1 %v1881_v11  ;;  %1620 = vmatprep.subr.bf16.mxu0 %v1882_v12  ;;  %v1409_v38 = vcombine.low %v16_v34, %v20_v37  ;;  %v1410_v39 = vcombine.high %v16_v34, %v20_v37  ;;  %v1902_v40 = vld [vmem:[%s2431_s1 + $0x140] sm:$0xff]   ;;  %v24_v47 = vld [vmem:[%s2432_s0 + $0x48] sm:$0xff]  ;;  %v1910_v62 = vld [vmem:[%s2431_s1 + $0x150] sm:$0xff]  }
   0xe   :  { %1684 = vmatprep.subr.bf16.mxu1 %v1883_v13  ;;  %950 = vmatprep.mubr.bf16.mxu0 %v1408_v36  ;;  %v1903_v41 = vld [vmem:[%s2431_s1 + $0x100] sm:$0xff]   ;;  %v28_v48 = vld [vmem:[%s2432_s0 + $0x68] sm:$0xff]  ;;  %v1911_v63 = vld [vmem:[%s2431_s1 + $0x110] sm:$0xff]  }
   0xf   :  { %1047 = vmatprep.mubr.bf16.mxu1 %v1410_v39  ;;  %v1904_v42 = vld [vmem:[%s2431_s1 + $0x1c0] sm:$0xff]   ;;  %v1418_v49 = vcombine.high %v24_v47, %v28_v48  ;;  %v1906_v50 = vld [vmem:[%s2431_s1 + $0x148] sm:$0xff]   ;;  %v1417_v53 = vcombine.low %v24_v47, %v28_v48  ;;  %v1912_v0 = vld [vmem:[%s2431_s1 + $0x1d0] sm:$0xff]  }
  0x10   :  { %1621 = vmatpush3.bf16.msra.mxu0 %v1884_v14  ;;  %v1905_v43 = vld [vmem:[%s2431_s1 + $0x180] sm:$0xff]   ;;  %v1907_v52 = vld [vmem:[%s2431_s1 + $0x108] sm:$0xff]   ;;  %v1913_v1 = vld [vmem:[%s2431_s1 + $0x190] sm:$0xff]  }
  0x11   :  { %1685 = vmatpush3.bf16.msra.mxu1 %v1885_v15  ;;  %1622 = vmatprep.subr.bf16.mxu0 %v1886_v16  ;;  %v23_v44 = vld [vmem:[%s2432_s0 + $0x40] sm:$0xff]  ;;  %v1908_v54 = vld [vmem:[%s2431_s1 + $0x1c8] sm:$0xff]   ;;  %v1914_v10 = vld [vmem:[%s2431_s1 + $0x158] sm:$0xff]  }
  0x12   :  { %1686 = vmatprep.subr.bf16.mxu1 %v1887_v17  ;;  %v27_v45 = vld [vmem:[%s2432_s0 + $0x60] sm:$0xff]  ;;  %v1909_v55 = vld [vmem:[%s2431_s1 + $0x188] sm:$0xff]   ;;  %v1915_v11 = vld [vmem:[%s2431_s1 + $0x118] sm:$0xff]  }
  0x13   :  { %v1416_v46 = vcombine.high %v23_v44, %v27_v45  ;;  %v1415_v51 = vcombine.low %v23_v44, %v27_v45  ;;  %v31_v56 = vld [vmem:[%s2432_s0 + $0x80] sm:$0xff]  ;;  %v32_v58 = vld [vmem:[%s2432_s0 + $0x88] sm:$0xff]  ;;  %v1916_v12 = vld [vmem:[%s2431_s1 + $0x1d8] sm:$0xff]  }
  0x14   :  { %1623 = vmatpush3.bf16.msra.mxu0 %v1888_v18  ;;  %v35_v57 = vld [vmem:[%s2432_s0 + $0xa0] sm:$0xff]  ;;  %v36_v59 = vld [vmem:[%s2432_s0 + $0xa8] sm:$0xff]  ;;  %v1917_v13 = vld [vmem:[%s2431_s1 + $0x198] sm:$0xff]  }
  0x15   :  { %1687 = vmatpush3.bf16.msra.mxu1 %v1889_v19  ;;  %1624 = vmatprep.subr.bf16.mxu0 %v1890_v20  ;;  %v1424_v60 = vcombine.high %v31_v56, %v35_v57  ;;  %v1426_v61 = vcombine.high %v32_v58, %v36_v59  ;;  %v1423_v2 = vcombine.low %v31_v56, %v35_v57  ;;  %v39_v3 = vld [vmem:[%s2432_s0 + $0xc0] sm:$0xff]  ;;  %v40_v5 = vld [vmem:[%s2432_s0 + $0xc8] sm:$0xff]  ;;  %v1927_v39 = vld [vmem:[%s2431_s1 + $0x130] sm:$0xff]  }
  0x16   :  { %1688 = vmatprep.subr.bf16.mxu1 %v1891_v21  ;;  %v43_v4 = vld [vmem:[%s2432_s0 + $0xe0] sm:$0xff]  ;;  %v1425_v6 = vcombine.low %v32_v58, %v36_v59  ;;  %v44_v8 = vld [vmem:[%s2432_s0 + $0xe8] sm:$0xff]  ;;  %v1931_v48 = vld [vmem:[%s2431_s1 + $0x138] sm:$0xff]  }
  0x17   :  { %v1432_v7 = vcombine.high %v39_v3, %v43_v4  ;;  %v1434_v9 = vcombine.high %v40_v5, %v44_v8  ;;  %v47_v14 = vld [vmem:[%s2432_s0 + $0x100] sm:$0xff]  ;;  %v48_v16 = vld [vmem:[%s2432_s0 + $0x108] sm:$0xff]  ;;  %v1431_v19 = vcombine.low %v39_v3, %v43_v4  ;;  %v1433_v21 = vcombine.low %v40_v5, %v44_v8  ;;  %v26_v8 = vld [vmem:[%s2432_s0 + $0x58] sm:$0xff] }
  0x18   :  { %1625 = vmatpush3.bf16.msra.mxu0 %v1892_v22  ;;  %v51_v15 = vld [vmem:[%s2432_s0 + $0x120] sm:$0xff]  ;;  %v52_v17 = vld [vmem:[%s2432_s0 + $0x128] sm:$0xff] }
  0x19   :  { %1689 = vmatpush3.bf16.msra.mxu1 %v1893_v23  ;;  %1626 = vmatprep.subr.bf16.mxu0 %v1894_v24  ;;  %v1918_v18 = vld [vmem:[%s2431_s1 + $0x160] sm:$0xff]   ;;  %v1440_v22 = vcombine.high %v47_v14, %v51_v15  ;;  %v1442_v24 = vcombine.high %v48_v16, %v52_v17  ;;  %v1924_v32 = vld [vmem:[%s2431_s1 + $0x1e8] sm:$0xff]   ;;  %v1439_v34 = vcombine.low %v47_v14, %v51_v15  ;;  %v33_v14 = vld [vmem:[%s2432_s0 + $0x90] sm:$0xff] }
  0x1a   :  { %1690 = vmatprep.subr.bf16.mxu1 %v1895_v25  ;;  %v1919_v20 = vld [vmem:[%s2431_s1 + $0x120] sm:$0xff]   ;;  %v1925_v33 = vld [vmem:[%s2431_s1 + $0x1a8] sm:$0xff]   ;;  %v37_v15 = vld [vmem:[%s2432_s0 + $0xb0] sm:$0xff] }
  0x1b   :  { %v1920_v23 = vld [vmem:[%s2431_s1 + $0x1e0] sm:$0xff]   ;;  %v64_v44 = vld [vmem:[%s2432_s0 + $0x188] sm:$0xff] }
  0x1c   :  { %1627 = vmatpush3.bf16.msra.mxu0 %v1896_v26  ;;  %v1921_v25 = vld [vmem:[%s2431_s1 + $0x1a0] sm:$0xff]   ;;  %v68_v45 = vld [vmem:[%s2432_s0 + $0x1a8] sm:$0xff] }
  0x1d   :  { %1691 = vmatpush3.bf16.msra.mxu1 %v1897_v27  ;;  %1628 = vmatprep.subr.bf16.mxu0 %v1898_v28  ;;  %v55_v26 = vld [vmem:[%s2432_s0 + $0x140] sm:$0xff]  ;;  %v1922_v28 = vld [vmem:[%s2431_s1 + $0x168] sm:$0xff]   ;;  %v1457_v59 = vcombine.low %v64_v44, %v68_v45 }
  0x1e   :  { %1692 = vmatprep.subr.bf16.mxu1 %v1899_v29  ;;  %v59_v27 = vld [vmem:[%s2432_s0 + $0x160] sm:$0xff]  ;;  %v56_v29 = vld [vmem:[%s2432_s0 + $0x148] sm:$0xff] }
  0x1f   :  { %v1448_v36 = vcombine.high %v55_v26, %v59_v27  ;;  %v1447_v47 = vcombine.low %v55_v26, %v59_v27  ;;  %v72_v56 = vld [vmem:[%s2432_s0 + $0x1c8] sm:$0xff]  ;;  %v1427_v26 = vcombine.low %v33_v14, %v37_v15 }
  0x20   :  { %1629 = vmatpush3.bf16.msra.mxu0 %v1900_v30  ;;  %v60_v30 = vld [vmem:[%s2432_s0 + $0x168] sm:$0xff] }
  0x21   :  { %1693 = vmatpush3.bf16.msra.mxu1 %v1901_v31  ;;  %1742 = vmatprep.subr.bf16.mxu0 %v1902_v40  ;;  %v1923_v31 = vld [vmem:[%s2431_s1 + $0x128] sm:$0xff]   ;;  %v1450_v37 = vcombine.high %v56_v29, %v60_v30  ;;  %v1928_v40 = vld [vmem:[%s2431_s1 + $0x1f0] sm:$0xff]  }
  0x22   :  { %1806 = vmatprep.subr.bf16.mxu1 %v1904_v42  ;;  %v67_v42 = vld [vmem:[%s2432_s0 + $0x1a0] sm:$0xff]  ;;  %v76_v57 = vld [vmem:[%s2432_s0 + $0x1e8] sm:$0xff] }
  0x23   :  { %951 = vmatmul.mubr.bf16.vlgmr.msra.gmra.mrb[0].mxu0 %v1407_v35  ;;  %v1441_v35 = vcombine.low %v48_v16, %v52_v17  ;;  %v1465_v3 = vcombine.low %v72_v56, %v76_v57  ;;  %v34_v16 = vld [vmem:[%s2432_s0 + $0x98] sm:$0xff] }
  0x24   :  { %1048 = vmatmul.mubr.bf16.vlgmr.msra.gmra.mrb[0].mxu1 %v1409_v38  ;;  %1743 = vmatpush3.bf16.msra.mxu0 %v1903_v41  ;;  %v1926_v38 = vld [vmem:[%s2431_s1 + $0x170] sm:$0xff]   ;;  %v63_v41 = vld [vmem:[%s2432_s0 + $0x180] sm:$0xff]  ;;  %v38_v17 = vld [vmem:[%s2432_s0 + $0xb8] sm:$0xff] }
  0x25   :  { %1807 = vmatpush3.bf16.msra.mxu1 %v1905_v43  ;;  %958 = vmatprep.mubr.bf16.mxu0 %v1416_v46  ;;  %v1929_v43 = vld [vmem:[%s2431_s1 + $0x1b0] sm:$0xff]   ;;  %v1930_v46 = vld [vmem:[%s2431_s1 + $0x178] sm:$0xff]   ;;  %v1455_v58 = vcombine.low %v63_v41, %v67_v42  ;;  %v1429_v27 = vcombine.low %v34_v16, %v38_v17 }
  0x26   :  { %1055 = vmatprep.mubr.bf16.mxu1 %v1418_v49  ;;  %1744 = vmatprep.subr.bf16.mxu0 %v1906_v50  ;;  %v1449_v49 = vcombine.low %v56_v29, %v60_v30  ;;  %v1456_v50 = vcombine.high %v63_v41, %v67_v42  ;;  %v49_v30 = vld [vmem:[%s2432_s0 + $0x110] sm:$0xff]  ;;  %v62_v41 = vld [vmem:[%s2432_s0 + $0x178] sm:$0xff] }
  0x27   :  { %1808 = vmatprep.subr.bf16.mxu1 %v1908_v54  ;;  %v71_v54 = vld [vmem:[%s2432_s0 + $0x1c0] sm:$0xff] }
  0x28   :  { %1745 = vmatpush3.bf16.msra.mxu0 %v1907_v52  ;;  %v1458_v52 = vcombine.high %v64_v44, %v68_v45 }
  0x29   :  { %1809 = vmatpush3.bf16.msra.mxu1 %v1909_v55  ;;  %1746 = vmatprep.subr.bf16.mxu0 %v1910_v62  ;;  %v75_v55 = vld [vmem:[%s2432_s0 + $0x1e0] sm:$0xff]  ;;  %v17_v62 = vld [vmem:[%s2432_s0 + $0x10] sm:$0xff] }
  0x2a   :  { %1810 = vmatprep.subr.bf16.mxu1 %v1912_v0  ;;  %v18_v0 = vld [vmem:[%s2432_s0 + $0x18] sm:$0xff] }
  0x2b   :  { %959 = vmatmul.mubr.bf16.gmra.mrb[4].mxu0 %v1415_v51  ;;  %v1932_v51 = vld [vmem:[%s2431_s1 + $0x1f8] sm:$0xff]  }
  0x2c   :  { %1056 = vmatmul.mubr.bf16.gmra.mrb[4].mxu1 %v1417_v53  ;;  %966 = vmatprep.mubr.bf16.mxu0 %v1424_v60  ;;  %v1933_v53 = vld [vmem:[%s2431_s1 + $0x1b8] sm:$0xff]   ;;  %v1464_v60 = vcombine.high %v71_v54, %v75_v55 }
  0x2d   :  { %1063 = vmatprep.mubr.bf16.mxu1 %v1426_v61  ;;  %1747 = vmatpush3.bf16.msra.mxu0 %v1911_v63  ;;  %v1466_v61 = vcombine.high %v72_v56, %v76_v57  ;;  %v21_v63 = vld [vmem:[%s2432_s0 + $0x30] sm:$0xff]  ;;  %v74_v56 = vld [vmem:[%s2432_s0 + $0x1d8] sm:$0xff] }
  0x2e   :  { %1811 = vmatpush3.bf16.msra.mxu1 %v1913_v1  ;;  %1748 = vmatprep.subr.bf16.mxu0 %v1914_v10  ;;  %v22_v1 = vld [vmem:[%s2432_s0 + $0x38] sm:$0xff]  ;;  %v1412_v4 = vcombine.high %v17_v62, %v21_v63  ;;  %v1411_v10 = vcombine.low %v17_v62, %v21_v63 }
  0x2f   :  { %1812 = vmatprep.subr.bf16.mxu1 %v1916_v12  ;;  %v1414_v5 = vcombine.high %v18_v0, %v22_v1  ;;  %v78_v57 = vld [vmem:[%s2432_s0 + $0x1f8] sm:$0xff] }
  0x30   :  { %v1469_v63 = vcombine.low %v74_v56, %v78_v57 }
  0x31   :  { %1749 = vmatpush3.bf16.msra.mxu0 %v1915_v11  ;;  %v1413_v11 = vcombine.low %v18_v0, %v22_v1 }
  0x32   :  { %1813 = vmatpush3.bf16.msra.mxu1 %v1917_v13  ;;  %1750 = vmatprep.subr.bf16.mxu0 %v1918_v18 }
  0x33   :  { %967 = vmatmul.mubr.bf16.gmra.mrb[8].mxu0 %v1423_v2  ;;  %1814 = vmatprep.subr.bf16.mxu1 %v1920_v23  ;;  %v1463_v2 = vcombine.low %v71_v54, %v75_v55  ;;  %v45_v23 = vld [vmem:[%s2432_s0 + $0xf0] sm:$0xff] }
  0x34   :  { %1064 = vmatmul.mubr.bf16.gmra.mrb[8].mxu1 %v1425_v6  ;;  %974 = vmatprep.mubr.bf16.mxu0 %v1432_v7  ;;  %v25_v6 = vld [vmem:[%s2432_s0 + $0x50] sm:$0xff] }
  0x35   :  { %1071 = vmatprep.mubr.bf16.mxu1 %v1434_v9  ;;  %1751 = vmatpush3.bf16.msra.mxu0 %v1919_v20  ;;  %v29_v7 = vld [vmem:[%s2432_s0 + $0x70] sm:$0xff]  ;;  %v30_v9 = vld [vmem:[%s2432_s0 + $0x78] sm:$0xff]  ;;  %v1428_v20 = vcombine.high %v33_v14, %v37_v15 }
  0x36   :  { %1815 = vmatpush3.bf16.msra.mxu1 %v1921_v25  ;;  %1752 = vmatprep.subr.bf16.mxu0 %v1922_v28  ;;  %v1420_v12 = vcombine.high %v25_v6, %v29_v7  ;;  %v1422_v13 = vcombine.high %v26_v8, %v30_v9  ;;  %v1419_v18 = vcombine.low %v25_v6, %v29_v7  ;;  %v46_v25 = vld [vmem:[%s2432_s0 + $0xf8] sm:$0xff]  ;;  %v73_v54 = vld [vmem:[%s2432_s0 + $0x1d0] sm:$0xff] }
  0x37   :  { %1816 = vmatprep.subr.bf16.mxu1 %v1924_v32  ;;  %v50_v32 = vld [vmem:[%s2432_s0 + $0x118] sm:$0xff]  ;;  %v77_v55 = vld [vmem:[%s2432_s0 + $0x1f0] sm:$0xff] }
  0x38   :  { %v1467_v62 = vcombine.low %v73_v54, %v77_v55 }
  0x39   :  { %1753 = vmatpush3.bf16.msra.mxu0 %v1923_v31  ;;  %v53_v31 = vld [vmem:[%s2432_s0 + $0x130] sm:$0xff] }
  0x3a   :  { %1817 = vmatpush3.bf16.msra.mxu1 %v1925_v33  ;;  %1754 = vmatprep.subr.bf16.mxu0 %v1926_v38  ;;  %v54_v33 = vld [vmem:[%s2432_s0 + $0x138] sm:$0xff]  ;;  %v57_v38 = vld [vmem:[%s2432_s0 + $0x150] sm:$0xff]  ;;  %v1443_v42 = vcombine.low %v49_v30, %v53_v31 }
  0x3b   :  { %975 = vmatmul.mubr.bf16.gmra.mrb[12].mxu0 %v1431_v19  ;;  %1818 = vmatprep.subr.bf16.mxu1 %v1928_v40  ;;  %v1421_v19 = vcombine.low %v26_v8, %v30_v9  ;;  %v58_v40 = vld [vmem:[%s2432_s0 + $0x158] sm:$0xff] }
  0x3c   :  { %1072 = vmatmul.mubr.bf16.gmra.mrb[12].mxu1 %v1433_v21  ;;  %982 = vmatprep.mubr.bf16.mxu0 %v1440_v22  ;;  %v1430_v21 = vcombine.high %v34_v16, %v38_v17  ;;  %v41_v22 = vld [vmem:[%s2432_s0 + $0xd0] sm:$0xff]  ;;  %v1454_v45 = vcombine.high %v58_v40, %v62_v41 }
  0x3d   :  { %1079 = vmatprep.mubr.bf16.mxu1 %v1442_v24  ;;  %1755 = vmatpush3.bf16.msra.mxu0 %v1927_v39  ;;  %v42_v24 = vld [vmem:[%s2432_s0 + $0xd8] sm:$0xff]  ;;  %v1436_v28 = vcombine.high %v41_v22, %v45_v23  ;;  %v61_v39 = vld [vmem:[%s2432_s0 + $0x170] sm:$0xff] }
  0x3e   :  { %1819 = vmatpush3.bf16.msra.mxu1 %v1929_v43  ;;  %1756 = vmatprep.subr.bf16.mxu0 %v1930_v46  ;;  %v1438_v29 = vcombine.high %v42_v24, %v46_v25  ;;  %v1445_v43 = vcombine.low %v50_v32, %v54_v33  ;;  %v1452_v44 = vcombine.high %v57_v38, %v61_v39  ;;  %v65_v46 = vld [vmem:[%s2432_s0 + $0x190] sm:$0xff] }
  0x3f   :  { %1820 = vmatprep.subr.bf16.mxu1 %v1932_v51  ;;  %v1453_v51 = vcombine.low %v58_v40, %v62_v41 }
  0x41   :  { %1757 = vmatpush3.bf16.msra.mxu0 %v1931_v48  ;;  %v66_v48 = vld [vmem:[%s2432_s0 + $0x198] sm:$0xff] }
  0x42   :  { %1821 = vmatpush3.bf16.msra.mxu1 %v1933_v53 }
  0x43   :  { %983 = vmatmul.mubr.bf16.gmra.mrb[16].mxu0 %v1439_v34  ;;  %v1435_v34 = vcombine.low %v41_v22, %v45_v23 }
  0x44   :  { %1080 = vmatmul.mubr.bf16.gmra.mrb[16].mxu1 %v1441_v35  ;;  %990 = vmatprep.mubr.bf16.mxu0 %v1448_v36  ;;  %v1437_v35 = vcombine.low %v42_v24, %v46_v25  ;;  %v1444_v36 = vcombine.high %v49_v30, %v53_v31 }
  0x45   :  { %1087 = vmatprep.mubr.bf16.mxu1 %v1450_v37  ;;  %v1446_v37 = vcombine.high %v50_v32, %v54_v33 }
  0x4b   :  { %991 = vmatmul.mubr.bf16.gmra.mrb[20].mxu0 %v1447_v47  ;;  %v69_v47 = vld [vmem:[%s2432_s0 + $0x1b0] sm:$0xff] }
  0x4c   :  { %1088 = vmatmul.mubr.bf16.gmra.mrb[20].mxu1 %v1449_v49  ;;  %998 = vmatprep.mubr.bf16.mxu0 %v1456_v50  ;;  %v70_v49 = vld [vmem:[%s2432_s0 + $0x1b8] sm:$0xff]  ;;  %v1451_v50 = vcombine.low %v57_v38, %v61_v39 }
  0x4d   :  { %1095 = vmatprep.mubr.bf16.mxu1 %v1458_v52  ;;  %v1460_v52 = vcombine.high %v65_v46, %v69_v47  ;;  %v1462_v53 = vcombine.high %v66_v48, %v70_v49 }
  0x53   :  { %999 = vmatmul.mubr.bf16.gmra.mrb[24].mxu0 %v1455_v58  ;;  %v1459_v58 = vcombine.low %v65_v46, %v69_v47 }
  0x54   :  { %1096 = vmatmul.mubr.bf16.gmra.mrb[24].mxu1 %v1457_v59  ;;  %1006 = vmatprep.mubr.bf16.mxu0 %v1464_v60  ;;  %v1461_v59 = vcombine.low %v66_v48, %v70_v49  ;;  %v1468_v60 = vcombine.high %v73_v54, %v77_v55 }
  0x55   :  { %1103 = vmatprep.mubr.bf16.mxu1 %v1466_v61  ;;  %v1470_v61 = vcombine.high %v74_v56, %v78_v57 }
  0x5b   :  { %1007 = vmatmul.mubr.bf16.gmra.mrb[28].mxu0 %v1463_v2  ;;  %v2341_v2 = vld [vmem:[%s2433_s2] ss:$0 sm:$0xff] }
  0x5c   :  { %1104 = vmatmul.mubr.bf16.gmra.mrb[28].mxu1 %v1465_v3  ;;  %1144 = vmatprep.mubr.bf16.mxu0 %v1412_v4 }
  0x5d   :  { %1241 = vmatprep.mubr.bf16.mxu1 %v1414_v5 }
  0x63   :  { %1145 = vmatmul.mubr.bf16.vlgmr.msra.gmra.mrb[32].mxu0 %v1411_v10 }
  0x64   :  { %1242 = vmatmul.mubr.bf16.vlgmr.msra.gmra.mrb[32].mxu1 %v1413_v11  ;;  %1152 = vmatprep.mubr.bf16.mxu0 %v1420_v12 }
  0x65   :  { %1249 = vmatprep.mubr.bf16.mxu1 %v1422_v13 }
  0x6b   :  { %1153 = vmatmul.mubr.bf16.gmra.mrb[36].mxu0 %v1419_v18 }
  0x6c   :  { %1250 = vmatmul.mubr.bf16.gmra.mrb[36].mxu1 %v1421_v19  ;;  %1160 = vmatprep.mubr.bf16.mxu0 %v1428_v20 }
  0x6d   :  { %1257 = vmatprep.mubr.bf16.mxu1 %v1430_v21 }
  0x73   :  { %1161 = vmatmul.mubr.bf16.gmra.mrb[40].mxu0 %v1427_v26 }
  0x74   :  { %1258 = vmatmul.mubr.bf16.gmra.mrb[40].mxu1 %v1429_v27  ;;  %1168 = vmatprep.mubr.bf16.mxu0 %v1436_v28 }
  0x75   :  { %1265 = vmatprep.mubr.bf16.mxu1 %v1438_v29 }
  0x7b   :  { %1169 = vmatmul.mubr.bf16.gmra.mrb[44].mxu0 %v1435_v34 }
  0x7c   :  { %1266 = vmatmul.mubr.bf16.gmra.mrb[44].mxu1 %v1437_v35  ;;  %1176 = vmatprep.mubr.bf16.mxu0 %v1444_v36 }
  0x7d   :  { %1273 = vmatprep.mubr.bf16.mxu1 %v1446_v37 }
  0x83   :  { %1177 = vmatmul.mubr.bf16.gmra.mrb[48].mxu0 %v1443_v42 }
  0x84   :  { %1274 = vmatmul.mubr.bf16.gmra.mrb[48].mxu1 %v1445_v43  ;;  %1184 = vmatprep.mubr.bf16.mxu0 %v1452_v44 }
  0x85   :  { %1281 = vmatprep.mubr.bf16.mxu1 %v1454_v45 }
  0x8b   :  { %1185 = vmatmul.mubr.bf16.gmra.mrb[52].mxu0 %v1451_v50 }
  0x8c   :  { %1282 = vmatmul.mubr.bf16.gmra.mrb[52].mxu1 %v1453_v51  ;;  %1192 = vmatprep.mubr.bf16.mxu0 %v1460_v52 }
  0x8d   :  { %1289 = vmatprep.mubr.bf16.mxu1 %v1462_v53 }
  0x93   :  { %1193 = vmatmul.mubr.bf16.gmra.mrb[56].mxu0 %v1459_v58 }
  0x94   :  { %1290 = vmatmul.mubr.bf16.gmra.mrb[56].mxu1 %v1461_v59  ;;  %1200 = vmatprep.mubr.bf16.mxu0 %v1468_v60 }
  0x95   :  { %1297 = vmatprep.mubr.bf16.mxu1 %v1470_v61 }
  0x9b   :  { %1201 = vmatmul.mubr.bf16.gmra.mrb[60].mxu0 %v1467_v62 }
  0x9c   :  { %1298 = vmatmul.mubr.bf16.gmra.mrb[60].mxu1 %v1469_v63 }
  0xf6   :  { %v1630_v0 = vpop.f32.mrb[0].mxu0 }
  0xf7   :  { %v1694_v1 = vpop.f32.mrb[0].mxu1  ;;  %v1631_v3 = vpop.f32.mrb[1].mxu0 }
  0xf8   :  { %v1632_v4 = vadd.f32 %v1631_v3, %v1630_v0  ;;  %v1695_v5 = vpop.f32.mrb[1].mxu1  ;;  %v1633_v6 = vpop.f32.mrb[2].mxu0 }
  0xf9   :  { %v1696_v7 = vadd.f32 %v1695_v5, %v1694_v1  ;;  %v1697_v8 = vpop.f32.mrb[2].mxu1  ;;  %v1634_v9 = vpop.f32.mrb[3].mxu0 }
  0xfa   :  { %v953_v10 = vadd.f32 %v1632_v4, %v2341_v2  ;;  %v1635_v11 = vadd.f32 %v1634_v9, %v1633_v6  ;;  %v1698_v12 = vpop.f32.mrb[3].mxu1 }
  0xfb   :  { %v1699_v13 = vadd.f32 %v1698_v12, %v1697_v8 }
  0xfc   :  { %v2344_v14 = vadd.f32 %v1696_v7, %v953_v10  ;;  %v956_v15 = vadd.f32 %v1635_v11, %v2341_v2 }
  0xfe   :  { %v2347_v16 = vadd.f32 %v1699_v13, %v956_v15  ;;  %v1636_v17 = vpop.f32.mrb[4].mxu0 }
  0xff   :  { %v1700_v18 = vpop.f32.mrb[4].mxu1  ;;  %v1637_v19 = vpop.f32.mrb[5].mxu0 }
 0x100   :  { %v1638_v20 = vadd.f32 %v1637_v19, %v1636_v17  ;;  %v1701_v21 = vpop.f32.mrb[5].mxu1  ;;  %v1639_v22 = vpop.f32.mrb[6].mxu0 }
 0x101   :  { %v1702_v23 = vadd.f32 %v1701_v21, %v1700_v18  ;;  %v1703_v24 = vpop.f32.mrb[6].mxu1  ;;  %v1640_v25 = vpop.f32.mrb[7].mxu0 }
 0x102   :  { %v961_v26 = vadd.f32 %v1638_v20, %v2341_v2  ;;  %v1641_v27 = vadd.f32 %v1640_v25, %v1639_v22  ;;  %v1704_v28 = vpop.f32.mrb[7].mxu1 }
 0x103   :  { %v1705_v29 = vadd.f32 %v1704_v28, %v1703_v24 }
 0x104   :  { %v2350_v30 = vadd.f32 %v1702_v23, %v961_v26  ;;  %v964_v31 = vadd.f32 %v1641_v27, %v2341_v2 }
 0x106   :  { %v2353_v32 = vadd.f32 %v1705_v29, %v964_v31  ;;  %v1642_v33 = vpop.f32.mrb[8].mxu0 }
 0x107   :  { %v1706_v34 = vpop.f32.mrb[8].mxu1  ;;  %v1643_v35 = vpop.f32.mrb[9].mxu0 }
 0x108   :  { %v1644_v36 = vadd.f32 %v1643_v35, %v1642_v33  ;;  %v1707_v37 = vpop.f32.mrb[9].mxu1  ;;  %v1645_v38 = vpop.f32.mrb[10].mxu0 }
 0x109   :  { %v1708_v39 = vadd.f32 %v1707_v37, %v1706_v34  ;;  %v1709_v40 = vpop.f32.mrb[10].mxu1  ;;  %v1646_v41 = vpop.f32.mrb[11].mxu0 }
 0x10a   :  { %v969_v42 = vadd.f32 %v1644_v36, %v2341_v2  ;;  %v1647_v43 = vadd.f32 %v1646_v41, %v1645_v38  ;;  %v1710_v44 = vpop.f32.mrb[11].mxu1 }
 0x10b   :  { %v1711_v45 = vadd.f32 %v1710_v44, %v1709_v40 }
 0x10c   :  { %v2356_v46 = vadd.f32 %v1708_v39, %v969_v42  ;;  %v972_v47 = vadd.f32 %v1647_v43, %v2341_v2 }
 0x10e   :  { %v2359_v48 = vadd.f32 %v1711_v45, %v972_v47  ;;  %v1648_v49 = vpop.f32.mrb[12].mxu0 }
 0x10f   :  { %v1712_v50 = vpop.f32.mrb[12].mxu1  ;;  %v1649_v51 = vpop.f32.mrb[13].mxu0 }
 0x110   :  { %v1650_v52 = vadd.f32 %v1649_v51, %v1648_v49  ;;  %v1713_v53 = vpop.f32.mrb[13].mxu1  ;;  %v1651_v54 = vpop.f32.mrb[14].mxu0 }
 0x111   :  { %v1714_v55 = vadd.f32 %v1713_v53, %v1712_v50  ;;  %v1715_v56 = vpop.f32.mrb[14].mxu1  ;;  %v1652_v57 = vpop.f32.mrb[15].mxu0 }
 0x112   :  { %v977_v58 = vadd.f32 %v1650_v52, %v2341_v2  ;;  %v1653_v59 = vadd.f32 %v1652_v57, %v1651_v54  ;;  %v1716_v60 = vpop.f32.mrb[15].mxu1 }
 0x113   :  { %v1717_v61 = vadd.f32 %v1716_v60, %v1715_v56 }
 0x114   :  { %v2362_v62 = vadd.f32 %v1714_v55, %v977_v58  ;;  %v980_v63 = vadd.f32 %v1653_v59, %v2341_v2 }
 0x116   :  { %v2365_v0 = vadd.f32 %v1717_v61, %v980_v63  ;;  %v1654_v1 = vpop.f32.mrb[16].mxu0 }
 0x117   :  { %v1718_v3 = vpop.f32.mrb[16].mxu1  ;;  %v1655_v4 = vpop.f32.mrb[17].mxu0 }
 0x118   :  { %v1656_v5 = vadd.f32 %v1655_v4, %v1654_v1  ;;  %v1719_v6 = vpop.f32.mrb[17].mxu1  ;;  %v1657_v7 = vpop.f32.mrb[18].mxu0 }
 0x119   :  { %v1720_v8 = vadd.f32 %v1719_v6, %v1718_v3  ;;  %v1721_v9 = vpop.f32.mrb[18].mxu1  ;;  %v1658_v10 = vpop.f32.mrb[19].mxu0 }
 0x11a   :  { %v985_v11 = vadd.f32 %v1656_v5, %v2341_v2  ;;  %v1659_v12 = vadd.f32 %v1658_v10, %v1657_v7  ;;  %v1722_v13 = vpop.f32.mrb[19].mxu1 }
 0x11b   :  { %v1723_v15 = vadd.f32 %v1722_v13, %v1721_v9 }
 0x11c   :  { %v2368_v17 = vadd.f32 %v1720_v8, %v985_v11  ;;  %v988_v18 = vadd.f32 %v1659_v12, %v2341_v2 }
 0x11e   :  { %v2371_v19 = vadd.f32 %v1723_v15, %v988_v18  ;;  %v1660_v20 = vpop.f32.mrb[20].mxu0 }
 0x11f   :  { %v1724_v21 = vpop.f32.mrb[20].mxu1  ;;  %v1661_v22 = vpop.f32.mrb[21].mxu0 }
 0x120   :  { %v1662_v23 = vadd.f32 %v1661_v22, %v1660_v20  ;;  %v1725_v24 = vpop.f32.mrb[21].mxu1  ;;  %v1663_v25 = vpop.f32.mrb[22].mxu0 }
 0x121   :  { %v1726_v26 = vadd.f32 %v1725_v24, %v1724_v21  ;;  %v1727_v27 = vpop.f32.mrb[22].mxu1  ;;  %v1664_v28 = vpop.f32.mrb[23].mxu0 }
 0x122   :  { %v993_v29 = vadd.f32 %v1662_v23, %v2341_v2  ;;  %v1665_v31 = vadd.f32 %v1664_v28, %v1663_v25  ;;  %v1728_v33 = vpop.f32.mrb[23].mxu1 }
 0x123   :  { %v1729_v34 = vadd.f32 %v1728_v33, %v1727_v27 }
 0x124   :  { %v2374_v35 = vadd.f32 %v1726_v26, %v993_v29  ;;  %v996_v36 = vadd.f32 %v1665_v31, %v2341_v2 }
 0x126   :  { %v2377_v37 = vadd.f32 %v1729_v34, %v996_v36  ;;  %v1666_v38 = vpop.f32.mrb[24].mxu0 }
 0x127   :  { %v1730_v39 = vpop.f32.mrb[24].mxu1  ;;  %v1667_v40 = vpop.f32.mrb[25].mxu0 }
 0x128   :  { %v1668_v41 = vadd.f32 %v1667_v40, %v1666_v38  ;;  %v1731_v42 = vpop.f32.mrb[25].mxu1  ;;  %v1669_v43 = vpop.f32.mrb[26].mxu0 }
 0x129   :  { %v1732_v44 = vadd.f32 %v1731_v42, %v1730_v39  ;;  %v1733_v45 = vpop.f32.mrb[26].mxu1  ;;  %v1670_v47 = vpop.f32.mrb[27].mxu0 }
 0x12a   :  { %v1001_v49 = vadd.f32 %v1668_v41, %v2341_v2  ;;  %v1671_v50 = vadd.f32 %v1670_v47, %v1669_v43  ;;  %v1734_v51 = vpop.f32.mrb[27].mxu1 }
 0x12b   :  { %v1735_v52 = vadd.f32 %v1734_v51, %v1733_v45 }
 0x12c   :  { %v2380_v53 = vadd.f32 %v1732_v44, %v1001_v49  ;;  %v1004_v54 = vadd.f32 %v1671_v50, %v2341_v2 }
 0x12e   :  { %v2383_v55 = vadd.f32 %v1735_v52, %v1004_v54  ;;  %v1672_v56 = vpop.f32.mrb[28].mxu0 }
 0x12f   :  { %v1736_v57 = vpop.f32.mrb[28].mxu1  ;;  %v1673_v58 = vpop.f32.mrb[29].mxu0 }
 0x130   :  { %v1674_v59 = vadd.f32 %v1673_v58, %v1672_v56  ;;  %v1737_v60 = vpop.f32.mrb[29].mxu1  ;;  %v1675_v61 = vpop.f32.mrb[30].mxu0 }
 0x131   :  { %v1738_v63 = vadd.f32 %v1737_v60, %v1736_v57  ;;  %v1739_v1 = vpop.f32.mrb[30].mxu1  ;;  %v1676_v3 = vpop.f32.mrb[31].mxu0 }
 0x132   :  { %v1009_v4 = vadd.f32 %v1674_v59, %v2341_v2  ;;  %v1677_v5 = vadd.f32 %v1676_v3, %v1675_v61  ;;  %v1740_v6 = vpop.f32.mrb[31].mxu1 }
 0x133   :  { %v1741_v7 = vadd.f32 %v1740_v6, %v1739_v1 }
 0x134   :  { %v2386_v8 = vadd.f32 %v1738_v63, %v1009_v4  ;;  %v1012_v9 = vadd.f32 %v1677_v5, %v2341_v2 }
 0x136   :  { %v2389_v10 = vadd.f32 %v1741_v7, %v1012_v9  ;;  %v1758_v11 = vpop.f32.mrb[32].mxu0 }
 0x137   :  { %v1822_v12 = vpop.f32.mrb[32].mxu1  ;;  %v1759_v13 = vpop.f32.mrb[33].mxu0 }
 0x138   :  { %v1760_v15 = vadd.f32 %v1759_v13, %v1758_v11  ;;  %v1823_v18 = vpop.f32.mrb[33].mxu1  ;;  %v1761_v20 = vpop.f32.mrb[34].mxu0 }
 0x139   :  { %v1824_v21 = vadd.f32 %v1823_v18, %v1822_v12  ;;  %v1825_v22 = vpop.f32.mrb[34].mxu1  ;;  %v1762_v23 = vpop.f32.mrb[35].mxu0 }
 0x13a   :  { %v1147_v24 = vadd.f32 %v1760_v15, %v2344_v14  ;;  %v1763_v25 = vadd.f32 %v1762_v23, %v1761_v20  ;;  %v1826_v26 = vpop.f32.mrb[35].mxu1 }
 0x13b   :  { %v1827_v27 = vadd.f32 %v1826_v26, %v1825_v22 }
 0x13c   :  { %v1244_v28 = vadd.f32 %v1824_v21, %v1147_v24  ;;  %v1150_v29 = vadd.f32 %v1763_v25, %v2347_v16 }
 0x13e   :  { %v1247_v2 = vadd.f32 %v1827_v27, %v1150_v29  ;;  %v1764_v31 = vpop.f32.mrb[36].mxu0  ;;  %v1306_v36 = vmax.f32 %v1244_v28, 0.0 }
 0x13f   :  { %v1828_v33 = vpop.f32.mrb[36].mxu1  ;;  %v1765_v34 = vpop.f32.mrb[37].mxu0 }
 0x140   :  { %v1307_v38 = vmax.f32 %v1247_v2, 0.0  ;;  %v1766_v39 = vadd.f32 %v1765_v34, %v1764_v31  ;;  %v1829_v40 = vpop.f32.mrb[37].mxu1  ;;  %v1767_v41 = vpop.f32.mrb[38].mxu0 }
 0x141   :  { %v1830_v42 = vadd.f32 %v1829_v40, %v1828_v33  ;;  %v1831_v43 = vpop.f32.mrb[38].mxu1  ;;  %v1768_v44 = vpop.f32.mrb[39].mxu0 }
 0x142   :  { %v1570_v45 = vpack.c.bf16 %v1307_v38, %v1306_v36  ;;  %v1155_v14 = vadd.f32 %v1766_v39, %v2350_v30  ;;  %v1769_v47 = vadd.f32 %v1768_v44, %v1767_v41  ;;  %v1832_v49 = vpop.f32.mrb[39].mxu1 }
 0x143   :  { %v1833_v50 = vadd.f32 %v1832_v49, %v1831_v43 }
 0x144   :  { %1571 = vst [vmem:[%s2434_s3] sm:$0xff] %v1570_v45   ;;  %v1252_v16 = vadd.f32 %v1830_v42, %v1155_v14  ;;  %v1158_v51 = vadd.f32 %v1769_v47, %v2353_v32 }
 0x146   :  { %v1255_v52 = vadd.f32 %v1833_v50, %v1158_v51  ;;  %v1770_v54 = vpop.f32.mrb[40].mxu0  ;;  %v1308_v58 = vmax.f32 %v1252_v16, 0.0 }
 0x147   :  { %v1834_v56 = vpop.f32.mrb[40].mxu1  ;;  %v1771_v57 = vpop.f32.mrb[41].mxu0 }
 0x148   :  { %v1309_v59 = vmax.f32 %v1255_v52, 0.0  ;;  %v1772_v60 = vadd.f32 %v1771_v57, %v1770_v54  ;;  %v1835_v61 = vpop.f32.mrb[41].mxu1  ;;  %v1773_v63 = vpop.f32.mrb[42].mxu0 }
 0x149   :  { %v1836_v30 = vadd.f32 %v1835_v61, %v1834_v56  ;;  %v1837_v1 = vpop.f32.mrb[42].mxu1  ;;  %v1774_v3 = vpop.f32.mrb[43].mxu0 }
 0x14a   :  { %v1575_v4 = vpack.c.bf16 %v1309_v59, %v1308_v58  ;;  %v1163_v5 = vadd.f32 %v1772_v60, %v2356_v46  ;;  %v1775_v6 = vadd.f32 %v1774_v3, %v1773_v63  ;;  %v1838_v7 = vpop.f32.mrb[43].mxu1 }
 0x14b   :  { %v1839_v9 = vadd.f32 %v1838_v7, %v1837_v1 }
 0x14c   :  { %1607 = vst [vmem:[%s2434_s3 + $0x8] sm:$0xff] %v1575_v4   ;;  %v1260_v32 = vadd.f32 %v1836_v30, %v1163_v5  ;;  %v1166_v11 = vadd.f32 %v1775_v6, %v2359_v48 }
 0x14e   :  { %v1263_v12 = vadd.f32 %v1839_v9, %v1166_v11  ;;  %v1776_v13 = vpop.f32.mrb[44].mxu0  ;;  %v1310_v20 = vmax.f32 %v1260_v32, 0.0 }
 0x14f   :  { %v1840_v15 = vpop.f32.mrb[44].mxu1  ;;  %v1777_v18 = vpop.f32.mrb[45].mxu0 }
 0x150   :  { %v1311_v21 = vmax.f32 %v1263_v12, 0.0  ;;  %v1778_v22 = vadd.f32 %v1777_v18, %v1776_v13  ;;  %v1841_v23 = vpop.f32.mrb[45].mxu1  ;;  %v1779_v24 = vpop.f32.mrb[46].mxu0 }
 0x151   :  { %v1842_v46 = vadd.f32 %v1841_v23, %v1840_v15  ;;  %v1843_v25 = vpop.f32.mrb[46].mxu1  ;;  %v1780_v26 = vpop.f32.mrb[47].mxu0 }
 0x152   :  { %v1580_v27 = vpack.c.bf16 %v1311_v21, %v1310_v20  ;;  %v1171_v28 = vadd.f32 %v1778_v22, %v2362_v62  ;;  %v1781_v29 = vadd.f32 %v1780_v26, %v1779_v24  ;;  %v1844_v2 = vpop.f32.mrb[47].mxu1 }
 0x153   :  { %v1845_v31 = vadd.f32 %v1844_v2, %v1843_v25 }
 0x154   :  { %1608 = vst [vmem:[%s2434_s3 + $0x10] sm:$0xff] %v1580_v27   ;;  %v1268_v48 = vadd.f32 %v1842_v46, %v1171_v28  ;;  %v1174_v33 = vadd.f32 %v1781_v29, %v2365_v0 }
 0x156   :  { %v1271_v34 = vadd.f32 %v1845_v31, %v1174_v33  ;;  %v1782_v36 = vpop.f32.mrb[48].mxu0  ;;  %v1312_v40 = vmax.f32 %v1268_v48, 0.0 }
 0x157   :  { %v1846_v38 = vpop.f32.mrb[48].mxu1  ;;  %v1783_v39 = vpop.f32.mrb[49].mxu0 }
 0x158   :  { %v1313_v41 = vmax.f32 %v1271_v34, 0.0  ;;  %v1784_v42 = vadd.f32 %v1783_v39, %v1782_v36  ;;  %v1847_v43 = vpop.f32.mrb[49].mxu1  ;;  %v1785_v44 = vpop.f32.mrb[50].mxu0 }
 0x159   :  { %v1848_v62 = vadd.f32 %v1847_v43, %v1846_v38  ;;  %v1849_v45 = vpop.f32.mrb[50].mxu1  ;;  %v1786_v14 = vpop.f32.mrb[51].mxu0 }
 0x15a   :  { %v1585_v47 = vpack.c.bf16 %v1313_v41, %v1312_v40  ;;  %v1179_v49 = vadd.f32 %v1784_v42, %v2368_v17  ;;  %v1787_v50 = vadd.f32 %v1786_v14, %v1785_v44  ;;  %v1850_v16 = vpop.f32.mrb[51].mxu1 }
 0x15b   :  { %v1851_v51 = vadd.f32 %v1850_v16, %v1849_v45 }
 0x15c   :  { %1609 = vst [vmem:[%s2434_s3 + $0x18] sm:$0xff] %v1585_v47   ;;  %v1276_v0 = vadd.f32 %v1848_v62, %v1179_v49  ;;  %v1182_v52 = vadd.f32 %v1787_v50, %v2371_v19 }
 0x15e   :  { %v1279_v54 = vadd.f32 %v1851_v51, %v1182_v52  ;;  %v1788_v56 = vpop.f32.mrb[52].mxu0  ;;  %v1314_v59 = vmax.f32 %v1276_v0, 0.0 }
 0x15f   :  { %v1852_v57 = vpop.f32.mrb[52].mxu1  ;;  %v1789_v58 = vpop.f32.mrb[53].mxu0 }
 0x160   :  { %v1315_v60 = vmax.f32 %v1279_v54, 0.0  ;;  %v1790_v61 = vadd.f32 %v1789_v58, %v1788_v56  ;;  %v1853_v63 = vpop.f32.mrb[53].mxu1  ;;  %v1791_v30 = vpop.f32.mrb[54].mxu0 }
 0x161   :  { %v1854_v17 = vadd.f32 %v1853_v63, %v1852_v57  ;;  %v1855_v1 = vpop.f32.mrb[54].mxu1  ;;  %v1792_v3 = vpop.f32.mrb[55].mxu0 }
 0x162   :  { %v1590_v4 = vpack.c.bf16 %v1315_v60, %v1314_v59  ;;  %v1187_v5 = vadd.f32 %v1790_v61, %v2374_v35  ;;  %v1793_v6 = vadd.f32 %v1792_v3, %v1791_v30  ;;  %v1856_v7 = vpop.f32.mrb[55].mxu1 }
 0x163   :  { %v1857_v9 = vadd.f32 %v1856_v7, %v1855_v1 }
 0x164   :  { %1610 = vst [vmem:[%s2434_s3 + $0x20] sm:$0xff] %v1590_v4   ;;  %v1284_v19 = vadd.f32 %v1854_v17, %v1187_v5  ;;  %v1190_v32 = vadd.f32 %v1793_v6, %v2377_v37 }
 0x166   :  { %v1287_v11 = vadd.f32 %v1857_v9, %v1190_v32  ;;  %v1794_v12 = vpop.f32.mrb[56].mxu0  ;;  %v1316_v18 = vmax.f32 %v1284_v19, 0.0 }
 0x167   :  { %v1858_v13 = vpop.f32.mrb[56].mxu1  ;;  %v1795_v15 = vpop.f32.mrb[57].mxu0 }
 0x168   :  { %v1317_v20 = vmax.f32 %v1287_v11, 0.0  ;;  %v1796_v21 = vadd.f32 %v1795_v15, %v1794_v12  ;;  %v1859_v22 = vpop.f32.mrb[57].mxu1  ;;  %v1797_v23 = vpop.f32.mrb[58].mxu0 }
 0x169   :  { %v1860_v35 = vadd.f32 %v1859_v22, %v1858_v13  ;;  %v1861_v24 = vpop.f32.mrb[58].mxu1  ;;  %v1798_v46 = vpop.f32.mrb[59].mxu0 }
 0x16a   :  { %v1595_v25 = vpack.c.bf16 %v1317_v20, %v1316_v18  ;;  %v1195_v26 = vadd.f32 %v1796_v21, %v2380_v53  ;;  %v1799_v27 = vadd.f32 %v1798_v46, %v1797_v23  ;;  %v1862_v28 = vpop.f32.mrb[59].mxu1 }
 0x16b   :  { %v1863_v29 = vadd.f32 %v1862_v28, %v1861_v24 }
 0x16c   :  { %1611 = vst [vmem:[%s2434_s3 + $0x28] sm:$0xff] %v1595_v25   ;;  %v1292_v37 = vadd.f32 %v1860_v35, %v1195_v26  ;;  %v1198_v2 = vadd.f32 %v1799_v27, %v2383_v55 }
 0x16e   :  { %v1295_v31 = vadd.f32 %v1863_v29, %v1198_v2  ;;  %v1800_v48 = vpop.f32.mrb[60].mxu0  ;;  %v1318_v36 = vmax.f32 %v1292_v37, 0.0 }
 0x16f   :  { %v1864_v33 = vpop.f32.mrb[60].mxu1  ;;  %v1801_v34 = vpop.f32.mrb[61].mxu0 }
 0x170   :  { %v1319_v38 = vmax.f32 %v1295_v31, 0.0  ;;  %v1802_v39 = vadd.f32 %v1801_v34, %v1800_v48  ;;  %v1865_v40 = vpop.f32.mrb[61].mxu1  ;;  %v1803_v41 = vpop.f32.mrb[62].mxu0 }
 0x171   :  { %v1866_v53 = vadd.f32 %v1865_v40, %v1864_v33  ;;  %v1867_v42 = vpop.f32.mrb[62].mxu1  ;;  %v1804_v43 = vpop.f32.mrb[63].mxu0 }
 0x172   :  { %v1600_v44 = vpack.c.bf16 %v1319_v38, %v1318_v36  ;;  %v1203_v62 = vadd.f32 %v1802_v39, %v2386_v8  ;;  %v1805_v45 = vadd.f32 %v1804_v43, %v1803_v41  ;;  %v1868_v14 = vpop.f32.mrb[63].mxu1 }
 0x173   :  { %v1869_v47 = vadd.f32 %v1868_v14, %v1867_v42 }
 0x174   :  { %1612 = vst [vmem:[%s2434_s3 + $0x30] sm:$0xff] %v1600_v44   ;;  %v1300_v55 = vadd.f32 %v1866_v53, %v1203_v62  ;;  %v1206_v49 = vadd.f32 %v1805_v45, %v2389_v10 }
 0x176   :  { %v1303_v50 = vadd.f32 %v1869_v47, %v1206_v49  ;;  %v1320_v16 = vmax.f32 %v1300_v55, 0.0 }
 0x178   :  { %v1321_v51 = vmax.f32 %v1303_v50, 0.0 }
 0x17a   :  { %v1605_v0 = vpack.c.bf16 %v1321_v51, %v1320_v16 }
 0x17c   :  { %1613 = vst [vmem:[%s2434_s3 + $0x38] sm:$0xff] %v1605_v0  }

// kernel: _lambda_.11
= control target key start
LH: loop header
LB: loop body
LE: loop exit
PB: predicated region body
PF: predicated region fallthrough
CT: control target
= control target key end

     0   :  { %10 = vsyncpa [#allocation3], 0  ;;  %s340_s0 = inlined_call_operand.vmem [shape: bf16[2,64], index: 0, kind: input, shape index: {}]   ;;  %s341_s1 = inlined_call_operand.vmem [shape: f32[64,10], index: 1, kind: input, shape index: {}]   ;;  %s342_s2 = inlined_call_operand.vmem [shape: f32[1,10], index: 2, kind: input, shape index: {}]   ;;  %s343_s3 = inlined_call_operand.hbm [shape: f32[2,64], index: 3, kind: output, shape index: {0}]   ;;  %s344_s4 = inlined_call_operand.hbm [shape: f32[2,10], index: 4, kind: output, shape index: {1}]  }
   0x1   :  { %v18_v0 = vld [vmem:[%s340_s0] sm:$0x1] }
   0x2   :  { %11 = vsyncpa [#allocation5], 0  ;;  %v19_v1 = vunpack.c.l.bf16 %v18_v0  ;;  %vm21_vm0 = vcmask 517120   ;;  %v29_v4 = vld [vmem:[%s341_s1] sm:$0xff]  ;;  %v30_v5 = vld [vmem:[%s341_s1 + $0x8] sm:$0xff]  ;;  %v254_v7 = vmov 0.0|0.0  }
   0x3   :  { %v184_v6 = vpack.c.bf16 %v30_v5, %v29_v4  ;;  %183 = vmatprep.subr.bf16.mxu0 %v254_v7  ;;  %v31_v8 = vld [vmem:[%s341_s1 + $0x10] sm:$0xff]  ;;  %v32_v9 = vld [vmem:[%s341_s1 + $0x18] sm:$0xff]  ;;  %v33_v11 = vld [vmem:[%s341_s1 + $0x20] sm:$0xff]  ;;  %vm255_vm1 = vmmov 0   ;;  %v256_v13 = vmov 0.0   ;;  %vm44_vm2 = vcmask 523264  }
   0x4   :  { %v20_v2 = vmul.f32 %v19_v1, %v19_v1  ;;  %v187_v10 = vpack.c.bf16 %v32_v9, %v31_v8  ;;  %v34_v12 = vld [vmem:[%s341_s1 + $0x28] sm:$0xff]  ;;  %180 = vmatprep.mubr.msk.f32.mxu0 %vm255_vm1, %v256_v13  ;;  %v35_v15 = vld [vmem:[%s341_s1 + $0x30] sm:$0xff]  ;;  %v36_v16 = vld [vmem:[%s341_s1 + $0x38] sm:$0xff]  ;;  %s257_s6 = smov [#allocation2]  }
   0x5   :  { %185 = vmatpush3.bf16.msra.mxu0 %v184_v6  ;;  %v190_v14 = vpack.c.bf16 %v34_v12, %v33_v11  ;;  %v193_v17 = vpack.c.bf16 %v36_v16, %v35_v15  ;;  %s131_s7 = sshll.u32 %s257_s6, 4  ;;  %s132_s7 = int_to_ptr.vmem [resolvable:$true] %s131_s7 }
   0x6   :  { %v22_v3 = vsel %vm21_vm0, %v20_v2, 0.0  ;;  %186 = vmatprep.subr.bf16.mxu0 %v254_v7  ;;  %s206_s8 = scalar_lea.vmem %s132_s7, 32  ;;  %p211_p1 = scmp.lt.s32.totalorder %s132_s7, %s132_s7 }
   0x7   :  { %23 = vadd.xlane.f32.xlu0 %v22_v3  ;;  %p207_p0 = scmp.ne.s32.totalorder %s132_s7, %s206_s8  ;;  %p212_p2 = scmp.lt.s32.totalorder %s206_s8, %s206_s8 }
   0x9   :  { %188 = vmatpush3.bf16.msra.mxu0 %v187_v10  ;;  %p213_p3 = por %p212_p2, %p211_p1 }
   0xa   :  { %189 = vmatprep.subr.bf16.mxu0 %v254_v7 }
   0xb   :  { %p214_p4 = pnand %p213_p3, %p207_p0 }
   0xd   :  { %191 = vmatpush3.bf16.msra.mxu0 %v190_v14 }
   0xe   :  { %192 = vmatprep.subr.bf16.mxu0 %v254_v7 }
  0x11   :  { %194 = vmatpush3.bf16.msra.mxu0 %v193_v17 }
  0x94   :  { %v24_v18 = vpop.xlane.xlu0 %23 }
  0x95   :  { %v25_v19 = vadd.f32 1e-10, %v24_v18 }
  0x97   :  { %200 = vrsqrt.f32 %v25_v19 }
  0xa1   :  { %v201_v20 = vpop.eup %200 }
  0xa2   :  { %v27_v21 = vmul.f32 %v201_v20, %v19_v1 }
  0xa4   :  { %181 = vmatmul.mubr.msk.f32.vlgmr.msra.gmra.mrb[0].mxu0 %vm44_vm2, %v27_v21  ;;  %28 = vst.msk [vmem:[#allocation2] sm:$0x3] %vm21_vm0, %v27_v21 }
  0xa5   :  { %217 = shalt.err (!%p214_p4)
}
  0xa6   :  { %s218_s10 = scalar_lea.hbm %s343_s3, 32 }
  0xa7   :  { %p219_p5 = scmp.ne.s32.totalorder %s343_s3, %s218_s10  ;;  %p222_p6 = scmp.lt.u32.totalorder %s218_s10, %s343_s3 }
  0xa9   :  { %p224_p7 = pnand %p222_p6, %p219_p5 }
  0xab   :  { %227 = shalt.err (!%p224_p7)
}
  0xac   :  { %134 = dma.vmem_to_hbm [thread:$0]  %s132_s7, 32, %s343_s3, [#allocation3]   ;;  %v153_v22 = vld [vmem:[%s342_s2] ss:$0 sm:$0xff]  ;;  %vm123_vm3 = vcmask 74752  }
  0xad   :  { %s258_s19 = smov [#allocation4]  }
  0xae   :  { %s141_s20 = sshll.u32 %s258_s19, 4  ;;  %s142_s20 = int_to_ptr.vmem [resolvable:$true] %s141_s20 }
  0xaf   :  { %s228_s3 = scalar_lea.vmem %s142_s20, 32  ;;  %p233_p9 = scmp.lt.s32.totalorder %s142_s20, %s142_s20 }
  0xb0   :  { %p229_p8 = scmp.ne.s32.totalorder %s142_s20, %s228_s3  ;;  %p234_p10 = scmp.lt.s32.totalorder %s228_s3, %s228_s3 }
  0xb2   :  { %p235_p11 = por %p234_p10, %p233_p9 }
  0xb4   :  { %p236_p12 = pnand %p235_p11, %p229_p8 }
 0x177   :  { %v114_v23 = vpop.f32.mrb[0].mxu0 }
 0x178   :  { %v115_v24 = vadd.f32 %v153_v22, %v114_v23  ;;  %v182_v25 = vpop.f32.mrb[1].mxu0 }
 0x17a   :  { %v118_v26 = vsub.f32 0.0, %v115_v24 }
 0x17c   :  { %v119_v27 = vmul.f32 1.442695, %v118_v26 }
 0x17e   :  { %202 = vpow2.f32 %v119_v27 }
 0x188   :  { %v203_v28 = vpop.eup %202 }
 0x189   :  { %v121_v29 = vadd.f32 1.0, %v203_v28 }
 0x18b   :  { %204 = vrcp.f32 %v121_v29 }
 0x195   :  { %v205_v30 = vpop.eup %204 }
 0x196   :  { %124 = vst.msk [vmem:[#allocation4] sm:$0x3] %vm123_vm3, %v205_v30 }
 0x197   :  { %239 = shalt.err (!%p236_p12)
}
 0x198   :  { %s240_s21 = scalar_lea.hbm %s344_s4, 32 }
 0x199   :  { %p241_p13 = scmp.ne.s32.totalorder %s344_s4, %s240_s21  ;;  %p244_p0 = scmp.lt.u32.totalorder %s240_s21, %s344_s4 }
 0x19b   :  { %p246_p1 = pnand %p244_p0, %p241_p13 }
 0x19d   :  { %249 = shalt.err (!%p246_p1)
}
 0x19e   :  { %144 = dma.vmem_to_hbm [thread:$0]  %s142_s20, 32, %s344_s4, [#allocation5]  }
 0x19f   :  { %250 = dma.done.wait [#allocation3], 32  }
 0x1a0   :  { %251 = vsyncadd [#allocation3], 4294967264 }
 0x1a1   :  { %252 = dma.done.wait [#allocation5], 32  }
 0x1a2   :  { %253 = vsyncadd [#allocation5], 4294967264 }
 0x1a3   :  { %151 = vsyncpa [#allocation3], 1 }
 0x1a4   :  { %152 = vsyncpa [#allocation5], 1 }

// kernel: _lambda_.9
= control target key start
LH: loop header
LB: loop body
LE: loop exit
PB: predicated region body
PF: predicated region fallthrough
CT: control target
= control target key end

     0   :  { %s2699_s1 = inlined_call_operand.vmem [shape: bf16[2048,128], index: 1, kind: input, shape index: {}]   ;;  %s2700_s0 = inlined_call_operand.vmem [shape: bf16[32,2048], index: 0, kind: input, shape index: {}]   ;;  %s2701_s2 = inlined_call_operand.vmem [shape: f32[1,128], index: 2, kind: input, shape index: {}]   ;;  %s2702_s3 = inlined_call_operand.vmem [shape: bf16[32,128], index: 3, kind: output, shape index: {}]  }
   0x1   :  { %v2062_v0 = vld [vmem:[%s2699_s1 + $0x40] sm:$0xff]   ;;  %v2066_v4 = vld [vmem:[%s2699_s1 + $0x48] sm:$0xff]   ;;  %v2070_v8 = vld [vmem:[%s2699_s1 + $0x50] sm:$0xff]  }
   0x2   :  { %v2063_v1 = vld [vmem:[%s2699_s1 + $0xc0] sm:$0xff]   ;;  %1838 = vmatprep.subr.bf16.mxu0 %v2062_v0  ;;  %v2067_v5 = vld [vmem:[%s2699_s1 + $0xc8] sm:$0xff]   ;;  %v2071_v9 = vld [vmem:[%s2699_s1 + $0xd0] sm:$0xff]  }
   0x3   :  { %v2064_v2 = vld [vmem:[%s2699_s1] sm:$0xff]   ;;  %1866 = vmatprep.subr.bf16.mxu1 %v2063_v1  ;;  %v2068_v6 = vld [vmem:[%s2699_s1 + $0x8] sm:$0xff]   ;;  %v2072_v10 = vld [vmem:[%s2699_s1 + $0x10] sm:$0xff]  }
   0x4   :  { %v2065_v3 = vld [vmem:[%s2699_s1 + $0x80] sm:$0xff]   ;;  %1839 = vmatpush3.bf16.msra.mxu0 %v2064_v2  ;;  %v2069_v7 = vld [vmem:[%s2699_s1 + $0x88] sm:$0xff]   ;;  %v2073_v11 = vld [vmem:[%s2699_s1 + $0x90] sm:$0xff]  }
   0x5   :  { %1867 = vmatpush3.bf16.msra.mxu1 %v2065_v3  ;;  %1840 = vmatprep.subr.bf16.mxu0 %v2066_v4  ;;  %v2074_v12 = vld [vmem:[%s2699_s1 + $0x58] sm:$0xff]   ;;  %v2078_v16 = vld [vmem:[%s2699_s1 + $0x60] sm:$0xff]   ;;  %v2082_v20 = vld [vmem:[%s2699_s1 + $0x68] sm:$0xff]  }
   0x6   :  { %1868 = vmatprep.subr.bf16.mxu1 %v2067_v5  ;;  %v2075_v13 = vld [vmem:[%s2699_s1 + $0xd8] sm:$0xff]   ;;  %v2079_v17 = vld [vmem:[%s2699_s1 + $0xe0] sm:$0xff]   ;;  %v2083_v21 = vld [vmem:[%s2699_s1 + $0xe8] sm:$0xff]  }
   0x7   :  { %v2076_v14 = vld [vmem:[%s2699_s1 + $0x18] sm:$0xff]   ;;  %v2080_v18 = vld [vmem:[%s2699_s1 + $0x20] sm:$0xff]   ;;  %v2084_v22 = vld [vmem:[%s2699_s1 + $0x28] sm:$0xff]  }
   0x8   :  { %1841 = vmatpush3.bf16.msra.mxu0 %v2068_v6  ;;  %v2077_v15 = vld [vmem:[%s2699_s1 + $0x98] sm:$0xff]   ;;  %v2081_v19 = vld [vmem:[%s2699_s1 + $0xa0] sm:$0xff]   ;;  %v2085_v23 = vld [vmem:[%s2699_s1 + $0xa8] sm:$0xff]  }
   0x9   :  { %1869 = vmatpush3.bf16.msra.mxu1 %v2069_v7  ;;  %1842 = vmatprep.subr.bf16.mxu0 %v2070_v8  ;;  %v2086_v24 = vld [vmem:[%s2699_s1 + $0x70] sm:$0xff]   ;;  %v2090_v28 = vld [vmem:[%s2699_s1 + $0x78] sm:$0xff]   ;;  %v15_v32 = vld [vmem:[%s2700_s0] sm:$0xff] }
   0xa   :  { %1870 = vmatprep.subr.bf16.mxu1 %v2071_v9  ;;  %v2087_v25 = vld [vmem:[%s2699_s1 + $0xf0] sm:$0xff]   ;;  %v2091_v29 = vld [vmem:[%s2699_s1 + $0xf8] sm:$0xff]   ;;  %v23_v33 = vld [vmem:[%s2700_s0 + $0x40] sm:$0xff] }
   0xb   :  { %v2088_v26 = vld [vmem:[%s2699_s1 + $0x30] sm:$0xff]   ;;  %v2092_v30 = vld [vmem:[%s2699_s1 + $0x38] sm:$0xff]   ;;  %v16_v34 = vld [vmem:[%s2700_s0 + $0x8] sm:$0xff]  ;;  %v1659_v35 = vcombine.low %v15_v32, %v23_v33  ;;  %v1660_v36 = vcombine.high %v15_v32, %v23_v33 }
   0xc   :  { %1843 = vmatpush3.bf16.msra.mxu0 %v2072_v10  ;;  %v2089_v27 = vld [vmem:[%s2699_s1 + $0xb0] sm:$0xff]   ;;  %v2093_v31 = vld [vmem:[%s2699_s1 + $0xb8] sm:$0xff]   ;;  %v24_v37 = vld [vmem:[%s2700_s0 + $0x48] sm:$0xff] }
   0xd   :  { %1871 = vmatpush3.bf16.msra.mxu1 %v2073_v11  ;;  %1844 = vmatprep.subr.bf16.mxu0 %v2074_v12  ;;  %v1661_v38 = vcombine.low %v16_v34, %v24_v37  ;;  %v1662_v39 = vcombine.high %v16_v34, %v24_v37  ;;  %v2094_v40 = vld [vmem:[%s2699_s1 + $0x140] sm:$0xff]   ;;  %v2098_v44 = vld [vmem:[%s2699_s1 + $0x148] sm:$0xff]   ;;  %v2102_v48 = vld [vmem:[%s2699_s1 + $0x150] sm:$0xff]  }
   0xe   :  { %1872 = vmatprep.subr.bf16.mxu1 %v2075_v13  ;;  %1270 = vmatprep.mubr.bf16.mxu0 %v1660_v36  ;;  %v2095_v41 = vld [vmem:[%s2699_s1 + $0x1c0] sm:$0xff]   ;;  %v2099_v45 = vld [vmem:[%s2699_s1 + $0x1c8] sm:$0xff]   ;;  %v2103_v49 = vld [vmem:[%s2699_s1 + $0x1d0] sm:$0xff]  }
   0xf   :  { %1319 = vmatprep.mubr.bf16.mxu1 %v1662_v39  ;;  %v2096_v42 = vld [vmem:[%s2699_s1 + $0x100] sm:$0xff]   ;;  %v2100_v46 = vld [vmem:[%s2699_s1 + $0x108] sm:$0xff]   ;;  %v2104_v50 = vld [vmem:[%s2699_s1 + $0x110] sm:$0xff]  }
  0x10   :  { %1845 = vmatpush3.bf16.msra.mxu0 %v2076_v14  ;;  %v2097_v43 = vld [vmem:[%s2699_s1 + $0x180] sm:$0xff]   ;;  %v2101_v47 = vld [vmem:[%s2699_s1 + $0x188] sm:$0xff]   ;;  %v2105_v51 = vld [vmem:[%s2699_s1 + $0x190] sm:$0xff]  }
  0x11   :  { %1873 = vmatpush3.bf16.msra.mxu1 %v2077_v15  ;;  %1846 = vmatprep.subr.bf16.mxu0 %v2078_v16  ;;  %v2106_v52 = vld [vmem:[%s2699_s1 + $0x158] sm:$0xff]   ;;  %v2110_v56 = vld [vmem:[%s2699_s1 + $0x160] sm:$0xff]   ;;  %v2114_v60 = vld [vmem:[%s2699_s1 + $0x168] sm:$0xff]  }
  0x12   :  { %1874 = vmatprep.subr.bf16.mxu1 %v2079_v17  ;;  %v2107_v53 = vld [vmem:[%s2699_s1 + $0x1d8] sm:$0xff]   ;;  %v2111_v57 = vld [vmem:[%s2699_s1 + $0x1e0] sm:$0xff]   ;;  %v2115_v61 = vld [vmem:[%s2699_s1 + $0x1e8] sm:$0xff]  }
  0x13   :  { %v2108_v54 = vld [vmem:[%s2699_s1 + $0x118] sm:$0xff]   ;;  %v2112_v58 = vld [vmem:[%s2699_s1 + $0x120] sm:$0xff]   ;;  %v2116_v1 = vld [vmem:[%s2699_s1 + $0x128] sm:$0xff]  }
  0x14   :  { %1847 = vmatpush3.bf16.msra.mxu0 %v2080_v18  ;;  %v2109_v55 = vld [vmem:[%s2699_s1 + $0x198] sm:$0xff]   ;;  %v2113_v59 = vld [vmem:[%s2699_s1 + $0x1a0] sm:$0xff]   ;;  %v2117_v3 = vld [vmem:[%s2699_s1 + $0x1a8] sm:$0xff]  }
  0x15   :  { %1875 = vmatpush3.bf16.msra.mxu1 %v2081_v19  ;;  %1848 = vmatprep.subr.bf16.mxu0 %v2082_v20  ;;  %v31_v62 = vld [vmem:[%s2700_s0 + $0x80] sm:$0xff]  ;;  %v32_v4 = vld [vmem:[%s2700_s0 + $0x88] sm:$0xff]  ;;  %v2118_v8 = vld [vmem:[%s2699_s1 + $0x170] sm:$0xff]  }
  0x16   :  { %1876 = vmatprep.subr.bf16.mxu1 %v2083_v21  ;;  %v39_v63 = vld [vmem:[%s2700_s0 + $0xc0] sm:$0xff]  ;;  %v40_v5 = vld [vmem:[%s2700_s0 + $0xc8] sm:$0xff]  ;;  %v2119_v9 = vld [vmem:[%s2699_s1 + $0x1f0] sm:$0xff]  }
  0x17   :  { %v1676_v0 = vcombine.high %v31_v62, %v39_v63  ;;  %v1675_v2 = vcombine.low %v31_v62, %v39_v63  ;;  %v1678_v6 = vcombine.high %v32_v4, %v40_v5  ;;  %v1677_v7 = vcombine.low %v32_v4, %v40_v5  ;;  %v2120_v10 = vld [vmem:[%s2699_s1 + $0x130] sm:$0xff]   ;;  %v2122_v12 = vld [vmem:[%s2699_s1 + $0x178] sm:$0xff]   ;;  %v20_v4 = vld [vmem:[%s2700_s0 + $0x28] sm:$0xff] }
  0x18   :  { %1849 = vmatpush3.bf16.msra.mxu0 %v2084_v22  ;;  %v2121_v11 = vld [vmem:[%s2699_s1 + $0x1b0] sm:$0xff]   ;;  %v2123_v13 = vld [vmem:[%s2699_s1 + $0x1f8] sm:$0xff]   ;;  %v28_v5 = vld [vmem:[%s2700_s0 + $0x68] sm:$0xff] }
  0x19   :  { %1877 = vmatpush3.bf16.msra.mxu1 %v2085_v23  ;;  %1850 = vmatprep.subr.bf16.mxu0 %v2086_v24  ;;  %v2124_v14 = vld [vmem:[%s2699_s1 + $0x138] sm:$0xff]   ;;  %v17_v16 = vld [vmem:[%s2700_s0 + $0x10] sm:$0xff]  ;;  %v2126_v24 = vld [vmem:[%s2699_s1 + $0x240] sm:$0xff]  }
  0x1a   :  { %1878 = vmatprep.subr.bf16.mxu1 %v2087_v25  ;;  %v2125_v15 = vld [vmem:[%s2699_s1 + $0x1b8] sm:$0xff]   ;;  %v25_v17 = vld [vmem:[%s2700_s0 + $0x50] sm:$0xff]  ;;  %v2127_v25 = vld [vmem:[%s2699_s1 + $0x2c0] sm:$0xff]  }
  0x1b   :  { %v18_v18 = vld [vmem:[%s2700_s0 + $0x18] sm:$0xff]  ;;  %v1663_v20 = vcombine.low %v17_v16, %v25_v17  ;;  %v1664_v21 = vcombine.high %v17_v16, %v25_v17  ;;  %v33_v32 = vld [vmem:[%s2700_s0 + $0x90] sm:$0xff]  ;;  %v35_v16 = vld [vmem:[%s2700_s0 + $0xa0] sm:$0xff] }
  0x1c   :  { %1851 = vmatpush3.bf16.msra.mxu0 %v2088_v26  ;;  %v26_v19 = vld [vmem:[%s2700_s0 + $0x58] sm:$0xff]  ;;  %v2128_v26 = vld [vmem:[%s2699_s1 + $0x200] sm:$0xff]   ;;  %v41_v33 = vld [vmem:[%s2700_s0 + $0xd0] sm:$0xff] }
  0x1d   :  { %1879 = vmatpush3.bf16.msra.mxu1 %v2089_v27  ;;  %1852 = vmatprep.subr.bf16.mxu0 %v2090_v28  ;;  %v1665_v22 = vcombine.low %v18_v18, %v26_v19  ;;  %v1666_v23 = vcombine.high %v18_v18, %v26_v19  ;;  %v2129_v27 = vld [vmem:[%s2699_s1 + $0x280] sm:$0xff]   ;;  %v2130_v28 = vld [vmem:[%s2699_s1 + $0x248] sm:$0xff]   ;;  %v1680_v34 = vcombine.high %v33_v32, %v41_v33  ;;  %v2134_v36 = vld [vmem:[%s2699_s1 + $0x250] sm:$0xff]  }
  0x1e   :  { %1880 = vmatprep.subr.bf16.mxu1 %v2091_v29  ;;  %v2131_v29 = vld [vmem:[%s2699_s1 + $0x2c8] sm:$0xff]   ;;  %v2135_v37 = vld [vmem:[%s2699_s1 + $0x2d0] sm:$0xff]   ;;  %v42_v39 = vld [vmem:[%s2700_s0 + $0xd8] sm:$0xff] }
  0x1f   :  { %v2156_v62 = vld [vmem:[%s2699_s1 + $0x238] sm:$0xff]   ;;  %v43_v17 = vld [vmem:[%s2700_s0 + $0xe0] sm:$0xff] }
  0x20   :  { %1853 = vmatpush3.bf16.msra.mxu0 %v2092_v30  ;;  %v2132_v30 = vld [vmem:[%s2699_s1 + $0x208] sm:$0xff]   ;;  %v2157_v63 = vld [vmem:[%s2699_s1 + $0x2b8] sm:$0xff]   ;;  %v1684_v18 = vcombine.high %v35_v16, %v43_v17  ;;  %v1683_v19 = vcombine.low %v35_v16, %v43_v17 }
  0x21   :  { %1881 = vmatpush3.bf16.msra.mxu1 %v2093_v31  ;;  %1894 = vmatprep.subr.bf16.mxu0 %v2094_v40  ;;  %v2133_v31 = vld [vmem:[%s2699_s1 + $0x288] sm:$0xff]  }
  0x22   :  { %1922 = vmatprep.subr.bf16.mxu1 %v2095_v41  ;;  %v2136_v41 = vld [vmem:[%s2699_s1 + $0x210] sm:$0xff]  }
  0x23   :  { %1271 = vmatmul.mubr.bf16.vlgmr.msra.gmra.mrb[0].mxu0 %v1659_v35  ;;  %v1679_v35 = vcombine.low %v33_v32, %v41_v33  ;;  %v2174_v32 = vld [vmem:[%s2699_s1 + $0x360] sm:$0xff]  }
  0x24   :  { %1320 = vmatmul.mubr.bf16.vlgmr.msra.gmra.mrb[0].mxu1 %v1661_v38  ;;  %1895 = vmatpush3.bf16.msra.mxu0 %v2096_v42  ;;  %v34_v38 = vld [vmem:[%s2700_s0 + $0x98] sm:$0xff]  ;;  %v2175_v33 = vld [vmem:[%s2699_s1 + $0x3e0] sm:$0xff]  }
  0x25   :  { %1923 = vmatpush3.bf16.msra.mxu1 %v2097_v43  ;;  %1896 = vmatprep.subr.bf16.mxu0 %v2098_v44  ;;  %v1682_v40 = vcombine.high %v34_v38, %v42_v39  ;;  %v1681_v42 = vcombine.low %v34_v38, %v42_v39  ;;  %v2137_v43 = vld [vmem:[%s2699_s1 + $0x290] sm:$0xff]   ;;  %v2138_v44 = vld [vmem:[%s2699_s1 + $0x258] sm:$0xff]   ;;  %v2180_v38 = vld [vmem:[%s2699_s1 + $0x328] sm:$0xff]  }
  0x26   :  { %1924 = vmatprep.subr.bf16.mxu1 %v2099_v45  ;;  %1278 = vmatprep.mubr.bf16.mxu0 %v1676_v0  ;;  %v2139_v45 = vld [vmem:[%s2699_s1 + $0x2d8] sm:$0xff]   ;;  %v19_v0 = vld [vmem:[%s2700_s0 + $0x20] sm:$0xff]  ;;  %v2181_v39 = vld [vmem:[%s2699_s1 + $0x3a8] sm:$0xff]  }
  0x27   :  { %1327 = vmatprep.mubr.bf16.mxu1 %v1678_v6  ;;  %v1669_v6 = vcombine.low %v20_v4, %v28_v5 }
  0x28   :  { %1897 = vmatpush3.bf16.msra.mxu0 %v2100_v46  ;;  %v2140_v46 = vld [vmem:[%s2699_s1 + $0x218] sm:$0xff]  }
  0x29   :  { %1925 = vmatpush3.bf16.msra.mxu1 %v2101_v47  ;;  %1898 = vmatprep.subr.bf16.mxu0 %v2102_v48  ;;  %v2141_v47 = vld [vmem:[%s2699_s1 + $0x298] sm:$0xff]   ;;  %v2142_v48 = vld [vmem:[%s2699_s1 + $0x260] sm:$0xff]  }
  0x2a   :  { %1926 = vmatprep.subr.bf16.mxu1 %v2103_v49  ;;  %v2143_v49 = vld [vmem:[%s2699_s1 + $0x2e0] sm:$0xff]  }
  0x2b   :  { %1279 = vmatmul.mubr.bf16.gmra.mrb[4].mxu0 %v1675_v2 }
  0x2c   :  { %1899 = vmatpush3.bf16.msra.mxu0 %v2104_v50  ;;  %1328 = vmatmul.mubr.bf16.gmra.mrb[4].mxu1 %v1677_v7  ;;  %v2144_v50 = vld [vmem:[%s2699_s1 + $0x220] sm:$0xff]   ;;  %v1670_v7 = vcombine.high %v20_v4, %v28_v5 }
  0x2d   :  { %1927 = vmatpush3.bf16.msra.mxu1 %v2105_v51  ;;  %1900 = vmatprep.subr.bf16.mxu0 %v2106_v52  ;;  %v2145_v51 = vld [vmem:[%s2699_s1 + $0x2a0] sm:$0xff]   ;;  %v2146_v52 = vld [vmem:[%s2699_s1 + $0x268] sm:$0xff]  }
  0x2e   :  { %1928 = vmatprep.subr.bf16.mxu1 %v2107_v53  ;;  %1368 = vmatprep.mubr.bf16.mxu0 %v1664_v21  ;;  %v2147_v53 = vld [vmem:[%s2699_s1 + $0x2e8] sm:$0xff]   ;;  %v2167_v21 = vld [vmem:[%s2699_s1 + $0x3d0] sm:$0xff]  }
  0x2f   :  { %1417 = vmatprep.mubr.bf16.mxu1 %v1666_v23  ;;  %v44_v23 = vld [vmem:[%s2700_s0 + $0xe8] sm:$0xff] }
  0x30   :  { %1901 = vmatpush3.bf16.msra.mxu0 %v2108_v54  ;;  %v2148_v54 = vld [vmem:[%s2699_s1 + $0x228] sm:$0xff]  }
  0x31   :  { %1929 = vmatpush3.bf16.msra.mxu1 %v2109_v55  ;;  %1902 = vmatprep.subr.bf16.mxu0 %v2110_v56  ;;  %v2149_v55 = vld [vmem:[%s2699_s1 + $0x2a8] sm:$0xff]   ;;  %v2150_v56 = vld [vmem:[%s2699_s1 + $0x270] sm:$0xff]  }
  0x32   :  { %1930 = vmatprep.subr.bf16.mxu1 %v2111_v57  ;;  %v2151_v57 = vld [vmem:[%s2699_s1 + $0x2f0] sm:$0xff]  }
  0x34   :  { %1903 = vmatpush3.bf16.msra.mxu0 %v2112_v58  ;;  %v2152_v58 = vld [vmem:[%s2699_s1 + $0x230] sm:$0xff]  }
  0x35   :  { %1931 = vmatpush3.bf16.msra.mxu1 %v2113_v59  ;;  %1904 = vmatprep.subr.bf16.mxu0 %v2114_v60  ;;  %v2153_v59 = vld [vmem:[%s2699_s1 + $0x2b0] sm:$0xff]   ;;  %v2154_v60 = vld [vmem:[%s2699_s1 + $0x278] sm:$0xff]  }
  0x36   :  { %1932 = vmatprep.subr.bf16.mxu1 %v2115_v61  ;;  %v2155_v61 = vld [vmem:[%s2699_s1 + $0x2f8] sm:$0xff]  }
  0x38   :  { %1905 = vmatpush3.bf16.msra.mxu0 %v2116_v1  ;;  %v27_v1 = vld [vmem:[%s2700_s0 + $0x60] sm:$0xff] }
  0x39   :  { %1933 = vmatpush3.bf16.msra.mxu1 %v2117_v3  ;;  %1906 = vmatprep.subr.bf16.mxu0 %v2118_v8  ;;  %v1667_v2 = vcombine.low %v19_v0, %v27_v1  ;;  %v1668_v3 = vcombine.high %v19_v0, %v27_v1  ;;  %v2158_v8 = vld [vmem:[%s2699_s1 + $0x340] sm:$0xff]  }
  0x3a   :  { %1934 = vmatprep.subr.bf16.mxu1 %v2119_v9  ;;  %v2159_v9 = vld [vmem:[%s2699_s1 + $0x3c0] sm:$0xff]  }
  0x3c   :  { %1907 = vmatpush3.bf16.msra.mxu0 %v2120_v10  ;;  %v2160_v10 = vld [vmem:[%s2699_s1 + $0x300] sm:$0xff]  }
  0x3d   :  { %1935 = vmatpush3.bf16.msra.mxu1 %v2121_v11  ;;  %1908 = vmatprep.subr.bf16.mxu0 %v2122_v12  ;;  %v2161_v11 = vld [vmem:[%s2699_s1 + $0x380] sm:$0xff]   ;;  %v2162_v12 = vld [vmem:[%s2699_s1 + $0x348] sm:$0xff]  }
  0x3e   :  { %1936 = vmatprep.subr.bf16.mxu1 %v2123_v13  ;;  %v2163_v13 = vld [vmem:[%s2699_s1 + $0x3c8] sm:$0xff]  }
  0x40   :  { %1909 = vmatpush3.bf16.msra.mxu0 %v2124_v14  ;;  %v2164_v14 = vld [vmem:[%s2699_s1 + $0x308] sm:$0xff]  }
  0x41   :  { %1937 = vmatpush3.bf16.msra.mxu1 %v2125_v15  ;;  %1950 = vmatprep.subr.bf16.mxu0 %v2126_v24  ;;  %v2165_v15 = vld [vmem:[%s2699_s1 + $0x388] sm:$0xff]  }
  0x42   :  { %1978 = vmatprep.subr.bf16.mxu1 %v2127_v25  ;;  %v2168_v25 = vld [vmem:[%s2699_s1 + $0x310] sm:$0xff]  }
  0x43   :  { %1369 = vmatmul.mubr.bf16.vlgmr.msra.gmra.mrb[8].mxu0 %v1663_v20  ;;  %v2166_v20 = vld [vmem:[%s2699_s1 + $0x350] sm:$0xff]  }
  0x44   :  { %1418 = vmatmul.mubr.bf16.vlgmr.msra.gmra.mrb[8].mxu1 %v1665_v22  ;;  %1951 = vmatpush3.bf16.msra.mxu0 %v2128_v26  ;;  %v36_v22 = vld [vmem:[%s2700_s0 + $0xa8] sm:$0xff] }
  0x45   :  { %1979 = vmatpush3.bf16.msra.mxu1 %v2129_v27  ;;  %1952 = vmatprep.subr.bf16.mxu0 %v2130_v28  ;;  %v1686_v24 = vcombine.high %v36_v22, %v44_v23  ;;  %v1685_v26 = vcombine.low %v36_v22, %v44_v23  ;;  %v2169_v27 = vld [vmem:[%s2699_s1 + $0x390] sm:$0xff]   ;;  %v2170_v28 = vld [vmem:[%s2699_s1 + $0x358] sm:$0xff]  }
  0x46   :  { %1980 = vmatprep.subr.bf16.mxu1 %v2131_v29  ;;  %1376 = vmatprep.mubr.bf16.mxu0 %v1680_v34  ;;  %v2171_v29 = vld [vmem:[%s2699_s1 + $0x3d8] sm:$0xff]   ;;  %v2176_v34 = vld [vmem:[%s2699_s1 + $0x320] sm:$0xff]  }
  0x47   :  { %1425 = vmatprep.mubr.bf16.mxu1 %v1682_v40  ;;  %v2182_v40 = vld [vmem:[%s2699_s1 + $0x370] sm:$0xff]  }
  0x48   :  { %1953 = vmatpush3.bf16.msra.mxu0 %v2132_v30  ;;  %v2172_v30 = vld [vmem:[%s2699_s1 + $0x318] sm:$0xff]  }
  0x49   :  { %1981 = vmatpush3.bf16.msra.mxu1 %v2133_v31  ;;  %1954 = vmatprep.subr.bf16.mxu0 %v2134_v36  ;;  %v2173_v31 = vld [vmem:[%s2699_s1 + $0x398] sm:$0xff]   ;;  %v2178_v36 = vld [vmem:[%s2699_s1 + $0x368] sm:$0xff]  }
  0x4a   :  { %1982 = vmatprep.subr.bf16.mxu1 %v2135_v37  ;;  %v2179_v37 = vld [vmem:[%s2699_s1 + $0x3e8] sm:$0xff]  }
  0x4b   :  { %1377 = vmatmul.mubr.bf16.gmra.mrb[12].mxu0 %v1679_v35  ;;  %v2177_v35 = vld [vmem:[%s2699_s1 + $0x3a0] sm:$0xff]  }
  0x4c   :  { %1955 = vmatpush3.bf16.msra.mxu0 %v2136_v41  ;;  %1426 = vmatmul.mubr.bf16.gmra.mrb[12].mxu1 %v1681_v42  ;;  %v2183_v41 = vld [vmem:[%s2699_s1 + $0x3f0] sm:$0xff]  }
  0x4d   :  { %1983 = vmatpush3.bf16.msra.mxu1 %v2137_v43  ;;  %1956 = vmatprep.subr.bf16.mxu0 %v2138_v44  ;;  %v2184_v42 = vld [vmem:[%s2699_s1 + $0x330] sm:$0xff]   ;;  %v2186_v44 = vld [vmem:[%s2699_s1 + $0x378] sm:$0xff]  }
  0x4e   :  { %1984 = vmatprep.subr.bf16.mxu1 %v2139_v45  ;;  %1466 = vmatprep.mubr.bf16.mxu0 %v1668_v3  ;;  %v2185_v43 = vld [vmem:[%s2699_s1 + $0x3b0] sm:$0xff]   ;;  %v2187_v45 = vld [vmem:[%s2699_s1 + $0x3f8] sm:$0xff]  }
  0x4f   :  { %1515 = vmatprep.mubr.bf16.mxu1 %v1670_v7 }
  0x50   :  { %1957 = vmatpush3.bf16.msra.mxu0 %v2140_v46  ;;  %v2188_v46 = vld [vmem:[%s2699_s1 + $0x338] sm:$0xff]  }
  0x51   :  { %1985 = vmatpush3.bf16.msra.mxu1 %v2141_v47  ;;  %1958 = vmatprep.subr.bf16.mxu0 %v2142_v48  ;;  %v2189_v47 = vld [vmem:[%s2699_s1 + $0x3b8] sm:$0xff]   ;;  %v21_v48 = vld [vmem:[%s2700_s0 + $0x30] sm:$0xff] }
  0x52   :  { %1986 = vmatprep.subr.bf16.mxu1 %v2143_v49  ;;  %v29_v49 = vld [vmem:[%s2700_s0 + $0x70] sm:$0xff] }
  0x54   :  { %1959 = vmatpush3.bf16.msra.mxu0 %v2144_v50  ;;  %v22_v50 = vld [vmem:[%s2700_s0 + $0x38] sm:$0xff] }
  0x55   :  { %1987 = vmatpush3.bf16.msra.mxu1 %v2145_v51  ;;  %1960 = vmatprep.subr.bf16.mxu0 %v2146_v52  ;;  %v1671_v51 = vcombine.low %v21_v48, %v29_v49  ;;  %v1672_v52 = vcombine.high %v21_v48, %v29_v49 }
  0x56   :  { %1988 = vmatprep.subr.bf16.mxu1 %v2147_v53  ;;  %v30_v53 = vld [vmem:[%s2700_s0 + $0x78] sm:$0xff] }
  0x58   :  { %1961 = vmatpush3.bf16.msra.mxu0 %v2148_v54  ;;  %v37_v54 = vld [vmem:[%s2700_s0 + $0xb0] sm:$0xff] }
  0x59   :  { %1989 = vmatpush3.bf16.msra.mxu1 %v2149_v55  ;;  %1962 = vmatprep.subr.bf16.mxu0 %v2150_v56  ;;  %v45_v55 = vld [vmem:[%s2700_s0 + $0xf0] sm:$0xff]  ;;  %v1673_v56 = vcombine.low %v22_v50, %v30_v53 }
  0x5a   :  { %1990 = vmatprep.subr.bf16.mxu1 %v2151_v57  ;;  %v1674_v57 = vcombine.high %v22_v50, %v30_v53 }
  0x5c   :  { %1963 = vmatpush3.bf16.msra.mxu0 %v2152_v58  ;;  %v1688_v58 = vcombine.high %v37_v54, %v45_v55 }
  0x5d   :  { %1991 = vmatpush3.bf16.msra.mxu1 %v2153_v59  ;;  %1964 = vmatprep.subr.bf16.mxu0 %v2154_v60  ;;  %v38_v59 = vld [vmem:[%s2700_s0 + $0xb8] sm:$0xff] }
  0x5e   :  { %1992 = vmatprep.subr.bf16.mxu1 %v2155_v61  ;;  %v46_v60 = vld [vmem:[%s2700_s0 + $0xf8] sm:$0xff] }
  0x5f   :  { %v1690_v61 = vcombine.high %v38_v59, %v46_v60 }
  0x60   :  { %1965 = vmatpush3.bf16.msra.mxu0 %v2156_v62  ;;  %v1687_v62 = vcombine.low %v37_v54, %v45_v55 }
  0x61   :  { %1993 = vmatpush3.bf16.msra.mxu1 %v2157_v63  ;;  %2006 = vmatprep.subr.bf16.mxu0 %v2158_v8  ;;  %v1689_v63 = vcombine.low %v38_v59, %v46_v60 }
  0x62   :  { %2034 = vmatprep.subr.bf16.mxu1 %v2159_v9 }
  0x63   :  { %1467 = vmatmul.mubr.bf16.vlgmr.msra.gmra.mrb[16].mxu0 %v1667_v2  ;;  %v1658_v2 = vld [vmem:[%s2701_s2] ss:$0 sm:$0xff] }
  0x64   :  { %1516 = vmatmul.mubr.bf16.vlgmr.msra.gmra.mrb[16].mxu1 %v1669_v6  ;;  %2007 = vmatpush3.bf16.msra.mxu0 %v2160_v10 }
  0x65   :  { %2035 = vmatpush3.bf16.msra.mxu1 %v2161_v11  ;;  %2008 = vmatprep.subr.bf16.mxu0 %v2162_v12 }
  0x66   :  { %2036 = vmatprep.subr.bf16.mxu1 %v2163_v13  ;;  %1474 = vmatprep.mubr.bf16.mxu0 %v1684_v18 }
  0x67   :  { %1523 = vmatprep.mubr.bf16.mxu1 %v1686_v24 }
  0x68   :  { %2009 = vmatpush3.bf16.msra.mxu0 %v2164_v14 }
  0x69   :  { %2037 = vmatpush3.bf16.msra.mxu1 %v2165_v15  ;;  %2010 = vmatprep.subr.bf16.mxu0 %v2166_v20 }
  0x6a   :  { %2038 = vmatprep.subr.bf16.mxu1 %v2167_v21 }
  0x6b   :  { %1475 = vmatmul.mubr.bf16.gmra.mrb[20].mxu0 %v1683_v19 }
  0x6c   :  { %2011 = vmatpush3.bf16.msra.mxu0 %v2168_v25  ;;  %1524 = vmatmul.mubr.bf16.gmra.mrb[20].mxu1 %v1685_v26 }
  0x6d   :  { %2039 = vmatpush3.bf16.msra.mxu1 %v2169_v27  ;;  %2012 = vmatprep.subr.bf16.mxu0 %v2170_v28 }
  0x6e   :  { %2040 = vmatprep.subr.bf16.mxu1 %v2171_v29  ;;  %1564 = vmatprep.mubr.bf16.mxu0 %v1672_v52 }
  0x6f   :  { %1613 = vmatprep.mubr.bf16.mxu1 %v1674_v57 }
  0x70   :  { %2013 = vmatpush3.bf16.msra.mxu0 %v2172_v30 }
  0x71   :  { %2041 = vmatpush3.bf16.msra.mxu1 %v2173_v31  ;;  %2014 = vmatprep.subr.bf16.mxu0 %v2174_v32 }
  0x72   :  { %2042 = vmatprep.subr.bf16.mxu1 %v2175_v33 }
  0x74   :  { %2015 = vmatpush3.bf16.msra.mxu0 %v2176_v34 }
  0x75   :  { %2043 = vmatpush3.bf16.msra.mxu1 %v2177_v35  ;;  %2016 = vmatprep.subr.bf16.mxu0 %v2178_v36 }
  0x76   :  { %2044 = vmatprep.subr.bf16.mxu1 %v2179_v37 }
  0x78   :  { %2017 = vmatpush3.bf16.msra.mxu0 %v2180_v38 }
  0x79   :  { %2045 = vmatpush3.bf16.msra.mxu1 %v2181_v39  ;;  %2018 = vmatprep.subr.bf16.mxu0 %v2182_v40 }
  0x7a   :  { %2046 = vmatprep.subr.bf16.mxu1 %v2183_v41 }
  0x7c   :  { %2019 = vmatpush3.bf16.msra.mxu0 %v2184_v42 }
  0x7d   :  { %2047 = vmatpush3.bf16.msra.mxu1 %v2185_v43  ;;  %2020 = vmatprep.subr.bf16.mxu0 %v2186_v44 }
  0x7e   :  { %2048 = vmatprep.subr.bf16.mxu1 %v2187_v45 }
  0x80   :  { %2021 = vmatpush3.bf16.msra.mxu0 %v2188_v46 }
  0x81   :  { %2049 = vmatpush3.bf16.msra.mxu1 %v2189_v47 }
  0x83   :  { %1565 = vmatmul.mubr.bf16.vlgmr.msra.gmra.mrb[24].mxu0 %v1671_v51 }
  0x84   :  { %1614 = vmatmul.mubr.bf16.vlgmr.msra.gmra.mrb[24].mxu1 %v1673_v56  ;;  %1572 = vmatprep.mubr.bf16.mxu0 %v1688_v58 }
  0x85   :  { %1621 = vmatprep.mubr.bf16.mxu1 %v1690_v61 }
  0x8b   :  { %1573 = vmatmul.mubr.bf16.gmra.mrb[28].mxu0 %v1687_v62 }
  0x8c   :  { %1622 = vmatmul.mubr.bf16.gmra.mrb[28].mxu1 %v1689_v63 }
  0xf6   :  { %v1854_v0 = vpop.f32.mrb[0].mxu0 }
  0xf7   :  { %v1882_v1 = vpop.f32.mrb[0].mxu1  ;;  %v1855_v3 = vpop.f32.mrb[1].mxu0 }
  0xf8   :  { %v1856_v4 = vadd.f32 %v1855_v3, %v1854_v0  ;;  %v1883_v5 = vpop.f32.mrb[1].mxu1  ;;  %v1857_v6 = vpop.f32.mrb[2].mxu0 }
  0xf9   :  { %v1884_v7 = vadd.f32 %v1883_v5, %v1882_v1  ;;  %v1885_v8 = vpop.f32.mrb[2].mxu1  ;;  %v1858_v9 = vpop.f32.mrb[3].mxu0 }
  0xfa   :  { %v1273_v10 = vadd.f32 %v1856_v4, %v1658_v2  ;;  %v1859_v11 = vadd.f32 %v1858_v9, %v1857_v6  ;;  %v1886_v12 = vpop.f32.mrb[3].mxu1 }
  0xfb   :  { %v1887_v13 = vadd.f32 %v1886_v12, %v1885_v8 }
  0xfc   :  { %v1322_v14 = vadd.f32 %v1884_v7, %v1273_v10  ;;  %v1276_v15 = vadd.f32 %v1859_v11, %v1658_v2 }
  0xfe   :  { %v1325_v16 = vadd.f32 %v1887_v13, %v1276_v15  ;;  %v1860_v17 = vpop.f32.mrb[4].mxu0 }
  0xff   :  { %v1861_v18 = vpop.f32.mrb[5].mxu0  ;;  %v1888_v21 = vpop.f32.mrb[4].mxu1 }
 0x100   :  { %v1862_v19 = vadd.f32 %v1861_v18, %v1860_v17  ;;  %v1863_v20 = vpop.f32.mrb[6].mxu0  ;;  %v1889_v25 = vpop.f32.mrb[5].mxu1 }
 0x101   :  { %v1864_v22 = vpop.f32.mrb[7].mxu0  ;;  %v1890_v26 = vadd.f32 %v1889_v25, %v1888_v21  ;;  %v1891_v27 = vpop.f32.mrb[6].mxu1 }
 0x102   :  { %v1281_v23 = vadd.f32 %v1862_v19, %v1658_v2  ;;  %v1865_v24 = vadd.f32 %v1864_v22, %v1863_v20  ;;  %v1892_v29 = vpop.f32.mrb[7].mxu1 }
 0x103   :  { %v1893_v31 = vadd.f32 %v1892_v29, %v1891_v27 }
 0x104   :  { %v1284_v28 = vadd.f32 %v1865_v24, %v1658_v2  ;;  %v1330_v30 = vadd.f32 %v1890_v26, %v1281_v23 }
 0x106   :  { %v1333_v32 = vadd.f32 %v1893_v31, %v1284_v28 }
 0x116   :  { %v1910_v33 = vpop.f32.mrb[8].mxu0 }
 0x117   :  { %v1938_v34 = vpop.f32.mrb[8].mxu1  ;;  %v1911_v35 = vpop.f32.mrb[9].mxu0 }
 0x118   :  { %v1939_v36 = vpop.f32.mrb[9].mxu1  ;;  %v1912_v37 = vadd.f32 %v1911_v35, %v1910_v33  ;;  %v1913_v39 = vpop.f32.mrb[10].mxu0 }
 0x119   :  { %v1940_v38 = vadd.f32 %v1939_v36, %v1938_v34  ;;  %v1941_v40 = vpop.f32.mrb[10].mxu1  ;;  %v1914_v41 = vpop.f32.mrb[11].mxu0 }
 0x11a   :  { %v1942_v42 = vpop.f32.mrb[11].mxu1  ;;  %v1371_v43 = vadd.f32 %v1912_v37, %v1322_v14  ;;  %v1915_v44 = vadd.f32 %v1914_v41, %v1913_v39 }
 0x11b   :  { %v1943_v45 = vadd.f32 %v1942_v42, %v1941_v40 }
 0x11c   :  { %v1420_v46 = vadd.f32 %v1940_v38, %v1371_v43  ;;  %v1374_v47 = vadd.f32 %v1915_v44, %v1325_v16 }
 0x11e   :  { %v1423_v48 = vadd.f32 %v1943_v45, %v1374_v47  ;;  %v1916_v49 = vpop.f32.mrb[12].mxu0 }
 0x11f   :  { %v1917_v50 = vpop.f32.mrb[13].mxu0  ;;  %v1944_v55 = vpop.f32.mrb[12].mxu1 }
 0x120   :  { %v1918_v51 = vadd.f32 %v1917_v50, %v1916_v49  ;;  %v1919_v52 = vpop.f32.mrb[14].mxu0  ;;  %v1945_v57 = vpop.f32.mrb[13].mxu1 }
 0x121   :  { %v1920_v53 = vpop.f32.mrb[15].mxu0  ;;  %v1946_v59 = vadd.f32 %v1945_v57, %v1944_v55  ;;  %v1947_v60 = vpop.f32.mrb[14].mxu1 }
 0x122   :  { %v1379_v54 = vadd.f32 %v1918_v51, %v1330_v30  ;;  %v1921_v56 = vadd.f32 %v1920_v53, %v1919_v52  ;;  %v1948_v61 = vpop.f32.mrb[15].mxu1 }
 0x123   :  { %v1949_v63 = vadd.f32 %v1948_v61, %v1947_v60 }
 0x124   :  { %v1382_v58 = vadd.f32 %v1921_v56, %v1333_v32  ;;  %v1428_v62 = vadd.f32 %v1946_v59, %v1379_v54 }
 0x126   :  { %v1431_v0 = vadd.f32 %v1949_v63, %v1382_v58 }
 0x136   :  { %v1966_v1 = vpop.f32.mrb[16].mxu0 }
 0x137   :  { %v1994_v2 = vpop.f32.mrb[16].mxu1  ;;  %v1967_v3 = vpop.f32.mrb[17].mxu0 }
 0x138   :  { %v1968_v4 = vadd.f32 %v1967_v3, %v1966_v1  ;;  %v1995_v5 = vpop.f32.mrb[17].mxu1  ;;  %v1969_v6 = vpop.f32.mrb[18].mxu0 }
 0x139   :  { %v1996_v7 = vadd.f32 %v1995_v5, %v1994_v2  ;;  %v1997_v8 = vpop.f32.mrb[18].mxu1  ;;  %v1970_v9 = vpop.f32.mrb[19].mxu0 }
 0x13a   :  { %v1469_v10 = vadd.f32 %v1968_v4, %v1420_v46  ;;  %v1971_v11 = vadd.f32 %v1970_v9, %v1969_v6  ;;  %v1998_v12 = vpop.f32.mrb[19].mxu1 }
 0x13b   :  { %v1999_v13 = vadd.f32 %v1998_v12, %v1997_v8 }
 0x13c   :  { %v1518_v14 = vadd.f32 %v1996_v7, %v1469_v10  ;;  %v1472_v15 = vadd.f32 %v1971_v11, %v1423_v48 }
 0x13e   :  { %v1521_v16 = vadd.f32 %v1999_v13, %v1472_v15  ;;  %v1972_v17 = vpop.f32.mrb[20].mxu0 }
 0x13f   :  { %v1973_v18 = vpop.f32.mrb[21].mxu0  ;;  %v2000_v21 = vpop.f32.mrb[20].mxu1 }
 0x140   :  { %v1974_v19 = vadd.f32 %v1973_v18, %v1972_v17  ;;  %v1975_v20 = vpop.f32.mrb[22].mxu0  ;;  %v2001_v25 = vpop.f32.mrb[21].mxu1 }
 0x141   :  { %v1976_v22 = vpop.f32.mrb[23].mxu0  ;;  %v2002_v26 = vadd.f32 %v2001_v25, %v2000_v21  ;;  %v2003_v27 = vpop.f32.mrb[22].mxu1 }
 0x142   :  { %v1477_v23 = vadd.f32 %v1974_v19, %v1428_v62  ;;  %v1977_v24 = vadd.f32 %v1976_v22, %v1975_v20  ;;  %v2004_v29 = vpop.f32.mrb[23].mxu1 }
 0x143   :  { %v2005_v31 = vadd.f32 %v2004_v29, %v2003_v27 }
 0x144   :  { %v1480_v28 = vadd.f32 %v1977_v24, %v1431_v0  ;;  %v1526_v30 = vadd.f32 %v2002_v26, %v1477_v23 }
 0x146   :  { %v1529_v32 = vadd.f32 %v2005_v31, %v1480_v28 }
 0x156   :  { %v2022_v33 = vpop.f32.mrb[24].mxu0 }
 0x157   :  { %v2050_v34 = vpop.f32.mrb[24].mxu1  ;;  %v2023_v35 = vpop.f32.mrb[25].mxu0 }
 0x158   :  { %v2024_v36 = vadd.f32 %v2023_v35, %v2022_v33  ;;  %v2051_v37 = vpop.f32.mrb[25].mxu1  ;;  %v2025_v38 = vpop.f32.mrb[26].mxu0 }
 0x159   :  { %v2052_v39 = vadd.f32 %v2051_v37, %v2050_v34  ;;  %v2053_v40 = vpop.f32.mrb[26].mxu1  ;;  %v2026_v41 = vpop.f32.mrb[27].mxu0 }
 0x15a   :  { %v1567_v42 = vadd.f32 %v2024_v36, %v1518_v14  ;;  %v2027_v43 = vadd.f32 %v2026_v41, %v2025_v38  ;;  %v2054_v44 = vpop.f32.mrb[27].mxu1 }
 0x15b   :  { %v2055_v45 = vadd.f32 %v2054_v44, %v2053_v40 }
 0x15c   :  { %v1616_v46 = vadd.f32 %v2052_v39, %v1567_v42  ;;  %v1570_v47 = vadd.f32 %v2027_v43, %v1521_v16 }
 0x15e   :  { %v1619_v48 = vadd.f32 %v2055_v45, %v1570_v47  ;;  %v2028_v49 = vpop.f32.mrb[28].mxu0  ;;  %v1630_v52 = vmax.f32 %v1616_v46, 0.0 }
 0x15f   :  { %v2056_v50 = vpop.f32.mrb[28].mxu1  ;;  %v2029_v51 = vpop.f32.mrb[29].mxu0 }
 0x160   :  { %v1631_v53 = vmax.f32 %v1619_v48, 0.0  ;;  %v2030_v54 = vadd.f32 %v2029_v51, %v2028_v49  ;;  %v2057_v55 = vpop.f32.mrb[29].mxu1  ;;  %v2031_v56 = vpop.f32.mrb[30].mxu0 }
 0x161   :  { %v2058_v57 = vadd.f32 %v2057_v55, %v2056_v50  ;;  %v2059_v58 = vpop.f32.mrb[30].mxu1  ;;  %v2032_v59 = vpop.f32.mrb[31].mxu0 }
 0x162   :  { %v1830_v60 = vpack.c.bf16 %v1631_v53, %v1630_v52  ;;  %v1575_v61 = vadd.f32 %v2030_v54, %v1526_v30  ;;  %v2033_v62 = vadd.f32 %v2032_v59, %v2031_v56  ;;  %v2060_v63 = vpop.f32.mrb[31].mxu1 }
 0x163   :  { %v2061_v0 = vadd.f32 %v2060_v63, %v2059_v58 }
 0x164   :  { %1831 = vst [vmem:[%s2702_s3] sm:$0xff] %v1830_v60   ;;  %v1624_v1 = vadd.f32 %v2058_v57, %v1575_v61  ;;  %v1578_v2 = vadd.f32 %v2033_v62, %v1529_v32 }
 0x166   :  { %v1627_v3 = vadd.f32 %v2061_v0, %v1578_v2  ;;  %v1632_v4 = vmax.f32 %v1624_v1, 0.0 }
 0x168   :  { %v1633_v5 = vmax.f32 %v1627_v3, 0.0 }
 0x16a   :  { %v1835_v6 = vpack.c.bf16 %v1633_v5, %v1632_v4 }
 0x16c   :  { %1837 = vst [vmem:[%s2702_s3 + $0x8] sm:$0xff] %v1835_v6  }

// kernel: _lambda_.10
= control target key start
LH: loop header
LB: loop body
LE: loop exit
PB: predicated region body
PF: predicated region fallthrough
CT: control target
= control target key end

     0   :  { %v1928_v22 = vmov 1966171168   ;;  %v286_v24 = vlaneseq  ;;  %vm1486_vm0 = vcmask 516096   ;;  %s2379_s1 = inlined_call_operand.vmem [shape: bf16[2048,64], index: 1, kind: input, shape index: {}]   ;;  %s2380_s0 = inlined_call_operand.vmem [shape: bf16[2,2048], index: 0, kind: input, shape index: {}]   ;;  %s2381_s2 = inlined_call_operand.vmem [shape: f32[1,64], index: 2, kind: input, shape index: {}]   ;;  %s2382_s3 = inlined_call_operand.vmem [shape: bf16[2,64], index: 3, kind: output, shape index: {}]  }
   0x1   :  { %v1798_v0 = vld [vmem:[%s2379_s1 + $0x40] sm:$0xff]   ;;  %v1802_v4 = vld [vmem:[%s2379_s1 + $0x48] sm:$0xff]   ;;  %v1806_v8 = vld [vmem:[%s2379_s1 + $0x50] sm:$0xff]   ;;  %v284_v23 = vunpack.c.l.s4 %v1928_v22 }
   0x2   :  { %v1799_v1 = vld [vmem:[%s2379_s1 + $0xc0] sm:$0xff]   ;;  %1621 = vmatprep.subr.bf16.mxu0 %v1798_v0  ;;  %v1803_v5 = vld [vmem:[%s2379_s1 + $0xc8] sm:$0xff]   ;;  %v1807_v9 = vld [vmem:[%s2379_s1 + $0xd0] sm:$0xff]   ;;  %v287_v30 = vshrl.u32 %v286_v24, 7 }
   0x3   :  { %v1800_v2 = vld [vmem:[%s2379_s1] sm:$0xff]   ;;  %1643 = vmatprep.subr.bf16.mxu1 %v1799_v1  ;;  %v1804_v6 = vld [vmem:[%s2379_s1 + $0x8] sm:$0xff]   ;;  %v1808_v10 = vld [vmem:[%s2379_s1 + $0x10] sm:$0xff]   ;;  %v285_v29 = vunpack.c.0.s8 %v284_v23 }
   0x4   :  { %v1801_v3 = vld [vmem:[%s2379_s1 + $0x80] sm:$0xff]   ;;  %1622 = vmatpush3.bf16.msra.mxu0 %v1800_v2  ;;  %v1805_v7 = vld [vmem:[%s2379_s1 + $0x88] sm:$0xff]   ;;  %v1809_v11 = vld [vmem:[%s2379_s1 + $0x90] sm:$0xff]  }
   0x5   :  { %1644 = vmatpush3.bf16.msra.mxu1 %v1801_v3  ;;  %1623 = vmatprep.subr.bf16.mxu0 %v1802_v4  ;;  %v1810_v12 = vld [vmem:[%s2379_s1 + $0x58] sm:$0xff]   ;;  %v1814_v16 = vld [vmem:[%s2379_s1 + $0x60] sm:$0xff]   ;;  %v1818_v20 = vld [vmem:[%s2379_s1 + $0x68] sm:$0xff]   ;;  %v2039_v35 = vsub.s32 %v285_v29, %v287_v30 }
   0x6   :  { %1645 = vmatprep.subr.bf16.mxu1 %v1803_v5  ;;  %v1811_v13 = vld [vmem:[%s2379_s1 + $0xd8] sm:$0xff]   ;;  %v1815_v17 = vld [vmem:[%s2379_s1 + $0xe0] sm:$0xff]   ;;  %v1819_v21 = vld [vmem:[%s2379_s1 + $0xe8] sm:$0xff]  }
   0x7   :  { %v1812_v14 = vld [vmem:[%s2379_s1 + $0x18] sm:$0xff]   ;;  %v1816_v18 = vld [vmem:[%s2379_s1 + $0x20] sm:$0xff]   ;;  %v1820_v25 = vld [vmem:[%s2379_s1 + $0x28] sm:$0xff]  }
   0x8   :  { %1624 = vmatpush3.bf16.msra.mxu0 %v1804_v6  ;;  %v1813_v15 = vld [vmem:[%s2379_s1 + $0x98] sm:$0xff]   ;;  %v1817_v19 = vld [vmem:[%s2379_s1 + $0xa0] sm:$0xff]   ;;  %v1821_v26 = vld [vmem:[%s2379_s1 + $0xa8] sm:$0xff]  }
   0x9   :  { %1646 = vmatpush3.bf16.msra.mxu1 %v1805_v7  ;;  %1625 = vmatprep.subr.bf16.mxu0 %v1806_v8  ;;  %v1822_v27 = vld [vmem:[%s2379_s1 + $0x70] sm:$0xff]   ;;  %v1826_v33 = vld [vmem:[%s2379_s1 + $0x78] sm:$0xff]   ;;  %v15_v38 = vld [vmem:[%s2380_s0] sm:$0xff] }
   0xa   :  { %1647 = vmatprep.subr.bf16.mxu1 %v1807_v9  ;;  %v1823_v28 = vld [vmem:[%s2379_s1 + $0xf0] sm:$0xff]   ;;  %v1827_v34 = vld [vmem:[%s2379_s1 + $0xf8] sm:$0xff]   ;;  %v282_v39 = vcombine.high %v15_v38, %v15_v38  ;;  %v289_v40 = vrot.slane %v15_v38, %v2039_v35  ;;  %v1832_v41 = vld [vmem:[%s2379_s1 + $0x140] sm:$0xff]  }
   0xb   :  { %v1824_v31 = vld [vmem:[%s2379_s1 + $0x30] sm:$0xff]   ;;  %v1828_v36 = vld [vmem:[%s2379_s1 + $0x38] sm:$0xff]   ;;  %v1833_v42 = vld [vmem:[%s2379_s1 + $0x1c0] sm:$0xff]  }
   0xc   :  { %1626 = vmatpush3.bf16.msra.mxu0 %v1808_v10  ;;  %v1825_v32 = vld [vmem:[%s2379_s1 + $0xb0] sm:$0xff]   ;;  %v1829_v37 = vld [vmem:[%s2379_s1 + $0xb8] sm:$0xff]   ;;  %v297_v43 = vcombine.high %v289_v40, %v289_v40  ;;  %v305_v44 = vrot.slane %v289_v40, %v2039_v35  ;;  %v2059_v45 = vrot.slane %v282_v39, %v2039_v35  ;;  %v1834_v47 = vld [vmem:[%s2379_s1 + $0x100] sm:$0xff]  }
   0xd   :  { %1648 = vmatpush3.bf16.msra.mxu1 %v1809_v11  ;;  %1627 = vmatprep.subr.bf16.mxu0 %v1810_v12  ;;  %v1836_v50 = vld [vmem:[%s2379_s1 + $0x148] sm:$0xff]   ;;  %v1835_v52 = vld [vmem:[%s2379_s1 + $0x180] sm:$0xff]   ;;  %v1840_v57 = vld [vmem:[%s2379_s1 + $0x150] sm:$0xff]  }
   0xe   :  { %1649 = vmatprep.subr.bf16.mxu1 %v1811_v13  ;;  %v319_v46 = vrot.slane %v297_v43, %v2039_v35  ;;  %v298_v48 = vcombine.high %v2059_v45, %v2059_v45  ;;  %v327_v49 = vcombine.high %v305_v44, %v305_v44  ;;  %v1837_v54 = vld [vmem:[%s2379_s1 + $0x1c8] sm:$0xff]   ;;  %v1841_v59 = vld [vmem:[%s2379_s1 + $0x1d0] sm:$0xff]   ;;  %v1844_v61 = vld [vmem:[%s2379_s1 + $0x158] sm:$0xff]  }
   0xf   :  { %v1838_v55 = vld [vmem:[%s2379_s1 + $0x108] sm:$0xff]   ;;  %v1842_v60 = vld [vmem:[%s2379_s1 + $0x110] sm:$0xff]   ;;  %v1845_v63 = vld [vmem:[%s2379_s1 + $0x1d8] sm:$0xff]  }
  0x10   :  { %1628 = vmatpush3.bf16.msra.mxu0 %v1812_v14  ;;  %1196 = vmatprep.mubr.bf16.mxu0 %v319_v46  ;;  %v329_v51 = vcombine.high %v319_v46, %v319_v46  ;;  %v326_v53 = vrot.slane %v298_v48, %v2039_v35  ;;  %v1839_v58 = vld [vmem:[%s2379_s1 + $0x188] sm:$0xff]   ;;  %v1843_v62 = vld [vmem:[%s2379_s1 + $0x190] sm:$0xff]   ;;  %v1846_v0 = vld [vmem:[%s2379_s1 + $0x118] sm:$0xff]  }
  0x11   :  { %1650 = vmatpush3.bf16.msra.mxu1 %v1813_v15  ;;  %1629 = vmatprep.subr.bf16.mxu0 %v1814_v16  ;;  %v1848_v1 = vld [vmem:[%s2379_s1 + $0x160] sm:$0xff]   ;;  %v1847_v2 = vld [vmem:[%s2379_s1 + $0x198] sm:$0xff]   ;;  %v2119_v5 = vld [vmem:[%s2380_s0 + $0x8] sm:$0xff] }
  0x12   :  { %1651 = vmatprep.subr.bf16.mxu1 %v1815_v17  ;;  %1236 = vmatprep.mubr.bf16.mxu1 %v329_v51  ;;  %v330_v56 = vcombine.high %v326_v53, %v326_v53  ;;  %v1849_v3 = vld [vmem:[%s2379_s1 + $0x1e0] sm:$0xff]   ;;  %v1852_v6 = vld [vmem:[%s2379_s1 + $0x168] sm:$0xff]   ;;  %v1856_v10 = vld [vmem:[%s2379_s1 + $0x170] sm:$0xff]   ;;  %v2141_v12 = vrot.slane %v2119_v5, %v2039_v35  ;;  %v331_v46 = vcombine.high %v2119_v5, %v2119_v5 }
  0x13   :  { %v1850_v4 = vld [vmem:[%s2379_s1 + $0x120] sm:$0xff]   ;;  %v1853_v8 = vld [vmem:[%s2379_s1 + $0x1e8] sm:$0xff]   ;;  %v1857_v13 = vld [vmem:[%s2379_s1 + $0x1f0] sm:$0xff]  }
  0x14   :  { %1630 = vmatpush3.bf16.msra.mxu0 %v1816_v18  ;;  %v1851_v7 = vld [vmem:[%s2379_s1 + $0x1a0] sm:$0xff]   ;;  %v1854_v9 = vld [vmem:[%s2379_s1 + $0x128] sm:$0xff]   ;;  %v1858_v14 = vld [vmem:[%s2379_s1 + $0x130] sm:$0xff]   ;;  %v346_v17 = vcombine.high %v2141_v12, %v2141_v12 }
  0x15   :  { %1652 = vmatpush3.bf16.msra.mxu1 %v1817_v19  ;;  %1631 = vmatprep.subr.bf16.mxu0 %v1818_v20  ;;  %v1855_v11 = vld [vmem:[%s2379_s1 + $0x1a8] sm:$0xff]   ;;  %v1860_v15 = vld [vmem:[%s2379_s1 + $0x178] sm:$0xff]   ;;  %v1859_v16 = vld [vmem:[%s2379_s1 + $0x1b0] sm:$0xff]   ;;  %v312_v20 = vrot.slane %v2059_v45, %v2039_v35 }
  0x16   :  { %1653 = vmatprep.subr.bf16.mxu1 %v1819_v21  ;;  %v1861_v18 = vld [vmem:[%s2379_s1 + $0x1f8] sm:$0xff]   ;;  %v1864_v21 = vld [vmem:[%s2379_s1 + $0x240] sm:$0xff]   ;;  %v368_v23 = vrot.slane %v346_v17, %v2039_v35  ;;  %v1869_v30 = vld [vmem:[%s2379_s1 + $0x2c8] sm:$0xff]  }
  0x17   :  { %v1862_v19 = vld [vmem:[%s2379_s1 + $0x138] sm:$0xff]   ;;  %v1865_v24 = vld [vmem:[%s2379_s1 + $0x2c0] sm:$0xff]   ;;  %v1875_v38 = vld [vmem:[%s2379_s1 + $0x290] sm:$0xff]  }
  0x18   :  { %1632 = vmatpush3.bf16.msra.mxu0 %v1820_v25  ;;  %v1863_v22 = vld [vmem:[%s2379_s1 + $0x1b8] sm:$0xff]   ;;  %v1866_v25 = vld [vmem:[%s2379_s1 + $0x200] sm:$0xff]   ;;  %v378_v29 = vcombine.high %v368_v23, %v368_v23  ;;  %v1884_v45 = vld [vmem:[%s2379_s1 + $0x268] sm:$0xff]  }
  0x19   :  { %1654 = vmatpush3.bf16.msra.mxu1 %v1821_v26  ;;  %1633 = vmatprep.subr.bf16.mxu0 %v1822_v27  ;;  %v328_v26 = vcombine.high %v312_v20, %v312_v20  ;;  %v1868_v27 = vld [vmem:[%s2379_s1 + $0x248] sm:$0xff]   ;;  %v1877_v39 = vld [vmem:[%s2379_s1 + $0x2d8] sm:$0xff]   ;;  %v1881_v43 = vld [vmem:[%s2379_s1 + $0x2e0] sm:$0xff]  }
  0x1a   :  { %1655 = vmatprep.subr.bf16.mxu1 %v1823_v28  ;;  %v1867_v28 = vld [vmem:[%s2379_s1 + $0x280] sm:$0xff]   ;;  %v1878_v40 = vld [vmem:[%s2379_s1 + $0x218] sm:$0xff]   ;;  %v1885_v48 = vld [vmem:[%s2379_s1 + $0x2e8] sm:$0xff]  }
  0x1b   :  { %v1887_v51 = vld [vmem:[%s2379_s1 + $0x2a8] sm:$0xff]   ;;  %v1911_v17 = vld [vmem:[%s2379_s1 + $0x398] sm:$0xff]  }
  0x1c   :  { %1634 = vmatpush3.bf16.msra.mxu0 %v1824_v31  ;;  %v1870_v31 = vld [vmem:[%s2379_s1 + $0x208] sm:$0xff]  }
  0x1d   :  { %1656 = vmatpush3.bf16.msra.mxu1 %v1825_v32  ;;  %1635 = vmatprep.subr.bf16.mxu0 %v1826_v33  ;;  %v1872_v32 = vld [vmem:[%s2379_s1 + $0x250] sm:$0xff]   ;;  %v1871_v33 = vld [vmem:[%s2379_s1 + $0x288] sm:$0xff]  }
  0x1e   :  { %1657 = vmatprep.subr.bf16.mxu1 %v1827_v34  ;;  %v1873_v34 = vld [vmem:[%s2379_s1 + $0x2d0] sm:$0xff]  }
  0x20   :  { %1636 = vmatpush3.bf16.msra.mxu0 %v1828_v36  ;;  %v1874_v36 = vld [vmem:[%s2379_s1 + $0x210] sm:$0xff]  }
  0x21   :  { %1658 = vmatpush3.bf16.msra.mxu1 %v1829_v37  ;;  %1665 = vmatprep.subr.bf16.mxu0 %v1832_v41  ;;  %v1876_v37 = vld [vmem:[%s2379_s1 + $0x258] sm:$0xff]   ;;  %v1880_v41 = vld [vmem:[%s2379_s1 + $0x260] sm:$0xff]  }
  0x22   :  { %1687 = vmatprep.subr.bf16.mxu1 %v1833_v42  ;;  %v1879_v42 = vld [vmem:[%s2379_s1 + $0x298] sm:$0xff]  }
  0x23   :  { %1197 = vmatmul.mubr.bf16.vlgmr.msra.gmra.mrb[0].mxu0 %v305_v44  ;;  %v1882_v44 = vld [vmem:[%s2379_s1 + $0x220] sm:$0xff]  }
  0x24   :  { %1666 = vmatpush3.bf16.msra.mxu0 %v1834_v47  ;;  %1237 = vmatmul.mubr.bf16.vlgmr.msra.gmra.mrb[0].mxu1 %v327_v49  ;;  %v1883_v47 = vld [vmem:[%s2379_s1 + $0x2a0] sm:$0xff]   ;;  %v1886_v49 = vld [vmem:[%s2379_s1 + $0x228] sm:$0xff]  }
  0x25   :  { %1667 = vmatprep.subr.bf16.mxu0 %v1836_v50  ;;  %1688 = vmatpush3.bf16.msra.mxu1 %v1835_v52  ;;  %v1888_v50 = vld [vmem:[%s2379_s1 + $0x270] sm:$0xff]   ;;  %v2247_v52 = vrot.slane %v331_v46, %v2039_v35 }
  0x26   :  { %1276 = vmatprep.mubr.bf16.mxu0 %v326_v53  ;;  %1689 = vmatprep.subr.bf16.mxu1 %v1837_v54  ;;  %v1889_v53 = vld [vmem:[%s2379_s1 + $0x2f0] sm:$0xff]  }
  0x27   :  { %1316 = vmatprep.mubr.bf16.mxu1 %v330_v56  ;;  %v1890_v54 = vld [vmem:[%s2379_s1 + $0x230] sm:$0xff]  }
  0x28   :  { %1668 = vmatpush3.bf16.msra.mxu0 %v1838_v55  ;;  %v1892_v55 = vld [vmem:[%s2379_s1 + $0x278] sm:$0xff]   ;;  %v1891_v56 = vld [vmem:[%s2379_s1 + $0x2b0] sm:$0xff]  }
  0x29   :  { %1669 = vmatprep.subr.bf16.mxu0 %v1840_v57  ;;  %1690 = vmatpush3.bf16.msra.mxu1 %v1839_v58  ;;  %v347_v57 = vcombine.high %v2247_v52, %v2247_v52  ;;  %v1893_v58 = vld [vmem:[%s2379_s1 + $0x2f8] sm:$0xff]  }
  0x2a   :  { %1691 = vmatprep.subr.bf16.mxu1 %v1841_v59  ;;  %v1894_v59 = vld [vmem:[%s2379_s1 + $0x238] sm:$0xff]  }
  0x2c   :  { %1670 = vmatpush3.bf16.msra.mxu0 %v1842_v60  ;;  %v354_v60 = vrot.slane %v2141_v12, %v2039_v35  ;;  %v1908_v12 = vld [vmem:[%s2379_s1 + $0x358] sm:$0xff]  }
  0x2d   :  { %1671 = vmatprep.subr.bf16.mxu0 %v1844_v61  ;;  %1692 = vmatpush3.bf16.msra.mxu1 %v1843_v62  ;;  %v1896_v61 = vld [vmem:[%s2379_s1 + $0x340] sm:$0xff]   ;;  %v1895_v62 = vld [vmem:[%s2379_s1 + $0x2b8] sm:$0xff]  }
  0x2e   :  { %1693 = vmatprep.subr.bf16.mxu1 %v1845_v63  ;;  %v375_v63 = vrot.slane %v347_v57, %v2039_v35 }
  0x30   :  { %1672 = vmatpush3.bf16.msra.mxu0 %v1846_v0  ;;  %v1897_v0 = vld [vmem:[%s2379_s1 + $0x3c0] sm:$0xff]   ;;  %v379_v5 = vcombine.high %v375_v63, %v375_v63 }
  0x31   :  { %1673 = vmatprep.subr.bf16.mxu0 %v1848_v1  ;;  %1694 = vmatpush3.bf16.msra.mxu1 %v1847_v2  ;;  %v1898_v1 = vld [vmem:[%s2379_s1 + $0x300] sm:$0xff]   ;;  %v376_v2 = vcombine.high %v354_v60, %v354_v60 }
  0x32   :  { %1695 = vmatprep.subr.bf16.mxu1 %v1849_v3  ;;  %v1900_v3 = vld [vmem:[%s2379_s1 + $0x348] sm:$0xff]  }
  0x34   :  { %1674 = vmatpush3.bf16.msra.mxu0 %v1850_v4  ;;  %v1899_v4 = vld [vmem:[%s2379_s1 + $0x380] sm:$0xff]  }
  0x35   :  { %1675 = vmatprep.subr.bf16.mxu0 %v1852_v6  ;;  %1696 = vmatpush3.bf16.msra.mxu1 %v1851_v7  ;;  %v1901_v6 = vld [vmem:[%s2379_s1 + $0x3c8] sm:$0xff]  }
  0x36   :  { %1697 = vmatprep.subr.bf16.mxu1 %v1853_v8  ;;  %v1902_v7 = vld [vmem:[%s2379_s1 + $0x308] sm:$0xff]   ;;  %v1904_v8 = vld [vmem:[%s2379_s1 + $0x350] sm:$0xff]  }
  0x38   :  { %1676 = vmatpush3.bf16.msra.mxu0 %v1854_v9  ;;  %v1903_v9 = vld [vmem:[%s2379_s1 + $0x388] sm:$0xff]  }
  0x39   :  { %1677 = vmatprep.subr.bf16.mxu0 %v1856_v10  ;;  %1698 = vmatpush3.bf16.msra.mxu1 %v1855_v11  ;;  %v1905_v10 = vld [vmem:[%s2379_s1 + $0x3d0] sm:$0xff]  }
  0x3a   :  { %1699 = vmatprep.subr.bf16.mxu1 %v1857_v13  ;;  %v1906_v11 = vld [vmem:[%s2379_s1 + $0x310] sm:$0xff]  }
  0x3b   :  { %v1907_v13 = vld [vmem:[%s2379_s1 + $0x390] sm:$0xff]  }
  0x3c   :  { %1678 = vmatpush3.bf16.msra.mxu0 %v1858_v14  ;;  %v1909_v14 = vld [vmem:[%s2379_s1 + $0x3d8] sm:$0xff]  }
  0x3d   :  { %1679 = vmatprep.subr.bf16.mxu0 %v1860_v15  ;;  %1700 = vmatpush3.bf16.msra.mxu1 %v1859_v16  ;;  %v1910_v15 = vld [vmem:[%s2379_s1 + $0x318] sm:$0xff]   ;;  %v1912_v16 = vld [vmem:[%s2379_s1 + $0x360] sm:$0xff]  }
  0x3e   :  { %1701 = vmatprep.subr.bf16.mxu1 %v1861_v18  ;;  %v1913_v18 = vld [vmem:[%s2379_s1 + $0x3e0] sm:$0xff]  }
  0x40   :  { %1680 = vmatpush3.bf16.msra.mxu0 %v1862_v19  ;;  %v1914_v19 = vld [vmem:[%s2379_s1 + $0x320] sm:$0xff]  }
  0x41   :  { %1709 = vmatprep.subr.bf16.mxu0 %v1864_v21  ;;  %1702 = vmatpush3.bf16.msra.mxu1 %v1863_v22  ;;  %v1915_v21 = vld [vmem:[%s2379_s1 + $0x3a0] sm:$0xff]   ;;  %v1917_v22 = vld [vmem:[%s2379_s1 + $0x3e8] sm:$0xff]  }
  0x42   :  { %1731 = vmatprep.subr.bf16.mxu1 %v1865_v24  ;;  %v1920_v24 = vld [vmem:[%s2379_s1 + $0x370] sm:$0xff]  }
  0x43   :  { %1277 = vmatmul.mubr.bf16.vlgmr.msra.gmra.mrb[4].mxu0 %v312_v20  ;;  %v1916_v20 = vld [vmem:[%s2379_s1 + $0x368] sm:$0xff]  }
  0x44   :  { %1710 = vmatpush3.bf16.msra.mxu0 %v1866_v25  ;;  %1356 = vmatprep.mubr.bf16.mxu0 %v368_v23  ;;  %v1918_v23 = vld [vmem:[%s2379_s1 + $0x328] sm:$0xff]  }
  0x45   :  { %1317 = vmatmul.mubr.bf16.vlgmr.msra.gmra.mrb[4].mxu1 %v328_v26  ;;  %1711 = vmatprep.subr.bf16.mxu0 %v1868_v27  ;;  %v1919_v25 = vld [vmem:[%s2379_s1 + $0x3a8] sm:$0xff]   ;;  %v1921_v26 = vld [vmem:[%s2379_s1 + $0x3f0] sm:$0xff]  }
  0x46   :  { %1732 = vmatpush3.bf16.msra.mxu1 %v1867_v28  ;;  %1396 = vmatprep.mubr.bf16.mxu1 %v378_v29  ;;  %v1922_v27 = vld [vmem:[%s2379_s1 + $0x330] sm:$0xff]   ;;  %v1924_v28 = vld [vmem:[%s2379_s1 + $0x378] sm:$0xff]  }
  0x47   :  { %1733 = vmatprep.subr.bf16.mxu1 %v1869_v30  ;;  %v1923_v29 = vld [vmem:[%s2379_s1 + $0x3b0] sm:$0xff]   ;;  %v1925_v30 = vld [vmem:[%s2379_s1 + $0x3f8] sm:$0xff]  }
  0x48   :  { %1712 = vmatpush3.bf16.msra.mxu0 %v1870_v31  ;;  %v1926_v31 = vld [vmem:[%s2379_s1 + $0x338] sm:$0xff]  }
  0x49   :  { %1713 = vmatprep.subr.bf16.mxu0 %v1872_v32  ;;  %v361_v32 = vrot.slane %v2247_v52, %v2039_v35 }
  0x4a   :  { %1734 = vmatpush3.bf16.msra.mxu1 %v1871_v33  ;;  %v1927_v33 = vld [vmem:[%s2379_s1 + $0x3b8] sm:$0xff]  }
  0x4b   :  { %1735 = vmatprep.subr.bf16.mxu1 %v1873_v34  ;;  %v377_v34 = vcombine.high %v361_v32, %v361_v32 }
  0x4c   :  { %1714 = vmatpush3.bf16.msra.mxu0 %v1874_v36 }
  0x4d   :  { %1715 = vmatprep.subr.bf16.mxu0 %v1876_v37  ;;  %v1492_v37 = vld [vmem:[%s2381_s2] ss:$0 sm:$0xff] }
  0x4e   :  { %1736 = vmatpush3.bf16.msra.mxu1 %v1875_v38 }
  0x4f   :  { %1737 = vmatprep.subr.bf16.mxu1 %v1877_v39 }
  0x50   :  { %1716 = vmatpush3.bf16.msra.mxu0 %v1878_v40 }
  0x51   :  { %1717 = vmatprep.subr.bf16.mxu0 %v1880_v41 }
  0x52   :  { %1738 = vmatpush3.bf16.msra.mxu1 %v1879_v42 }
  0x53   :  { %1739 = vmatprep.subr.bf16.mxu1 %v1881_v43 }
  0x54   :  { %1718 = vmatpush3.bf16.msra.mxu0 %v1882_v44 }
  0x55   :  { %1719 = vmatprep.subr.bf16.mxu0 %v1884_v45 }
  0x56   :  { %1740 = vmatpush3.bf16.msra.mxu1 %v1883_v47 }
  0x57   :  { %1741 = vmatprep.subr.bf16.mxu1 %v1885_v48 }
  0x58   :  { %1720 = vmatpush3.bf16.msra.mxu0 %v1886_v49 }
  0x59   :  { %1721 = vmatprep.subr.bf16.mxu0 %v1888_v50 }
  0x5a   :  { %1742 = vmatpush3.bf16.msra.mxu1 %v1887_v51 }
  0x5b   :  { %1743 = vmatprep.subr.bf16.mxu1 %v1889_v53 }
  0x5c   :  { %1722 = vmatpush3.bf16.msra.mxu0 %v1890_v54 }
  0x5d   :  { %1723 = vmatprep.subr.bf16.mxu0 %v1892_v55 }
  0x5e   :  { %1744 = vmatpush3.bf16.msra.mxu1 %v1891_v56 }
  0x5f   :  { %1745 = vmatprep.subr.bf16.mxu1 %v1893_v58 }
  0x60   :  { %1724 = vmatpush3.bf16.msra.mxu0 %v1894_v59 }
  0x61   :  { %1753 = vmatprep.subr.bf16.mxu0 %v1896_v61 }
  0x62   :  { %1746 = vmatpush3.bf16.msra.mxu1 %v1895_v62 }
  0x63   :  { %1357 = vmatmul.mubr.bf16.vlgmr.msra.gmra.mrb[8].mxu0 %v354_v60  ;;  %1775 = vmatprep.subr.bf16.mxu1 %v1897_v0 }
  0x64   :  { %1754 = vmatpush3.bf16.msra.mxu0 %v1898_v1  ;;  %1436 = vmatprep.mubr.bf16.mxu0 %v375_v63 }
  0x65   :  { %1397 = vmatmul.mubr.bf16.vlgmr.msra.gmra.mrb[8].mxu1 %v376_v2  ;;  %1755 = vmatprep.subr.bf16.mxu0 %v1900_v3 }
  0x66   :  { %1776 = vmatpush3.bf16.msra.mxu1 %v1899_v4  ;;  %1476 = vmatprep.mubr.bf16.mxu1 %v379_v5 }
  0x67   :  { %1777 = vmatprep.subr.bf16.mxu1 %v1901_v6 }
  0x68   :  { %1756 = vmatpush3.bf16.msra.mxu0 %v1902_v7 }
  0x69   :  { %1757 = vmatprep.subr.bf16.mxu0 %v1904_v8 }
  0x6a   :  { %1778 = vmatpush3.bf16.msra.mxu1 %v1903_v9 }
  0x6b   :  { %1779 = vmatprep.subr.bf16.mxu1 %v1905_v10 }
  0x6c   :  { %1758 = vmatpush3.bf16.msra.mxu0 %v1906_v11 }
  0x6d   :  { %1759 = vmatprep.subr.bf16.mxu0 %v1908_v12 }
  0x6e   :  { %1780 = vmatpush3.bf16.msra.mxu1 %v1907_v13 }
  0x6f   :  { %1781 = vmatprep.subr.bf16.mxu1 %v1909_v14 }
  0x70   :  { %1760 = vmatpush3.bf16.msra.mxu0 %v1910_v15 }
  0x71   :  { %1761 = vmatprep.subr.bf16.mxu0 %v1912_v16 }
  0x72   :  { %1782 = vmatpush3.bf16.msra.mxu1 %v1911_v17 }
  0x73   :  { %1783 = vmatprep.subr.bf16.mxu1 %v1913_v18 }
  0x74   :  { %1762 = vmatpush3.bf16.msra.mxu0 %v1914_v19 }
  0x75   :  { %1763 = vmatprep.subr.bf16.mxu0 %v1916_v20 }
  0x76   :  { %1784 = vmatpush3.bf16.msra.mxu1 %v1915_v21 }
  0x77   :  { %1785 = vmatprep.subr.bf16.mxu1 %v1917_v22 }
  0x78   :  { %1764 = vmatpush3.bf16.msra.mxu0 %v1918_v23 }
  0x79   :  { %1765 = vmatprep.subr.bf16.mxu0 %v1920_v24 }
  0x7a   :  { %1786 = vmatpush3.bf16.msra.mxu1 %v1919_v25 }
  0x7b   :  { %1787 = vmatprep.subr.bf16.mxu1 %v1921_v26 }
  0x7c   :  { %1766 = vmatpush3.bf16.msra.mxu0 %v1922_v27 }
  0x7d   :  { %1767 = vmatprep.subr.bf16.mxu0 %v1924_v28 }
  0x7e   :  { %1788 = vmatpush3.bf16.msra.mxu1 %v1923_v29 }
  0x7f   :  { %1789 = vmatprep.subr.bf16.mxu1 %v1925_v30 }
  0x80   :  { %1768 = vmatpush3.bf16.msra.mxu0 %v1926_v31 }
  0x82   :  { %1790 = vmatpush3.bf16.msra.mxu1 %v1927_v33 }
  0x83   :  { %1437 = vmatmul.mubr.bf16.vlgmr.msra.gmra.mrb[12].mxu0 %v361_v32 }
  0x85   :  { %1477 = vmatmul.mubr.bf16.vlgmr.msra.gmra.mrb[12].mxu1 %v377_v34 }
  0xf6   :  { %v1637_v36 = vpop.f32.mrb[0].mxu0 }
  0xf7   :  { %v1638_v38 = vpop.f32.mrb[1].mxu0  ;;  %v1659_v39 = vpop.f32.mrb[0].mxu1 }
  0xf8   :  { %v1639_v40 = vadd.f32 %v1638_v38, %v1637_v36  ;;  %v1640_v35 = vpop.f32.mrb[2].mxu0  ;;  %v1660_v41 = vpop.f32.mrb[1].mxu1 }
  0xf9   :  { %v1641_v42 = vpop.f32.mrb[3].mxu0  ;;  %v1661_v44 = vadd.f32 %v1660_v41, %v1659_v39  ;;  %v1662_v45 = vpop.f32.mrb[2].mxu1 }
  0xfa   :  { %v1199_v43 = vadd.f32 %v1639_v40, %v1492_v37  ;;  %v1663_v46 = vpop.f32.mrb[3].mxu1 }
  0xfc   :  { %v1239_v47 = vadd.f32 %v1661_v44, %v1199_v43 }
 0x116   :  { %v1681_v48 = vpop.f32.mrb[4].mxu0 }
 0x117   :  { %v1682_v49 = vpop.f32.mrb[5].mxu0 }
 0x118   :  { %v1703_v50 = vpop.f32.mrb[4].mxu1  ;;  %v1683_v51 = vadd.f32 %v1682_v49, %v1681_v48  ;;  %v1684_v52 = vpop.f32.mrb[6].mxu0 }
 0x119   :  { %v1704_v53 = vpop.f32.mrb[5].mxu1  ;;  %v1685_v54 = vpop.f32.mrb[7].mxu0 }
 0x11a   :  { %v1279_v55 = vadd.f32 %v1683_v51, %v1239_v47  ;;  %v1705_v56 = vadd.f32 %v1704_v53, %v1703_v50  ;;  %v1706_v57 = vpop.f32.mrb[6].mxu1 }
 0x11b   :  { %v1707_v58 = vpop.f32.mrb[7].mxu1 }
 0x11c   :  { %v1319_v59 = vadd.f32 %v1705_v56, %v1279_v55 }
 0x136   :  { %v1725_v60 = vpop.f32.mrb[8].mxu0 }
 0x137   :  { %v1726_v61 = vpop.f32.mrb[9].mxu0 }
 0x138   :  { %v1747_v62 = vpop.f32.mrb[8].mxu1  ;;  %v1727_v63 = vadd.f32 %v1726_v61, %v1725_v60  ;;  %v1728_v0 = vpop.f32.mrb[10].mxu0 }
 0x139   :  { %v1748_v1 = vpop.f32.mrb[9].mxu1  ;;  %v1729_v2 = vpop.f32.mrb[11].mxu0 }
 0x13a   :  { %v1359_v3 = vadd.f32 %v1727_v63, %v1319_v59  ;;  %v1749_v4 = vadd.f32 %v1748_v1, %v1747_v62  ;;  %v1750_v5 = vpop.f32.mrb[10].mxu1 }
 0x13b   :  { %v1751_v6 = vpop.f32.mrb[11].mxu1 }
 0x13c   :  { %v1399_v7 = vadd.f32 %v1749_v4, %v1359_v3 }
 0x156   :  { %v1769_v8 = vpop.f32.mrb[12].mxu0 }
 0x157   :  { %v1770_v9 = vpop.f32.mrb[13].mxu0 }
 0x158   :  { %v1791_v10 = vpop.f32.mrb[12].mxu1  ;;  %v1771_v11 = vadd.f32 %v1770_v9, %v1769_v8  ;;  %v1772_v12 = vpop.f32.mrb[14].mxu0 }
 0x159   :  { %v1792_v13 = vpop.f32.mrb[13].mxu1  ;;  %v1773_v14 = vpop.f32.mrb[15].mxu0 }
 0x15a   :  { %v1439_v15 = vadd.f32 %v1771_v11, %v1399_v7  ;;  %v1793_v16 = vadd.f32 %v1792_v13, %v1791_v10  ;;  %v1794_v17 = vpop.f32.mrb[14].mxu1 }
 0x15b   :  { %v1795_v18 = vpop.f32.mrb[15].mxu1 }
 0x15c   :  { %v1479_v19 = vadd.f32 %v1793_v16, %v1439_v15 }
 0x15e   :  { %v1484_v20 = vmax.f32 %v1479_v19, 0.0 }
 0x160   :  { %v1485_v21 = vpack.c.bf16 %v1484_v20, %v1484_v20 }
 0x162   :  { %1487 = vst.msk [vmem:[%s2382_s3] sm:$0x1] %vm1486_vm0, %v1485_v21 }

</bundles_post_ra>
